<compile_context>
chip_gen: v7x
topology: tpu7x:2x2x1
jax: 0.10.0
libtpu: 0.0.40
codegen_flags: <defaults>
</compile_context>

<pallas_src>
import functools

import jax
import jax.numpy as jnp
from jax import lax
from jax.experimental import pallas as pl
from jax.experimental.pallas import tpu as pltpu


def _block_kernel(x_ref, ln1_ref, wqkv_ref, bqkv_ref, dwwqkv_ref, dwbqkv_ref,
                  temp_ref, pow_ref, pob_ref, ln2_ref, win_ref, bin_ref,
                  dwwin_ref, dwbin_ref, fow_ref, fob_ref,
                  out_ref, *, H, W, num_heads):
    f32 = jnp.float32
    bf16 = jnp.bfloat16
    HW = H * W
    C = x_ref.shape[1]
    C3 = wqkv_ref.shape[0]           # 3 * C     (fused q|k|v output channels)
    HID2 = win_ref.shape[0]          # 2 * hidden (fused gate|value channels)
    HID = HID2 // 2
    dh = C // num_heads

    x = x_ref[0]                                                    # (C, HW) f32

    # ---- per-lane boundary masks for the 3x3 depthwise conv (built once) ------
    # h/w indices recovered with f32 math (exact for these magnitudes) to avoid
    # integer vector div/mod.
    idxf = lax.broadcasted_iota(jnp.int32, (1, HW), 1).astype(f32)
    rowf = jnp.floor(idxf * (1.0 / W)) if (W & (W - 1)) == 0 else jnp.floor(idxf / W)
    colf = idxf - rowf * W
    masks = []
    for di in range(3):
        for dj in range(3):
            oi, oj = di - 1, dj - 1
            if oi == 0 and oj == 0:
                masks.append(None)
                continue
            conds = []
            if oi < 0:
                conds.append(rowf >= float(-oi))
            if oi > 0:
                conds.append(rowf < float(H - oi))
            if oj < 0:
                conds.append(colf >= float(-oj))
            if oj > 0:
                conds.append(colf < float(W - oj))
            m = conds[0]
            for c in conds[1:]:
                m = m & c
            masks.append(m.astype(f32))

    def layer_norm(t, wb_ref):
        # WithBias LayerNorm over channels (sublane axis); single-pass statistics.
        mu = jnp.mean(t, axis=0, keepdims=True)
        m2 = jnp.mean(t * t, axis=0, keepdims=True)
        var = m2 - mu * mu
        return (t - mu) * lax.rsqrt(var + 1e-5) * wb_ref[0] + wb_ref[1]

    def dwconv3x3(t, w9_ref, b_ref):
        # Depthwise 3x3, pad=1, on a (cg, HW) slab.  Each tap is a static lane
        # roll (XLU) of the whole slab + a (1, HW) boundary mask; no pad buffer.
        cg = t.shape[0]
        acc = jnp.zeros((cg, HW), f32) + b_ref[...]
        for di in range(3):
            for dj in range(3):
                tap = 3 * di + dj
                oi, oj = di - 1, dj - 1
                w_tap = w9_ref[:, tap:tap + 1]                      # (cg, 1)
                if oi == 0 and oj == 0:
                    acc = acc + t * w_tap
                else:
                    off = oi * W + oj
                    shifted = pltpu.roll(t, (-off) % HW, axis=1)    # out[i]=t[i+off]
                    acc = acc + shifted * w_tap * masks[tap]
        return acc

    # ------------------------- attention (MDTA) branch -------------------------
    xn = layer_norm(x, ln1_ref)
    qkv = jnp.dot(wqkv_ref[...], xn.astype(bf16),
                  preferred_element_type=f32) + bqkv_ref[...]       # (3C, HW)
    qkv = dwconv3x3(qkv, dwwqkv_ref, dwbqkv_ref)

    q = qkv[0:C, :]
    k = qkv[C:2 * C, :]
    v = qkv[2 * C:C3, :]

    # F.normalize(dim=-1): unit L2 norm per (head, channel) row over spatial lanes.
    qn = q / jnp.maximum(jnp.sqrt(jnp.sum(q * q, axis=1, keepdims=True)), 1e-12)
    kn = k / jnp.maximum(jnp.sqrt(jnp.sum(k * k, axis=1, keepdims=True)), 1e-12)
    qn = qn * temp_ref[...]                 # fold per-head temperature into q

    o_heads = []
    for h in range(num_heads):
        hs = h * dh
        qh = qn[hs:hs + dh, :].astype(bf16)
        kh = kn[hs:hs + dh, :].astype(bf16)
        vh = v[hs:hs + dh, :].astype(bf16)
        a = lax.dot_general(qh, kh, (((1,), (1,)), ((), ())),
                            preferred_element_type=f32)             # (dh, dh), K=HW
        a = jnp.exp(a - jnp.max(a, axis=-1, keepdims=True))
        a = a * pl.reciprocal(jnp.sum(a, axis=-1, keepdims=True), approx=True)
        o_heads.append(lax.dot_general(a.astype(bf16), vh,
                                       (((1,), (0,)), ((), ())),
                                       preferred_element_type=f32)) # (dh, HW)
    o = jnp.concatenate(o_heads, axis=0)                            # (C, HW)
    # Output projection hoisted out of the head loop: one (C,C)@(C,HW) matmul.
    x = x + jnp.dot(pow_ref[...], o.astype(bf16),
                    preferred_element_type=f32) + pob_ref[...]

    # ------------------------- feed-forward (GDFN) branch ----------------------
    xn2 = layer_norm(x, ln2_ref)
    t = jnp.dot(win_ref[...], xn2.astype(bf16),
                preferred_element_type=f32) + bin_ref[...]          # (2*HID, HW)
    t = dwconv3x3(t, dwwin_ref, dwbin_ref)
    x1 = t[0:HID, :]
    x2 = t[HID:HID2, :]
    # tanh-approx GELU (EUP tanh); exact-erf GELU kept in the reference only.
    g = 0.5 * x1 * (1.0 + jnp.tanh(0.7978845608028654 *
                                   (x1 + 0.044715 * x1 * x1 * x1)))
    y = jnp.dot(fow_ref[...], (g * x2).astype(bf16),
                preferred_element_type=f32) + fob_ref[...]

    out_ref[0] = x + y                                              # lane-dense store


def _full_spec(shape):
    nd = len(shape)
    # TODO(synk): mark these constant-index params pipeline_mode=pl.Buffered(1)
    # once single-buffered top-level BlockSpecs are confirmed on this jax version.
    return pl.BlockSpec(shape, lambda b, _nd=nd: (0,) * _nd)


def _vmem_cap_bytes():
    try:
        cap = getattr(pltpu.get_tpu_info(), "vmem_capacity_bytes", None)
        if cap:
            return int(cap)
    except Exception:
        pass
    return 64 * 2 ** 20   # conservative fallback (v7x per-core VMEM)


def transformer_block(x_nchw, params, num_heads):
    B, C, H, W = x_nchw.shape
    HW = H * W
    HID = params["w_in"].shape[-1]
    bf16 = jnp.bfloat16
    f32 = jnp.float32

    # Channels-first flattened layout needs no transpose from NCHW.
    x = x_nchw.reshape(B, C, HW).astype(f32)

    # Fuse the per-branch weights along the output-channel axis and pre-transpose
    # everything for the (C_out, HW) = W^T @ (C_in, HW) layout.
    catT = lambda p: jnp.concatenate(list(p), axis=-1).T
    plist = [
        jnp.transpose(params["ln1"], (0, 2, 1)),        # (2, C, 1)   [weight, bias]
        catT(params["w_qkv"]).astype(bf16),             # (3C, C)     fused q|k|v 1x1
        catT(params["b_qkv"]),                          # (3C, 1)
        catT(params["dww_qkv"]),                        # (3C, 9)     fused dw taps
        catT(params["dwb_qkv"]),                        # (3C, 1)
        params["temp"].reshape(C, 1).astype(f32),       # (C, 1) per-channel temperature
        params["po_w"].T.astype(bf16),                  # (C, C)      (cout, cin)
        params["po_b"].T,                               # (C, 1)
        jnp.transpose(params["ln2"], (0, 2, 1)),        # (2, C, 1)
        catT(params["w_in"]).astype(bf16),              # (2*HID, C)  fused project_in
        catT(params["b_in"]),                           # (2*HID, 1)
        catT(params["dww_in"]),                         # (2*HID, 9)
        catT(params["dwb_in"]),                         # (2*HID, 1)
        params["fo_w"].T.astype(bf16),                  # (C, HID)
        params["fo_b"].T,                               # (C, 1)
    ]

    # VMEM budget: double-buffered x/out blocks + (double-buffered) params + live
    # f32 intermediates, 2x headroom, capped at ~0.8x of this generation's VMEM
    # (~51 MiB on v7x, ~102 MiB on v5e/v6e).
    param_bytes = sum(int(p.size) * p.dtype.itemsize for p in plist)
    est = 4 * C * HW * 4
    est += 2 * param_bytes
    est += HW * (10 * C + 7 * HID) * 4
    vmem_limit = int(min(max(2 * est, 32 * 2 ** 20), int(0.8 * _vmem_cap_bytes())))

    # TODO(synk): at real Restormer resolutions add a spatial (row-band) grid axis
    # with a 1-row halo so the working set fits v7x's 64 MiB VMEM and megacore
    # gets a second parallel axis when B == 1.
    kernel = functools.partial(_block_kernel, H=H, W=W, num_heads=num_heads)
    y = pl.pallas_call(
        kernel,
        out_shape=jax.ShapeDtypeStruct((B, C, HW), jnp.float32),
        grid_spec=pltpu.PrefetchScalarGridSpec(
            num_scalar_prefetch=0,
            grid=(B,),
            in_specs=[pl.BlockSpec((1, C, HW), lambda b: (b, 0, 0))]
                     + [_full_spec(p.shape) for p in plist],
            out_specs=pl.BlockSpec((1, C, HW), lambda b: (b, 0, 0)),
        ),
        compiler_params=pltpu.CompilerParams(
            dimension_semantics=("parallel",),     # batch items independent
            vmem_limit_bytes=vmem_limit,
        ),
    )(x, *plist)
    return y.reshape(B, C, H, W)


# ------------------------------ pure-JAX reference ------------------------------
def transformer_block_reference(x_nchw, params, num_heads):
    B, C, H, W = x_nchw.shape
    x = jnp.transpose(x_nchw, (0, 2, 3, 1)).astype(jnp.float32)     # NHWC

    def ln(t, wb):
        mu = jnp.mean(t, axis=-1, keepdims=True)
        var = jnp.mean(jnp.square(t - mu), axis=-1, keepdims=True)
        return (t - mu) / jnp.sqrt(var + 1e-5) * wb[0, 0] + wb[1, 0]

    def conv1x1(t, w, b):
        return jnp.einsum("bhwc,cd->bhwd", t, w) + b

    def dwconv(t, w9, b):
        cg = t.shape[-1]
        ker = w9.reshape(3, 3, 1, cg)
        y = lax.conv_general_dilated(t, ker, (1, 1), ((1, 1), (1, 1)),
                                     dimension_numbers=("NHWC", "HWIO", "NHWC"),
                                     feature_group_count=cg)
        return y + b

    dh = C // num_heads
    xn = ln(x, params["ln1"])
    qkv = [dwconv(conv1x1(xn, params["w_qkv"][i], params["b_qkv"][i]),
                  params["dww_qkv"][i], params["dwb_qkv"][i]) for i in range(3)]

    def heads(t):
        t = t.reshape(B, H * W, num_heads, dh)
        return jnp.transpose(t, (0, 2, 3, 1))                       # (B, nh, dh, HW)

    q, k, v = (heads(t) for t in qkv)
    q = q / jnp.maximum(jnp.sqrt(jnp.sum(q * q, axis=-1, keepdims=True)), 1e-12)
    k = k / jnp.maximum(jnp.sqrt(jnp.sum(k * k, axis=-1, keepdims=True)), 1e-12)
    temp_head = params["temp"][0::dh, 0]
    attn = jnp.einsum("bnik,bnjk->bnij", q, k) * temp_head[None, :, None, None]
    attn = jax.nn.softmax(attn, axis=-1)
    o = jnp.einsum("bnij,bnjk->bnik", attn, v)
    o = jnp.transpose(o, (0, 3, 1, 2)).reshape(B, H, W, C)
    x = x + conv1x1(o, params["po_w"], params["po_b"])

    xn2 = ln(x, params["ln2"])
    x1 = dwconv(conv1x1(xn2, params["w_in"][0], params["b_in"][0]),
                params["dww_in"][0], params["dwb_in"][0])
    x2 = dwconv(conv1x1(xn2, params["w_in"][1], params["b_in"][1]),
                params["dww_in"][1], params["dwb_in"][1])
    g = 0.5 * x1 * (1.0 + lax.erf(x1 * 0.7071067811865476))
    x = x + conv1x1(g * x2, params["fo_w"], params["fo_b"])
    return jnp.transpose(x, (0, 3, 1, 2))


def init_params(key, dim, num_heads, ffn_expansion_factor):
    C = dim
    HID = int(dim * ffn_expansion_factor)
    dh = C // num_heads
    ks = jax.random.split(key, 17)
    n = lambda k, shp, s: (s * jax.random.normal(k, shp)).astype(jnp.float32)
    temp_head = 1.0 + 0.1 * jax.random.normal(ks[5], (num_heads,))
    return {
        "ln1": jnp.stack([jnp.ones((1, C)) + n(ks[0], (1, C), 0.1),
                          n(ks[1], (1, C), 0.1)]).astype(jnp.float32),      # (2,1,C): [w, b]
        "w_qkv": n(ks[2], (3, C, C), 0.2),        # q/k/v 1x1 conv weights (cin, cout)
        "b_qkv": n(ks[3], (3, 1, C), 0.1),
        "dww_qkv": n(ks[4], (3, 9, C), 0.2),      # depthwise 3x3 taps, row-major (di,dj)
        "dwb_qkv": n(ks[6], (3, 1, C), 0.1),
        "temp": jnp.repeat(temp_head, dh).reshape(C, 1).astype(jnp.float32),
        "po_w": n(ks[7], (C, C), 0.2),
        "po_b": n(ks[8], (1, C), 0.1),
        "ln2": jnp.stack([jnp.ones((1, C)) + n(ks[9], (1, C), 0.1),
                          n(ks[10], (1, C), 0.1)]).astype(jnp.float32),
        "w_in": n(ks[11], (2, C, HID), 0.2),      # project_in split into the two gate halves
        "b_in": n(ks[12], (2, 1, HID), 0.1),
        "dww_in": n(ks[13], (2, 9, HID), 0.2),
        "dwb_in": n(ks[14], (2, 1, HID), 0.1),
        "fo_w": n(ks[15], (HID, C), 0.2),
        "fo_b": n(ks[16], (1, C), 0.1),
    }


if __name__ == "__main__":
    B, dim, H, W = 2, 8, 16, 16
    num_heads = 2
    ffn_expansion_factor = 2.0

    key = jax.random.PRNGKey(0)
    kp, kx = jax.random.split(key)
    params = init_params(kp, dim, num_heads, ffn_expansion_factor)
    x = jax.random.normal(kx, (B, dim, H, W), jnp.float32)          # NCHW like PyTorch

    y = transformer_block(x, params, num_heads)
    y = jax.block_until_ready(y)

    y_ref = transformer_block_reference(x, params, num_heads)
    err = float(jnp.max(jnp.abs(y - y_ref)))
    assert y.shape == x.shape and err < 5e-2, f"max abs err {err}"
    print("KERNEL_OK")
</pallas_src>

<mosaic_0001>
module attributes {stable_mosaic.version = 11 : i64} {
  func.func @_block_kernel(%arg0: i32, %arg1: memref<1x8x256xf32, #tpu.memory_space<vmem>>, %arg2: memref<2x8x1xf32, #tpu.memory_space<vmem>>, %arg3: memref<24x8xbf16, #tpu.memory_space<vmem>>, %arg4: memref<24x1xf32, #tpu.memory_space<vmem>>, %arg5: memref<24x9xf32, #tpu.memory_space<vmem>>, %arg6: memref<24x1xf32, #tpu.memory_space<vmem>>, %arg7: memref<8x1xf32, #tpu.memory_space<vmem>>, %arg8: memref<8x8xbf16, #tpu.memory_space<vmem>>, %arg9: memref<8x1xf32, #tpu.memory_space<vmem>>, %arg10: memref<2x8x1xf32, #tpu.memory_space<vmem>>, %arg11: memref<32x8xbf16, #tpu.memory_space<vmem>>, %arg12: memref<32x1xf32, #tpu.memory_space<vmem>>, %arg13: memref<32x9xf32, #tpu.memory_space<vmem>>, %arg14: memref<32x1xf32, #tpu.memory_space<vmem>>, %arg15: memref<8x16xbf16, #tpu.memory_space<vmem>>, %arg16: memref<8x1xf32, #tpu.memory_space<vmem>>, %arg17: memref<1x8x256xf32, #tpu.memory_space<vmem>>) attributes {dimension_semantics = [#tpu.dimension_semantics<parallel>], iteration_bounds = array<i64: 2>, scalar_prefetch = 0 : i64, scratch_operands = 0 : i64, tpu.core_type = #tpu.core_type<tc>, window_params = [{transform_indices = @transform_0, window_bounds = array<i64: 1, 8, 256>}, {pipeline_mode = #tpu.pipeline_mode<synchronous>, transform_indices = @transform_1, window_bounds = array<i64: 2, 8, 1>}, {pipeline_mode = #tpu.pipeline_mode<synchronous>, transform_indices = @transform_2, window_bounds = array<i64: 24, 8>}, {pipeline_mode = #tpu.pipeline_mode<synchronous>, transform_indices = @transform_3, window_bounds = array<i64: 24, 1>}, {pipeline_mode = #tpu.pipeline_mode<synchronous>, transform_indices = @transform_4, window_bounds = array<i64: 24, 9>}, {pipeline_mode = #tpu.pipeline_mode<synchronous>, transform_indices = @transform_5, window_bounds = array<i64: 24, 1>}, {pipeline_mode = #tpu.pipeline_mode<synchronous>, transform_indices = @transform_6, window_bounds = array<i64: 8, 1>}, {pipeline_mode = #tpu.pipeline_mode<synchronous>, transform_indices = @transform_7, window_bounds = array<i64: 8, 8>}, {pipeline_mode = #tpu.pipeline_mode<synchronous>, transform_indices = @transform_8, window_bounds = array<i64: 8, 1>}, {pipeline_mode = #tpu.pipeline_mode<synchronous>, transform_indices = @transform_9, window_bounds = array<i64: 2, 8, 1>}, {pipeline_mode = #tpu.pipeline_mode<synchronous>, transform_indices = @transform_10, window_bounds = array<i64: 32, 8>}, {pipeline_mode = #tpu.pipeline_mode<synchronous>, transform_indices = @transform_11, window_bounds = array<i64: 32, 1>}, {pipeline_mode = #tpu.pipeline_mode<synchronous>, transform_indices = @transform_12, window_bounds = array<i64: 32, 9>}, {pipeline_mode = #tpu.pipeline_mode<synchronous>, transform_indices = @transform_13, window_bounds = array<i64: 32, 1>}, {pipeline_mode = #tpu.pipeline_mode<synchronous>, transform_indices = @transform_14, window_bounds = array<i64: 8, 16>}, {pipeline_mode = #tpu.pipeline_mode<synchronous>, transform_indices = @transform_15, window_bounds = array<i64: 8, 1>}, {transform_indices = @transform_16, window_bounds = array<i64: 1, 8, 256>}]} {
    %c0 = arith.constant 0 : index
    %c0_0 = arith.constant 0 : index
    %c0_1 = arith.constant 0 : index
    %0 = vector.load %arg1[%c0, %c0_0, %c0_1] : memref<1x8x256xf32, #tpu.memory_space<vmem>>, vector<1x8x256xf32>
    %1 = vector.shape_cast %0 : vector<1x8x256xf32> to vector<8x256xf32>
    %2 = tpu.iota {dimensions = array<i32: 1>} : vector<1x256xi32>
    %3 = arith.sitofp %2 : vector<1x256xi32> to vector<1x256xf32>
    %cst = arith.constant 6.250000e-02 : f32
    %4 = vector.broadcast %cst : f32 to vector<1x256xf32>
    %5 = arith.mulf %3, %4 : vector<1x256xf32>
    %6 = math.floor %5 : vector<1x256xf32>
    %cst_2 = arith.constant 1.600000e+01 : f32
    %7 = vector.broadcast %cst_2 : f32 to vector<1x256xf32>
    %8 = arith.mulf %6, %7 : vector<1x256xf32>
    %9 = arith.subf %3, %8 : vector<1x256xf32>
    %cst_3 = arith.constant 1.000000e+00 : f32
    %10 = vector.broadcast %cst_3 : f32 to vector<1x256xf32>
    %11 = arith.cmpf oge, %6, %10 : vector<1x256xf32>
    %cst_4 = arith.constant 1.000000e+00 : f32
    %12 = vector.broadcast %cst_4 : f32 to vector<1x256xf32>
    %13 = arith.cmpf oge, %9, %12 : vector<1x256xf32>
    %14 = arith.andi %11, %13 : vector<1x256xi1>
    %15 = arith.extui %14 : vector<1x256xi1> to vector<1x256xi32>
    %16 = arith.sitofp %15 : vector<1x256xi32> to vector<1x256xf32>
    %cst_5 = arith.constant 1.000000e+00 : f32
    %17 = vector.broadcast %cst_5 : f32 to vector<1x256xf32>
    %18 = arith.cmpf oge, %6, %17 : vector<1x256xf32>
    %19 = arith.extui %18 : vector<1x256xi1> to vector<1x256xi32>
    %20 = arith.sitofp %19 : vector<1x256xi32> to vector<1x256xf32>
    %cst_6 = arith.constant 1.000000e+00 : f32
    %21 = vector.broadcast %cst_6 : f32 to vector<1x256xf32>
    %22 = arith.cmpf oge, %6, %21 : vector<1x256xf32>
    %cst_7 = arith.constant 1.500000e+01 : f32
    %23 = vector.broadcast %cst_7 : f32 to vector<1x256xf32>
    %24 = arith.cmpf olt, %9, %23 : vector<1x256xf32>
    %25 = arith.andi %22, %24 : vector<1x256xi1>
    %26 = arith.extui %25 : vector<1x256xi1> to vector<1x256xi32>
    %27 = arith.sitofp %26 : vector<1x256xi32> to vector<1x256xf32>
    %cst_8 = arith.constant 1.000000e+00 : f32
    %28 = vector.broadcast %cst_8 : f32 to vector<1x256xf32>
    %29 = arith.cmpf oge, %9, %28 : vector<1x256xf32>
    %30 = arith.extui %29 : vector<1x256xi1> to vector<1x256xi32>
    %31 = arith.sitofp %30 : vector<1x256xi32> to vector<1x256xf32>
    %cst_9 = arith.constant 1.500000e+01 : f32
    %32 = vector.broadcast %cst_9 : f32 to vector<1x256xf32>
    %33 = arith.cmpf olt, %9, %32 : vector<1x256xf32>
    %34 = arith.extui %33 : vector<1x256xi1> to vector<1x256xi32>
    %35 = arith.sitofp %34 : vector<1x256xi32> to vector<1x256xf32>
    %cst_10 = arith.constant 1.500000e+01 : f32
    %36 = vector.broadcast %cst_10 : f32 to vector<1x256xf32>
    %37 = arith.cmpf olt, %6, %36 : vector<1x256xf32>
    %cst_11 = arith.constant 1.000000e+00 : f32
    %38 = vector.broadcast %cst_11 : f32 to vector<1x256xf32>
    %39 = arith.cmpf oge, %9, %38 : vector<1x256xf32>
    %40 = arith.andi %37, %39 : vector<1x256xi1>
    %41 = arith.extui %40 : vector<1x256xi1> to vector<1x256xi32>
    %42 = arith.sitofp %41 : vector<1x256xi32> to vector<1x256xf32>
    %cst_12 = arith.constant 1.500000e+01 : f32
    %43 = vector.broadcast %cst_12 : f32 to vector<1x256xf32>
    %44 = arith.cmpf olt, %6, %43 : vector<1x256xf32>
    %45 = arith.extui %44 : vector<1x256xi1> to vector<1x256xi32>
    %46 = arith.sitofp %45 : vector<1x256xi32> to vector<1x256xf32>
    %cst_13 = arith.constant 1.500000e+01 : f32
    %47 = vector.broadcast %cst_13 : f32 to vector<1x256xf32>
    %48 = arith.cmpf olt, %6, %47 : vector<1x256xf32>
    %cst_14 = arith.constant 1.500000e+01 : f32
    %49 = vector.broadcast %cst_14 : f32 to vector<1x256xf32>
    %50 = arith.cmpf olt, %9, %49 : vector<1x256xf32>
    %51 = arith.andi %48, %50 : vector<1x256xi1>
    %52 = arith.extui %51 : vector<1x256xi1> to vector<1x256xi32>
    %53 = arith.sitofp %52 : vector<1x256xi32> to vector<1x256xf32>
    %cst_15 = arith.constant dense<0.000000e+00> : vector<256xf32>
    %54 = vector.multi_reduction <add>, %1, %cst_15 [0] : vector<8x256xf32> to vector<256xf32>
    %55 = vector.shape_cast %54 : vector<256xf32> to vector<1x256xf32>
    %cst_16 = arith.constant 8.000000e+00 : f32
    %56 = vector.broadcast %cst_16 : f32 to vector<1x256xf32>
    %57 = arith.divf %55, %56 : vector<1x256xf32>
    %58 = arith.mulf %1, %1 : vector<8x256xf32>
    %cst_17 = arith.constant dense<0.000000e+00> : vector<256xf32>
    %59 = vector.multi_reduction <add>, %58, %cst_17 [0] : vector<8x256xf32> to vector<256xf32>
    %60 = vector.shape_cast %59 : vector<256xf32> to vector<1x256xf32>
    %cst_18 = arith.constant 8.000000e+00 : f32
    %61 = vector.broadcast %cst_18 : f32 to vector<1x256xf32>
    %62 = arith.divf %60, %61 : vector<1x256xf32>
    %63 = arith.mulf %57, %57 : vector<1x256xf32>
    %64 = arith.subf %62, %63 : vector<1x256xf32>
    %65 = vector.broadcast %57 : vector<1x256xf32> to vector<8x256xf32>
    %66 = arith.subf %1, %65 : vector<8x256xf32>
    %cst_19 = arith.constant 9.99999974E-6 : f32
    %67 = vector.broadcast %cst_19 : f32 to vector<1x256xf32>
    %68 = arith.addf %64, %67 : vector<1x256xf32>
    %69 = math.rsqrt %68 : vector<1x256xf32>
    %70 = vector.broadcast %69 : vector<1x256xf32> to vector<8x256xf32>
    %71 = arith.mulf %66, %70 : vector<8x256xf32>
    %c0_20 = arith.constant 0 : index
    %c0_21 = arith.constant 0 : index
    %c0_22 = arith.constant 0 : index
    %72 = vector.load %arg2[%c0_20, %c0_21, %c0_22] : memref<2x8x1xf32, #tpu.memory_space<vmem>>, vector<1x8x1xf32>
    %73 = vector.shape_cast %72 : vector<1x8x1xf32> to vector<8x1xf32>
    %74 = vector.broadcast %73 : vector<8x1xf32> to vector<8x256xf32>
    %75 = arith.mulf %71, %74 : vector<8x256xf32>
    %c1 = arith.constant 1 : index
    %c0_23 = arith.constant 0 : index
    %c0_24 = arith.constant 0 : index
    %76 = vector.load %arg2[%c1, %c0_23, %c0_24] : memref<2x8x1xf32, #tpu.memory_space<vmem>>, vector<1x8x1xf32>
    %77 = vector.shape_cast %76 : vector<1x8x1xf32> to vector<8x1xf32>
    %78 = vector.broadcast %77 : vector<8x1xf32> to vector<8x256xf32>
    %79 = arith.addf %75, %78 : vector<8x256xf32>
    %c0_25 = arith.constant 0 : index
    %c0_26 = arith.constant 0 : index
    %80 = vector.load %arg3[%c0_25, %c0_26] : memref<24x8xbf16, #tpu.memory_space<vmem>>, vector<24x8xbf16>
    %81 = arith.truncf %79 : vector<8x256xf32> to vector<8x256xbf16>
    %cst_27 = arith.constant dense<0.000000e+00> : vector<24x256xf32>
    %82 = tpu.matmul %80, %81, %cst_27 {dimension_numbers = #tpu.dot_dimension_numbers<[1], [0], [0], [1], [0, 0, 1, 1], [], []>} : vector<24x8xbf16>, vector<8x256xbf16>, vector<24x256xf32> -> vector<24x256xf32>
    %c0_28 = arith.constant 0 : index
    %c0_29 = arith.constant 0 : index
    %83 = vector.load %arg4[%c0_28, %c0_29] : memref<24x1xf32, #tpu.memory_space<vmem>>, vector<24x1xf32>
    %84 = vector.broadcast %83 : vector<24x1xf32> to vector<24x256xf32>
    %85 = arith.addf %82, %84 : vector<24x256xf32>
    %cst_30 = arith.constant 0.000000e+00 : f32
    %86 = vector.broadcast %cst_30 : f32 to vector<24x256xf32>
    %c0_31 = arith.constant 0 : index
    %c0_32 = arith.constant 0 : index
    %87 = vector.load %arg6[%c0_31, %c0_32] : memref<24x1xf32, #tpu.memory_space<vmem>>, vector<24x1xf32>
    %88 = vector.broadcast %87 : vector<24x1xf32> to vector<24x256xf32>
    %89 = arith.addf %86, %88 : vector<24x256xf32>
    %c0_33 = arith.constant 0 : index
    %c0_34 = arith.constant 0 : index
    %90 = vector.load %arg5[%c0_33, %c0_34] : memref<24x9xf32, #tpu.memory_space<vmem>>, vector<24x1xf32>
    %c17_i32 = arith.constant 17 : i32
    %91 = tpu.dynamic_rotate %85 by %c17_i32 dim 1 : vector<24x256xf32>, i32 -> vector<24x256xf32>
    %92 = vector.broadcast %90 : vector<24x1xf32> to vector<24x256xf32>
    %93 = arith.mulf %91, %92 : vector<24x256xf32>
    %94 = vector.broadcast %16 : vector<1x256xf32> to vector<24x256xf32>
    %95 = arith.mulf %93, %94 : vector<24x256xf32>
    %96 = arith.addf %89, %95 : vector<24x256xf32>
    %c0_35 = arith.constant 0 : index
    %c1_36 = arith.constant 1 : index
    %97 = vector.load %arg5[%c0_35, %c1_36] : memref<24x9xf32, #tpu.memory_space<vmem>>, vector<24x1xf32>
    %c16_i32 = arith.constant 16 : i32
    %98 = tpu.dynamic_rotate %85 by %c16_i32 dim 1 : vector<24x256xf32>, i32 -> vector<24x256xf32>
    %99 = vector.broadcast %97 : vector<24x1xf32> to vector<24x256xf32>
    %100 = arith.mulf %98, %99 : vector<24x256xf32>
    %101 = vector.broadcast %20 : vector<1x256xf32> to vector<24x256xf32>
    %102 = arith.mulf %100, %101 : vector<24x256xf32>
    %103 = arith.addf %96, %102 : vector<24x256xf32>
    %c0_37 = arith.constant 0 : index
    %c2 = arith.constant 2 : index
    %104 = vector.load %arg5[%c0_37, %c2] : memref<24x9xf32, #tpu.memory_space<vmem>>, vector<24x1xf32>
    %c15_i32 = arith.constant 15 : i32
    %105 = tpu.dynamic_rotate %85 by %c15_i32 dim 1 : vector<24x256xf32>, i32 -> vector<24x256xf32>
    %106 = vector.broadcast %104 : vector<24x1xf32> to vector<24x256xf32>
    %107 = arith.mulf %105, %106 : vector<24x256xf32>
    %108 = vector.broadcast %27 : vector<1x256xf32> to vector<24x256xf32>
    %109 = arith.mulf %107, %108 : vector<24x256xf32>
    %110 = arith.addf %103, %109 : vector<24x256xf32>
    %c0_38 = arith.constant 0 : index
    %c3 = arith.constant 3 : index
    %111 = vector.load %arg5[%c0_38, %c3] : memref<24x9xf32, #tpu.memory_space<vmem>>, vector<24x1xf32>
    %c1_i32 = arith.constant 1 : i32
    %112 = tpu.dynamic_rotate %85 by %c1_i32 dim 1 : vector<24x256xf32>, i32 -> vector<24x256xf32>
    %113 = vector.broadcast %111 : vector<24x1xf32> to vector<24x256xf32>
    %114 = arith.mulf %112, %113 : vector<24x256xf32>
    %115 = vector.broadcast %31 : vector<1x256xf32> to vector<24x256xf32>
    %116 = arith.mulf %114, %115 : vector<24x256xf32>
    %117 = arith.addf %110, %116 : vector<24x256xf32>
    %c0_39 = arith.constant 0 : index
    %c4 = arith.constant 4 : index
    %118 = vector.load %arg5[%c0_39, %c4] : memref<24x9xf32, #tpu.memory_space<vmem>>, vector<24x1xf32>
    %119 = vector.broadcast %118 : vector<24x1xf32> to vector<24x256xf32>
    %120 = arith.mulf %85, %119 : vector<24x256xf32>
    %121 = arith.addf %117, %120 : vector<24x256xf32>
    %c0_40 = arith.constant 0 : index
    %c5 = arith.constant 5 : index
    %122 = vector.load %arg5[%c0_40, %c5] : memref<24x9xf32, #tpu.memory_space<vmem>>, vector<24x1xf32>
    %c255_i32 = arith.constant 255 : i32
    %123 = tpu.dynamic_rotate %85 by %c255_i32 dim 1 : vector<24x256xf32>, i32 -> vector<24x256xf32>
    %124 = vector.broadcast %122 : vector<24x1xf32> to vector<24x256xf32>
    %125 = arith.mulf %123, %124 : vector<24x256xf32>
    %126 = vector.broadcast %35 : vector<1x256xf32> to vector<24x256xf32>
    %127 = arith.mulf %125, %126 : vector<24x256xf32>
    %128 = arith.addf %121, %127 : vector<24x256xf32>
    %c0_41 = arith.constant 0 : index
    %c6 = arith.constant 6 : index
    %129 = vector.load %arg5[%c0_41, %c6] : memref<24x9xf32, #tpu.memory_space<vmem>>, vector<24x1xf32>
    %c241_i32 = arith.constant 241 : i32
    %130 = tpu.dynamic_rotate %85 by %c241_i32 dim 1 : vector<24x256xf32>, i32 -> vector<24x256xf32>
    %131 = vector.broadcast %129 : vector<24x1xf32> to vector<24x256xf32>
    %132 = arith.mulf %130, %131 : vector<24x256xf32>
    %133 = vector.broadcast %42 : vector<1x256xf32> to vector<24x256xf32>
    %134 = arith.mulf %132, %133 : vector<24x256xf32>
    %135 = arith.addf %128, %134 : vector<24x256xf32>
    %c0_42 = arith.constant 0 : index
    %c7 = arith.constant 7 : index
    %136 = vector.load %arg5[%c0_42, %c7] : memref<24x9xf32, #tpu.memory_space<vmem>>, vector<24x1xf32>
    %c240_i32 = arith.constant 240 : i32
    %137 = tpu.dynamic_rotate %85 by %c240_i32 dim 1 : vector<24x256xf32>, i32 -> vector<24x256xf32>
    %138 = vector.broadcast %136 : vector<24x1xf32> to vector<24x256xf32>
    %139 = arith.mulf %137, %138 : vector<24x256xf32>
    %140 = vector.broadcast %46 : vector<1x256xf32> to vector<24x256xf32>
    %141 = arith.mulf %139, %140 : vector<24x256xf32>
    %142 = arith.addf %135, %141 : vector<24x256xf32>
    %c0_43 = arith.constant 0 : index
    %c8 = arith.constant 8 : index
    %143 = vector.load %arg5[%c0_43, %c8] : memref<24x9xf32, #tpu.memory_space<vmem>>, vector<24x1xf32>
    %c239_i32 = arith.constant 239 : i32
    %144 = tpu.dynamic_rotate %85 by %c239_i32 dim 1 : vector<24x256xf32>, i32 -> vector<24x256xf32>
    %145 = vector.broadcast %143 : vector<24x1xf32> to vector<24x256xf32>
    %146 = arith.mulf %144, %145 : vector<24x256xf32>
    %147 = vector.broadcast %53 : vector<1x256xf32> to vector<24x256xf32>
    %148 = arith.mulf %146, %147 : vector<24x256xf32>
    %149 = arith.addf %142, %148 : vector<24x256xf32>
    %150 = vector.extract_strided_slice %149 {offsets = [0, 0], sizes = [8, 256], strides = [1, 1]} : vector<24x256xf32> to vector<8x256xf32>
    %151 = vector.extract_strided_slice %149 {offsets = [8, 0], sizes = [8, 256], strides = [1, 1]} : vector<24x256xf32> to vector<8x256xf32>
    %152 = vector.extract_strided_slice %149 {offsets = [16, 0], sizes = [8, 256], strides = [1, 1]} : vector<24x256xf32> to vector<8x256xf32>
    %153 = arith.mulf %150, %150 : vector<8x256xf32>
    %cst_44 = arith.constant dense<0.000000e+00> : vector<8xf32>
    %154 = vector.multi_reduction <add>, %153, %cst_44 [1] : vector<8x256xf32> to vector<8xf32>
    %155 = vector.shape_cast %154 : vector<8xf32> to vector<8x1xf32>
    %156 = math.sqrt %155 : vector<8x1xf32>
    %cst_45 = arith.constant 9.99999996E-13 : f32
    %157 = vector.broadcast %cst_45 : f32 to vector<8x1xf32>
    %158 = arith.maximumf %156, %157 : vector<8x1xf32>
    %159 = vector.broadcast %158 : vector<8x1xf32> to vector<8x256xf32>
    %160 = arith.divf %150, %159 : vector<8x256xf32>
    %161 = arith.mulf %151, %151 : vector<8x256xf32>
    %cst_46 = arith.constant dense<0.000000e+00> : vector<8xf32>
    %162 = vector.multi_reduction <add>, %161, %cst_46 [1] : vector<8x256xf32> to vector<8xf32>
    %163 = vector.shape_cast %162 : vector<8xf32> to vector<8x1xf32>
    %164 = math.sqrt %163 : vector<8x1xf32>
    %cst_47 = arith.constant 9.99999996E-13 : f32
    %165 = vector.broadcast %cst_47 : f32 to vector<8x1xf32>
    %166 = arith.maximumf %164, %165 : vector<8x1xf32>
    %167 = vector.broadcast %166 : vector<8x1xf32> to vector<8x256xf32>
    %168 = arith.divf %151, %167 : vector<8x256xf32>
    %c0_48 = arith.constant 0 : index
    %c0_49 = arith.constant 0 : index
    %169 = vector.load %arg7[%c0_48, %c0_49] : memref<8x1xf32, #tpu.memory_space<vmem>>, vector<8x1xf32>
    %170 = vector.broadcast %169 : vector<8x1xf32> to vector<8x256xf32>
    %171 = arith.mulf %160, %170 : vector<8x256xf32>
    %172 = vector.extract_strided_slice %171 {offsets = [0, 0], sizes = [4, 256], strides = [1, 1]} : vector<8x256xf32> to vector<4x256xf32>
    %173 = arith.truncf %172 : vector<4x256xf32> to vector<4x256xbf16>
    %174 = vector.extract_strided_slice %168 {offsets = [0, 0], sizes = [4, 256], strides = [1, 1]} : vector<8x256xf32> to vector<4x256xf32>
    %175 = arith.truncf %174 : vector<4x256xf32> to vector<4x256xbf16>
    %176 = vector.extract_strided_slice %152 {offsets = [0, 0], sizes = [4, 256], strides = [1, 1]} : vector<8x256xf32> to vector<4x256xf32>
    %177 = arith.truncf %176 : vector<4x256xf32> to vector<4x256xbf16>
    %cst_50 = arith.constant dense<0.000000e+00> : vector<4x4xf32>
    %178 = tpu.matmul %173, %175, %cst_50 {dimension_numbers = #tpu.dot_dimension_numbers<[1], [1], [0], [0], [0, 0, 1, 0], [], []>} : vector<4x256xbf16>, vector<4x256xbf16>, vector<4x4xf32> -> vector<4x4xf32>
    %cst_51 = arith.constant dense<0xFF800000> : vector<4xf32>
    %179 = vector.multi_reduction <maximumf>, %178, %cst_51 [1] : vector<4x4xf32> to vector<4xf32>
    %180 = vector.shape_cast %179 : vector<4xf32> to vector<4x1xf32>
    %181 = vector.broadcast %180 : vector<4x1xf32> to vector<4x4xf32>
    %182 = arith.subf %178, %181 : vector<4x4xf32>
    %183 = math.exp %182 : vector<4x4xf32>
    %cst_52 = arith.constant dense<0.000000e+00> : vector<4xf32>
    %184 = vector.multi_reduction <add>, %183, %cst_52 [1] : vector<4x4xf32> to vector<4xf32>
    %185 = vector.shape_cast %184 : vector<4xf32> to vector<4x1xf32>
    %186 = tpu.reciprocal %185 {approx = true} : vector<4x1xf32> -> vector<4x1xf32>
    %187 = vector.broadcast %186 : vector<4x1xf32> to vector<4x4xf32>
    %188 = arith.mulf %183, %187 : vector<4x4xf32>
    %189 = arith.truncf %188 : vector<4x4xf32> to vector<4x4xbf16>
    %cst_53 = arith.constant dense<0.000000e+00> : vector<4x256xf32>
    %190 = tpu.matmul %189, %177, %cst_53 {dimension_numbers = #tpu.dot_dimension_numbers<[1], [0], [0], [1], [0, 0, 1, 1], [], []>} : vector<4x4xbf16>, vector<4x256xbf16>, vector<4x256xf32> -> vector<4x256xf32>
    %191 = vector.extract_strided_slice %171 {offsets = [4, 0], sizes = [4, 256], strides = [1, 1]} : vector<8x256xf32> to vector<4x256xf32>
    %192 = arith.truncf %191 : vector<4x256xf32> to vector<4x256xbf16>
    %193 = vector.extract_strided_slice %168 {offsets = [4, 0], sizes = [4, 256], strides = [1, 1]} : vector<8x256xf32> to vector<4x256xf32>
    %194 = arith.truncf %193 : vector<4x256xf32> to vector<4x256xbf16>
    %195 = vector.extract_strided_slice %152 {offsets = [4, 0], sizes = [4, 256], strides = [1, 1]} : vector<8x256xf32> to vector<4x256xf32>
    %196 = arith.truncf %195 : vector<4x256xf32> to vector<4x256xbf16>
    %cst_54 = arith.constant dense<0.000000e+00> : vector<4x4xf32>
    %197 = tpu.matmul %192, %194, %cst_54 {dimension_numbers = #tpu.dot_dimension_numbers<[1], [1], [0], [0], [0, 0, 1, 0], [], []>} : vector<4x256xbf16>, vector<4x256xbf16>, vector<4x4xf32> -> vector<4x4xf32>
    %cst_55 = arith.constant dense<0xFF800000> : vector<4xf32>
    %198 = vector.multi_reduction <maximumf>, %197, %cst_55 [1] : vector<4x4xf32> to vector<4xf32>
    %199 = vector.shape_cast %198 : vector<4xf32> to vector<4x1xf32>
    %200 = vector.broadcast %199 : vector<4x1xf32> to vector<4x4xf32>
    %201 = arith.subf %197, %200 : vector<4x4xf32>
    %202 = math.exp %201 : vector<4x4xf32>
    %cst_56 = arith.constant dense<0.000000e+00> : vector<4xf32>
    %203 = vector.multi_reduction <add>, %202, %cst_56 [1] : vector<4x4xf32> to vector<4xf32>
    %204 = vector.shape_cast %203 : vector<4xf32> to vector<4x1xf32>
    %205 = tpu.reciprocal %204 {approx = true} : vector<4x1xf32> -> vector<4x1xf32>
    %206 = vector.broadcast %205 : vector<4x1xf32> to vector<4x4xf32>
    %207 = arith.mulf %202, %206 : vector<4x4xf32>
    %208 = arith.truncf %207 : vector<4x4xf32> to vector<4x4xbf16>
    %cst_57 = arith.constant dense<0.000000e+00> : vector<4x256xf32>
    %209 = tpu.matmul %208, %196, %cst_57 {dimension_numbers = #tpu.dot_dimension_numbers<[1], [0], [0], [1], [0, 0, 1, 1], [], []>} : vector<4x4xbf16>, vector<4x256xbf16>, vector<4x256xf32> -> vector<4x256xf32>
    %210 = tpu.concatenate %190, %209 in 0 : vector<4x256xf32>, vector<4x256xf32> -> vector<8x256xf32>
    %c0_58 = arith.constant 0 : index
    %c0_59 = arith.constant 0 : index
    %211 = vector.load %arg8[%c0_58, %c0_59] : memref<8x8xbf16, #tpu.memory_space<vmem>>, vector<8x8xbf16>
    %212 = arith.truncf %210 : vector<8x256xf32> to vector<8x256xbf16>
    %cst_60 = arith.constant dense<0.000000e+00> : vector<8x256xf32>
    %213 = tpu.matmul %211, %212, %cst_60 {dimension_numbers = #tpu.dot_dimension_numbers<[1], [0], [0], [1], [0, 0, 1, 1], [], []>} : vector<8x8xbf16>, vector<8x256xbf16>, vector<8x256xf32> -> vector<8x256xf32>
    %214 = arith.addf %1, %213 : vector<8x256xf32>
    %c0_61 = arith.constant 0 : index
    %c0_62 = arith.constant 0 : index
    %215 = vector.load %arg9[%c0_61, %c0_62] : memref<8x1xf32, #tpu.memory_space<vmem>>, vector<8x1xf32>
    %216 = vector.broadcast %215 : vector<8x1xf32> to vector<8x256xf32>
    %217 = arith.addf %214, %216 : vector<8x256xf32>
    %cst_63 = arith.constant dense<0.000000e+00> : vector<256xf32>
    %218 = vector.multi_reduction <add>, %217, %cst_63 [0] : vector<8x256xf32> to vector<256xf32>
    %219 = vector.shape_cast %218 : vector<256xf32> to vector<1x256xf32>
    %cst_64 = arith.constant 8.000000e+00 : f32
    %220 = vector.broadcast %cst_64 : f32 to vector<1x256xf32>
    %221 = arith.divf %219, %220 : vector<1x256xf32>
    %222 = arith.mulf %217, %217 : vector<8x256xf32>
    %cst_65 = arith.constant dense<0.000000e+00> : vector<256xf32>
    %223 = vector.multi_reduction <add>, %222, %cst_65 [0] : vector<8x256xf32> to vector<256xf32>
    %224 = vector.shape_cast %223 : vector<256xf32> to vector<1x256xf32>
    %cst_66 = arith.constant 8.000000e+00 : f32
    %225 = vector.broadcast %cst_66 : f32 to vector<1x256xf32>
    %226 = arith.divf %224, %225 : vector<1x256xf32>
    %227 = arith.mulf %221, %221 : vector<1x256xf32>
    %228 = arith.subf %226, %227 : vector<1x256xf32>
    %229 = vector.broadcast %221 : vector<1x256xf32> to vector<8x256xf32>
    %230 = arith.subf %217, %229 : vector<8x256xf32>
    %cst_67 = arith.constant 9.99999974E-6 : f32
    %231 = vector.broadcast %cst_67 : f32 to vector<1x256xf32>
    %232 = arith.addf %228, %231 : vector<1x256xf32>
    %233 = math.rsqrt %232 : vector<1x256xf32>
    %234 = vector.broadcast %233 : vector<1x256xf32> to vector<8x256xf32>
    %235 = arith.mulf %230, %234 : vector<8x256xf32>
    %c0_68 = arith.constant 0 : index
    %c0_69 = arith.constant 0 : index
    %c0_70 = arith.constant 0 : index
    %236 = vector.load %arg10[%c0_68, %c0_69, %c0_70] : memref<2x8x1xf32, #tpu.memory_space<vmem>>, vector<1x8x1xf32>
    %237 = vector.shape_cast %236 : vector<1x8x1xf32> to vector<8x1xf32>
    %238 = vector.broadcast %237 : vector<8x1xf32> to vector<8x256xf32>
    %239 = arith.mulf %235, %238 : vector<8x256xf32>
    %c1_71 = arith.constant 1 : index
    %c0_72 = arith.constant 0 : index
    %c0_73 = arith.constant 0 : index
    %240 = vector.load %arg10[%c1_71, %c0_72, %c0_73] : memref<2x8x1xf32, #tpu.memory_space<vmem>>, vector<1x8x1xf32>
    %241 = vector.shape_cast %240 : vector<1x8x1xf32> to vector<8x1xf32>
    %242 = vector.broadcast %241 : vector<8x1xf32> to vector<8x256xf32>
    %243 = arith.addf %239, %242 : vector<8x256xf32>
    %c0_74 = arith.constant 0 : index
    %c0_75 = arith.constant 0 : index
    %244 = vector.load %arg11[%c0_74, %c0_75] : memref<32x8xbf16, #tpu.memory_space<vmem>>, vector<32x8xbf16>
    %245 = arith.truncf %243 : vector<8x256xf32> to vector<8x256xbf16>
    %cst_76 = arith.constant dense<0.000000e+00> : vector<32x256xf32>
    %246 = tpu.matmul %244, %245, %cst_76 {dimension_numbers = #tpu.dot_dimension_numbers<[1], [0], [0], [1], [0, 0, 1, 1], [], []>} : vector<32x8xbf16>, vector<8x256xbf16>, vector<32x256xf32> -> vector<32x256xf32>
    %c0_77 = arith.constant 0 : index
    %c0_78 = arith.constant 0 : index
    %247 = vector.load %arg12[%c0_77, %c0_78] : memref<32x1xf32, #tpu.memory_space<vmem>>, vector<32x1xf32>
    %248 = vector.broadcast %247 : vector<32x1xf32> to vector<32x256xf32>
    %249 = arith.addf %246, %248 : vector<32x256xf32>
    %cst_79 = arith.constant 0.000000e+00 : f32
    %250 = vector.broadcast %cst_79 : f32 to vector<32x256xf32>
    %c0_80 = arith.constant 0 : index
    %c0_81 = arith.constant 0 : index
    %251 = vector.load %arg14[%c0_80, %c0_81] : memref<32x1xf32, #tpu.memory_space<vmem>>, vector<32x1xf32>
    %252 = vector.broadcast %251 : vector<32x1xf32> to vector<32x256xf32>
    %253 = arith.addf %250, %252 : vector<32x256xf32>
    %c0_82 = arith.constant 0 : index
    %c0_83 = arith.constant 0 : index
    %254 = vector.load %arg13[%c0_82, %c0_83] : memref<32x9xf32, #tpu.memory_space<vmem>>, vector<32x1xf32>
    %c17_i32_84 = arith.constant 17 : i32
    %255 = tpu.dynamic_rotate %249 by %c17_i32_84 dim 1 : vector<32x256xf32>, i32 -> vector<32x256xf32>
    %256 = vector.broadcast %254 : vector<32x1xf32> to vector<32x256xf32>
    %257 = arith.mulf %255, %256 : vector<32x256xf32>
    %258 = vector.broadcast %16 : vector<1x256xf32> to vector<32x256xf32>
    %259 = arith.mulf %257, %258 : vector<32x256xf32>
    %260 = arith.addf %253, %259 : vector<32x256xf32>
    %c0_85 = arith.constant 0 : index
    %c1_86 = arith.constant 1 : index
    %261 = vector.load %arg13[%c0_85, %c1_86] : memref<32x9xf32, #tpu.memory_space<vmem>>, vector<32x1xf32>
    %c16_i32_87 = arith.constant 16 : i32
    %262 = tpu.dynamic_rotate %249 by %c16_i32_87 dim 1 : vector<32x256xf32>, i32 -> vector<32x256xf32>
    %263 = vector.broadcast %261 : vector<32x1xf32> to vector<32x256xf32>
    %264 = arith.mulf %262, %263 : vector<32x256xf32>
    %265 = vector.broadcast %20 : vector<1x256xf32> to vector<32x256xf32>
    %266 = arith.mulf %264, %265 : vector<32x256xf32>
    %267 = arith.addf %260, %266 : vector<32x256xf32>
    %c0_88 = arith.constant 0 : index
    %c2_89 = arith.constant 2 : index
    %268 = vector.load %arg13[%c0_88, %c2_89] : memref<32x9xf32, #tpu.memory_space<vmem>>, vector<32x1xf32>
    %c15_i32_90 = arith.constant 15 : i32
    %269 = tpu.dynamic_rotate %249 by %c15_i32_90 dim 1 : vector<32x256xf32>, i32 -> vector<32x256xf32>
    %270 = vector.broadcast %268 : vector<32x1xf32> to vector<32x256xf32>
    %271 = arith.mulf %269, %270 : vector<32x256xf32>
    %272 = vector.broadcast %27 : vector<1x256xf32> to vector<32x256xf32>
    %273 = arith.mulf %271, %272 : vector<32x256xf32>
    %274 = arith.addf %267, %273 : vector<32x256xf32>
    %c0_91 = arith.constant 0 : index
    %c3_92 = arith.constant 3 : index
    %275 = vector.load %arg13[%c0_91, %c3_92] : memref<32x9xf32, #tpu.memory_space<vmem>>, vector<32x1xf32>
    %c1_i32_93 = arith.constant 1 : i32
    %276 = tpu.dynamic_rotate %249 by %c1_i32_93 dim 1 : vector<32x256xf32>, i32 -> vector<32x256xf32>
    %277 = vector.broadcast %275 : vector<32x1xf32> to vector<32x256xf32>
    %278 = arith.mulf %276, %277 : vector<32x256xf32>
    %279 = vector.broadcast %31 : vector<1x256xf32> to vector<32x256xf32>
    %280 = arith.mulf %278, %279 : vector<32x256xf32>
    %281 = arith.addf %274, %280 : vector<32x256xf32>
    %c0_94 = arith.constant 0 : index
    %c4_95 = arith.constant 4 : index
    %282 = vector.load %arg13[%c0_94, %c4_95] : memref<32x9xf32, #tpu.memory_space<vmem>>, vector<32x1xf32>
    %283 = vector.broadcast %282 : vector<32x1xf32> to vector<32x256xf32>
    %284 = arith.mulf %249, %283 : vector<32x256xf32>
    %285 = arith.addf %281, %284 : vector<32x256xf32>
    %c0_96 = arith.constant 0 : index
    %c5_97 = arith.constant 5 : index
    %286 = vector.load %arg13[%c0_96, %c5_97] : memref<32x9xf32, #tpu.memory_space<vmem>>, vector<32x1xf32>
    %c255_i32_98 = arith.constant 255 : i32
    %287 = tpu.dynamic_rotate %249 by %c255_i32_98 dim 1 : vector<32x256xf32>, i32 -> vector<32x256xf32>
    %288 = vector.broadcast %286 : vector<32x1xf32> to vector<32x256xf32>
    %289 = arith.mulf %287, %288 : vector<32x256xf32>
    %290 = vector.broadcast %35 : vector<1x256xf32> to vector<32x256xf32>
    %291 = arith.mulf %289, %290 : vector<32x256xf32>
    %292 = arith.addf %285, %291 : vector<32x256xf32>
    %c0_99 = arith.constant 0 : index
    %c6_100 = arith.constant 6 : index
    %293 = vector.load %arg13[%c0_99, %c6_100] : memref<32x9xf32, #tpu.memory_space<vmem>>, vector<32x1xf32>
    %c241_i32_101 = arith.constant 241 : i32
    %294 = tpu.dynamic_rotate %249 by %c241_i32_101 dim 1 : vector<32x256xf32>, i32 -> vector<32x256xf32>
    %295 = vector.broadcast %293 : vector<32x1xf32> to vector<32x256xf32>
    %296 = arith.mulf %294, %295 : vector<32x256xf32>
    %297 = vector.broadcast %42 : vector<1x256xf32> to vector<32x256xf32>
    %298 = arith.mulf %296, %297 : vector<32x256xf32>
    %299 = arith.addf %292, %298 : vector<32x256xf32>
    %c0_102 = arith.constant 0 : index
    %c7_103 = arith.constant 7 : index
    %300 = vector.load %arg13[%c0_102, %c7_103] : memref<32x9xf32, #tpu.memory_space<vmem>>, vector<32x1xf32>
    %c240_i32_104 = arith.constant 240 : i32
    %301 = tpu.dynamic_rotate %249 by %c240_i32_104 dim 1 : vector<32x256xf32>, i32 -> vector<32x256xf32>
    %302 = vector.broadcast %300 : vector<32x1xf32> to vector<32x256xf32>
    %303 = arith.mulf %301, %302 : vector<32x256xf32>
    %304 = vector.broadcast %46 : vector<1x256xf32> to vector<32x256xf32>
    %305 = arith.mulf %303, %304 : vector<32x256xf32>
    %306 = arith.addf %299, %305 : vector<32x256xf32>
    %c0_105 = arith.constant 0 : index
    %c8_106 = arith.constant 8 : index
    %307 = vector.load %arg13[%c0_105, %c8_106] : memref<32x9xf32, #tpu.memory_space<vmem>>, vector<32x1xf32>
    %c239_i32_107 = arith.constant 239 : i32
    %308 = tpu.dynamic_rotate %249 by %c239_i32_107 dim 1 : vector<32x256xf32>, i32 -> vector<32x256xf32>
    %309 = vector.broadcast %307 : vector<32x1xf32> to vector<32x256xf32>
    %310 = arith.mulf %308, %309 : vector<32x256xf32>
    %311 = vector.broadcast %53 : vector<1x256xf32> to vector<32x256xf32>
    %312 = arith.mulf %310, %311 : vector<32x256xf32>
    %313 = arith.addf %306, %312 : vector<32x256xf32>
    %314 = vector.extract_strided_slice %313 {offsets = [0, 0], sizes = [16, 256], strides = [1, 1]} : vector<32x256xf32> to vector<16x256xf32>
    %315 = vector.extract_strided_slice %313 {offsets = [16, 0], sizes = [16, 256], strides = [1, 1]} : vector<32x256xf32> to vector<16x256xf32>
    %cst_108 = arith.constant 5.000000e-01 : f32
    %316 = vector.broadcast %cst_108 : f32 to vector<16x256xf32>
    %317 = arith.mulf %316, %314 : vector<16x256xf32>
    %cst_109 = arith.constant 4.471500e-02 : f32
    %318 = vector.broadcast %cst_109 : f32 to vector<16x256xf32>
    %319 = arith.mulf %318, %314 : vector<16x256xf32>
    %320 = arith.mulf %319, %314 : vector<16x256xf32>
    %321 = arith.mulf %320, %314 : vector<16x256xf32>
    %322 = arith.addf %314, %321 : vector<16x256xf32>
    %cst_110 = arith.constant 0.797884583 : f32
    %323 = vector.broadcast %cst_110 : f32 to vector<16x256xf32>
    %324 = arith.mulf %323, %322 : vector<16x256xf32>
    %325 = math.tanh %324 : vector<16x256xf32>
    %cst_111 = arith.constant 1.000000e+00 : f32
    %326 = vector.broadcast %cst_111 : f32 to vector<16x256xf32>
    %327 = arith.addf %326, %325 : vector<16x256xf32>
    %328 = arith.mulf %317, %327 : vector<16x256xf32>
    %c0_112 = arith.constant 0 : index
    %c0_113 = arith.constant 0 : index
    %329 = vector.load %arg15[%c0_112, %c0_113] : memref<8x16xbf16, #tpu.memory_space<vmem>>, vector<8x16xbf16>
    %330 = arith.mulf %328, %315 : vector<16x256xf32>
    %331 = arith.truncf %330 : vector<16x256xf32> to vector<16x256xbf16>
    %cst_114 = arith.constant dense<0.000000e+00> : vector<8x256xf32>
    %332 = tpu.matmul %329, %331, %cst_114 {dimension_numbers = #tpu.dot_dimension_numbers<[1], [0], [0], [1], [0, 0, 1, 1], [], []>} : vector<8x16xbf16>, vector<16x256xbf16>, vector<8x256xf32> -> vector<8x256xf32>
    %c0_115 = arith.constant 0 : index
    %c0_116 = arith.constant 0 : index
    %333 = vector.load %arg16[%c0_115, %c0_116] : memref<8x1xf32, #tpu.memory_space<vmem>>, vector<8x1xf32>
    %334 = vector.broadcast %333 : vector<8x1xf32> to vector<8x256xf32>
    %335 = arith.addf %332, %334 : vector<8x256xf32>
    %336 = arith.addf %217, %335 : vector<8x256xf32>
    %c0_117 = arith.constant 0 : index
    %c0_118 = arith.constant 0 : index
    %c0_119 = arith.constant 0 : index
    %337 = vector.load %arg17[%c0_117, %c0_118, %c0_119] : memref<1x8x256xf32, #tpu.memory_space<vmem>>, vector<1x8x256xf32>
    %338 = vector.shape_cast %337 : vector<1x8x256xf32> to vector<8x256xf32>
    %339 = vector.shape_cast %336 : vector<8x256xf32> to vector<1x8x256xf32>
    tpu.vector_store %arg17[%c0_117, %c0_118, %c0_119], %339 {strides = array<i32>} : memref<1x8x256xf32, #tpu.memory_space<vmem>>, vector<1x8x256xf32>,
    return
  }
  func.func @transform_0(%arg0: i32) -> (i32, i32, i32) {
    %c0_i32 = arith.constant 0 : i32
    %c0_i32_0 = arith.constant 0 : i32
    %c0_i32_1 = arith.constant 0 : i32
    return %arg0, %c0_i32, %c0_i32_0 : i32, i32, i32
  }
  func.func @transform_1(%arg0: i32) -> (i32, i32, i32) {
    %c0_i32 = arith.constant 0 : i32
    %c0_i32_0 = arith.constant 0 : i32
    %c0_i32_1 = arith.constant 0 : i32
    %c0_i32_2 = arith.constant 0 : i32
    return %c0_i32, %c0_i32_0, %c0_i32_1 : i32, i32, i32
  }
  func.func @transform_2(%arg0: i32) -> (i32, i32) {
    %c0_i32 = arith.constant 0 : i32
    %c0_i32_0 = arith.constant 0 : i32
    %c0_i32_1 = arith.constant 0 : i32
    return %c0_i32, %c0_i32_0 : i32, i32
  }
  func.func @transform_3(%arg0: i32) -> (i32, i32) {
    %c0_i32 = arith.constant 0 : i32
    %c0_i32_0 = arith.constant 0 : i32
    %c0_i32_1 = arith.constant 0 : i32
    return %c0_i32, %c0_i32_0 : i32, i32
  }
  func.func @transform_4(%arg0: i32) -> (i32, i32) {
    %c0_i32 = arith.constant 0 : i32
    %c0_i32_0 = arith.constant 0 : i32
    %c0_i32_1 = arith.constant 0 : i32
    return %c0_i32, %c0_i32_0 : i32, i32
  }
  func.func @transform_5(%arg0: i32) -> (i32, i32) {
    %c0_i32 = arith.constant 0 : i32
    %c0_i32_0 = arith.constant 0 : i32
    %c0_i32_1 = arith.constant 0 : i32
    return %c0_i32, %c0_i32_0 : i32, i32
  }
  func.func @transform_6(%arg0: i32) -> (i32, i32) {
    %c0_i32 = arith.constant 0 : i32
    %c0_i32_0 = arith.constant 0 : i32
    %c0_i32_1 = arith.constant 0 : i32
    return %c0_i32, %c0_i32_0 : i32, i32
  }
  func.func @transform_7(%arg0: i32) -> (i32, i32) {
    %c0_i32 = arith.constant 0 : i32
    %c0_i32_0 = arith.constant 0 : i32
    %c0_i32_1 = arith.constant 0 : i32
    return %c0_i32, %c0_i32_0 : i32, i32
  }
  func.func @transform_8(%arg0: i32) -> (i32, i32) {
    %c0_i32 = arith.constant 0 : i32
    %c0_i32_0 = arith.constant 0 : i32
    %c0_i32_1 = arith.constant 0 : i32
    return %c0_i32, %c0_i32_0 : i32, i32
  }
  func.func @transform_9(%arg0: i32) -> (i32, i32, i32) {
    %c0_i32 = arith.constant 0 : i32
    %c0_i32_0 = arith.constant 0 : i32
    %c0_i32_1 = arith.constant 0 : i32
    %c0_i32_2 = arith.constant 0 : i32
    return %c0_i32, %c0_i32_0, %c0_i32_1 : i32, i32, i32
  }
  func.func @transform_10(%arg0: i32) -> (i32, i32) {
    %c0_i32 = arith.constant 0 : i32
    %c0_i32_0 = arith.constant 0 : i32
    %c0_i32_1 = arith.constant 0 : i32
    return %c0_i32, %c0_i32_0 : i32, i32
  }
  func.func @transform_11(%arg0: i32) -> (i32, i32) {
    %c0_i32 = arith.constant 0 : i32
    %c0_i32_0 = arith.constant 0 : i32
    %c0_i32_1 = arith.constant 0 : i32
    return %c0_i32, %c0_i32_0 : i32, i32
  }
  func.func @transform_12(%arg0: i32) -> (i32, i32) {
    %c0_i32 = arith.constant 0 : i32
    %c0_i32_0 = arith.constant 0 : i32
    %c0_i32_1 = arith.constant 0 : i32
    return %c0_i32, %c0_i32_0 : i32, i32
  }
  func.func @transform_13(%arg0: i32) -> (i32, i32) {
    %c0_i32 = arith.constant 0 : i32
    %c0_i32_0 = arith.constant 0 : i32
    %c0_i32_1 = arith.constant 0 : i32
    return %c0_i32, %c0_i32_0 : i32, i32
  }
  func.func @transform_14(%arg0: i32) -> (i32, i32) {
    %c0_i32 = arith.constant 0 : i32
    %c0_i32_0 = arith.constant 0 : i32
    %c0_i32_1 = arith.constant 0 : i32
    return %c0_i32, %c0_i32_0 : i32, i32
  }
  func.func @transform_15(%arg0: i32) -> (i32, i32) {
    %c0_i32 = arith.constant 0 : i32
    %c0_i32_0 = arith.constant 0 : i32
    %c0_i32_1 = arith.constant 0 : i32
    return %c0_i32, %c0_i32_0 : i32, i32
  }
  func.func @transform_16(%arg0: i32) -> (i32, i32, i32) {
    %c0_i32 = arith.constant 0 : i32
    %c0_i32_0 = arith.constant 0 : i32
    %c0_i32_1 = arith.constant 0 : i32
    return %arg0, %c0_i32, %c0_i32_0 : i32, i32, i32
  }
}

</mosaic_0001>

<bundles_post_ra>
// kernel: tpu_custom_call.1
= control target key start
LH: loop header
LB: loop body
LE: loop exit
PB: predicated region body
PF: predicated region fallthrough
CT: control target
= control target key end

     0   :  { %s4444_s0 = inlined_call_operand.vmem [shape: f32[2,8,256], index: 0, kind: input, shape index: {}]   ;;  %s4445_s1 = inlined_call_operand.vmem [shape: f32[2,8,1], index: 1, kind: input, shape index: {}]   ;;  %s4446_s2 = inlined_call_operand.vmem [shape: bf16[24,8], index: 2, kind: input, shape index: {}]   ;;  %s4447_s3 = inlined_call_operand.vmem [shape: f32[24,1], index: 3, kind: input, shape index: {}]   ;;  %s4448_s4 = inlined_call_operand.vmem [shape: f32[24,9], index: 4, kind: input, shape index: {}]   ;;  %s4449_s5 = inlined_call_operand.vmem [shape: f32[24,1], index: 5, kind: input, shape index: {}]   ;;  %s4450_s6 = inlined_call_operand.vmem [shape: f32[8,1], index: 6, kind: input, shape index: {}]   ;;  %s4451_s7 = inlined_call_operand.vmem [shape: bf16[8,8], index: 7, kind: input, shape index: {}]   ;;  %s4452_s8 = inlined_call_operand.vmem [shape: f32[8,1], index: 8, kind: input, shape index: {}]   ;;  %s4453_s9 = inlined_call_operand.vmem [shape: f32[2,8,1], index: 9, kind: input, shape index: {}]   ;;  %s4454_s10 = inlined_call_operand.vmem [shape: bf16[32,8], index: 10, kind: input, shape index: {}]   ;;  %s4455_s11 = inlined_call_operand.vmem [shape: f32[32,1], index: 11, kind: input, shape index: {}]   ;;  %s4456_s12 = inlined_call_operand.vmem [shape: f32[32,9], index: 12, kind: input, shape index: {}]   ;;  %s4457_s13 = inlined_call_operand.vmem [shape: f32[32,1], index: 13, kind: input, shape index: {}]   ;;  %s4458_s14 = inlined_call_operand.vmem [shape: bf16[8,16], index: 14, kind: input, shape index: {}]   ;;  %s4459_s15 = inlined_call_operand.vmem [shape: f32[8,1], index: 15, kind: input, shape index: {}]   ;;  %s4460_s16 = inlined_call_operand.hbm [shape: f32[2,8,256], index: 16, kind: output, shape index: {}]  }
   0x1   :  { %4534 = sst [smem:[#allocation36_spill]] %s4444_s0 }
   0x2   :  { %4535 = sst [smem:[#allocation37_spill]] %s4445_s1 }
   0x3   :  { %4536 = sst [smem:[#allocation38_spill]] %s4446_s2 }
   0x4   :  { %4537 = sst [smem:[#allocation39_spill]] %s4447_s3 }
   0x5   :  { %4538 = sst [smem:[#allocation40_spill]] %s4448_s4 }
   0x6   :  { %4539 = sst [smem:[#allocation41_spill]] %s4449_s5 }
   0x7   :  { %4540 = sst [smem:[#allocation42_spill]] %s4450_s6 }
   0x8   :  { %4541 = sst [smem:[#allocation43_spill]] %s4452_s8 }
   0x9   :  { %4542 = sst [smem:[#allocation44_spill]] %s4453_s9 }
   0xa   :  { %21 = vsyncpa [#allocation3], 0 }
   0xb   :  { %23 = vsyncpa [#allocation3 + $0x1], 0  ;;  %s2811_s21 = smov 0   ;;  %s2813_s22 = smov 0  }
   0xc   :  { %s2815_s23 = smov 0   ;;  %s2817_s24 = smov 0  }
   0xd LB: > { %4543 = sst [smem:[#allocation5_spill]] %s2701_s23  ;;  %s2832_s25 = sadd.s32 4294967295, %s2705_s24   ;;  %s2705_s24 = sphi %s2817_s24, %s4647_s24   ;;  %s2701_s23 = sphi %s2815_s23, %s4649_s23   ;;  %s2697_s22 = sphi %s2813_s22, %s4651_s22   ;;  %s2693_s21 = sphi %s2811_s21, %s4650_s21  }
   0xe   : > { %s2439_s26 = sadd.s32 4294967294, %s2705_s24   ;;  %s2836_s27 = sadd.s32 1, %s2705_s24  }
   0xf   : > { %4544 = sst [smem:[#allocation6_spill]] %s2836_s27  ;;  %s377_s28 = sadd.s32 1, %s2701_s23 }
  0x10   : > { %s374_s29 = ssub.s32 %s2705_s24, %s2836_s27  ;;  %p387_p0 = scmp.ne.s32.totalorder %s2701_s23, %s2697_s22 }
  0x11   : > { %p375_p1 = scmp.eq.s32.totalorder %s374_s29, 0  ;;  %p388_p2 = scmp.eq.s32.totalorder %s2832_s25, 1 }
  0x12   : > { %p393_p3 = scmp.ne.s32.totalorder %s2697_s22, %s2693_s21  ;;  %p394_p4 = scmp.eq.s32.totalorder %s2439_s26, 1 }
  0x13   : > { %s2847_s30 = scalar_select %p375_p1, %s2701_s23, %s377_s28  }
  0x14   : > { %p2849_p5 = por %p388_p2, %p387_p0  ;;  %p2853_p6 = por %p394_p4, %p393_p3 }
  0x15   : > { %4545 = sst [smem:[#allocation7_spill]] %s2847_s30  ;;  %p2442_p7 = scmp.ge.s32.totalorder %s2705_s24, 1 }
  0x16   : > { %p465_p8 = scmp.lt.s32.totalorder %s2705_s24, 3 }
  0x18   : > { %p466_p9 = pnand %p2442_p7, %p465_p8 }
  0x1a   : > { %469 = sbr.rel (%p466_p9) target bundleno = 2585 (0xa19), region = 84 }
  0x21   : > { %s4548_s1 = sld [smem:[#allocation37_spill]]  ;;  %v4484_v1 = vmov 0   ;;  %s4549_s4 = sld [smem:[#allocation40_spill]]  ;;  %v4486_v5 = vmov 1   ;;  %v4482_v9 = vmov 2   ;;  %v4488_v11 = vmov 3  }
  0x22   : > { %2545 = vset.pattern.permute.xlu0 %v4484_v1  ;;  %721 = vmatprep.mubr.bf16.mxu0 %v4484_v1  ;;  %s4550_s3 = sld [smem:[#allocation39_spill]]  ;;  %s4551_s5 = sld [smem:[#allocation41_spill]]  ;;  %v4478_v12 = vmov 5   ;;  %v4480_v13 = vmov 4   ;;  %v4476_v14 = vmov 6   ;;  %v4472_v15 = vmov 8  }
  0x23   : > { %2546 = vset.pattern.permute.xlu1 %v4484_v1  ;;  %p515_p10 = scmp.lt.s32.totalorder %s2832_s25, 1  ;;  %v4474_v16 = vmov 7   ;;  %s4552_s28 = sld [smem:[#allocation36_spill]]  ;;  %vm682_vm0 = vcmask 1043456   ;;  %vm675_vm1 = vcmask 64512  }
  0x24   : > { %s4553_s2 = sld [smem:[#allocation38_spill]]  ;;  %s4468_s20 = smov 127  }
  0x25   : > { %s516_s18 = scalar_select %p515_p10, %s2832_s25, 1 }
  0x26   : > { %s4462_s26 = smov 16   ;;  %s4464_s23 = smov 113  }
  0x27   : > { %v627_v0 = vld [vmem:[%s4548_s1] sm:$0xff]  ;;  %v2462_v2 = vld [vmem:[%s4548_s1 + $0x8] sm:$0xff]  ;;  %s2486_s19 = sshll.u32 %s516_s18, 4  ;;  %s4470_s18 = smov 1  }
  0x28   : > { %630 = vperm.xlu0 %2545, %v627_v0   ;;  %v2871_v3 = vld [vmem:[%s4549_s4] sm:$0xff]  ;;  %v650_v4 = vld [vmem:[%s4550_s3 + $0x8] sm:$0xff]  ;;  %s4466_s30 = smov 112   ;;  %s4556_s1 = smov 112  }
  0x29   : > { %659 = vperm.xlu1 %2546, %v650_v4   ;;  %v649_v6 = vld [vmem:[%s4550_s3] sm:$0xff]  ;;  %v762_v7 = vld [vmem:[%s4549_s4 + $0x8] sm:$0xff]  ;;  %s2916_s29 = scalar_lea.vmem %s4552_s28, %s2486_s19  ;;  %s4502_s19 = smov 17  }
  0x2a   : > { %v741_v8 = vld [vmem:[%s4551_s5 + $0x8] sm:$0xff]  ;;  %v740_v10 = vld [vmem:[%s4551_s5] sm:$0xff]  ;;  %s4500_s28 = smov 15   ;;  %s4568_s6 = sld [smem:[#allocation42_spill]] }
  0x2b   : > { %v521_v17 = vld [vmem:[%s2916_s29] sm:$0xff]  ;;  %v522_v18 = vld [vmem:[%s2916_s29 + $0x8] sm:$0xff]  ;;  %s4585_s8 = sld [smem:[#allocation43_spill]]  ;;  %s4586_s9 = sld [smem:[#allocation44_spill]] }
  0x2c   : > { %639 = vperm.xlu0 %2545, %v2462_v2   ;;  %v584_v19 = vrot.slane %v521_v17, 4  ;;  %v599_v20 = vmul.f32 %v521_v17, %v521_v17  ;;  %v590_v21 = vrot.slane %v522_v18, 4  ;;  %v600_v22 = vmul.f32 %v522_v18, %v522_v18 }
  0x2d   : > { %654 = vperm.xlu1 %2546, %v649_v6  }
  0x2e   : > { %v585_v23 = vadd.f32 %v584_v19, %v521_v17  ;;  %v601_v24 = vrot.slane %v599_v20, 4  ;;  %v591_v25 = vadd.f32 %v590_v21, %v522_v18  ;;  %v607_v26 = vrot.slane %v600_v22, 4 }
  0x30   : > { %2550 = vset.pattern.permute.xlu0 %v4486_v5  ;;  %v586_v27 = vrot.slane %v585_v23, 2  ;;  %v602_v28 = vadd.f32 %v601_v24, %v599_v20  ;;  %v592_v29 = vrot.slane %v591_v25, 2  ;;  %v608_v30 = vadd.f32 %v607_v26, %v600_v22 }
  0x31   : > { %836 = vperm.xlu0 %2550, %v2871_v3   ;;  %2547 = vset.pattern.permute.xlu1 %v4486_v5 }
  0x32   : > { %840 = vperm.xlu1 %2547, %v762_v7   ;;  %v587_v31 = vadd.f32 %v586_v27, %v585_v23  ;;  %v603_v32 = vrot.slane %v602_v28, 2  ;;  %v593_v33 = vadd.f32 %v592_v29, %v591_v25  ;;  %v609_v34 = vrot.slane %v608_v30, 2 }
  0x34   : > { %v588_v35 = vrot.slane %v587_v31, 1  ;;  %v604_v36 = vadd.f32 %v603_v32, %v602_v28  ;;  %v594_v37 = vrot.slane %v593_v33, 1  ;;  %v610_v38 = vadd.f32 %v609_v34, %v608_v30 }
  0x35   : > { %2551 = vset.pattern.permute.xlu0 %v4484_v1 }
  0x36   : > { %790 = vperm.xlu0 %2551, %v762_v7   ;;  %2548 = vset.pattern.permute.xlu1 %v4482_v9  ;;  %v589_v39 = vadd.f32 %v588_v35, %v587_v31  ;;  %v605_v40 = vrot.slane %v604_v36, 1  ;;  %v595_v41 = vadd.f32 %v594_v37, %v593_v33  ;;  %v611_v42 = vrot.slane %v610_v38, 1  ;;  %v2606_v35 = vld [vmem:[%s4553_s2 + $0x8] ss:$0 sps:$4 sm:$0xff]  }
  0x37   : > { %889 = vperm.xlu1 %2548, %v762_v7  }
  0x38   : > { %v597_v43 = vmul.f32 0.125, %v589_v39  ;;  %v606_v44 = vadd.f32 %v605_v40, %v604_v36  ;;  %v598_v45 = vmul.f32 0.125, %v595_v41  ;;  %v612_v46 = vadd.f32 %v611_v42, %v610_v38 }
  0x3a   : > { %750 = vperm.xlu0 %2551, %v741_v8   ;;  %v613_v47 = vmul.f32 0.125, %v606_v44  ;;  %v615_v48 = vmul.f32 %v597_v43, %v597_v43  ;;  %v614_v49 = vmul.f32 0.125, %v612_v46  ;;  %v616_v50 = vmul.f32 %v598_v45, %v598_v45 }
  0x3b   : > { %2549 = vset.pattern.permute.xlu1 %v4488_v11  ;;  %v619_v56 = vsub.f32 %v521_v17, %v597_v43  ;;  %v620_v57 = vsub.f32 %v522_v18, %v598_v45 }
  0x3c   : > { %938 = vperm.xlu1 %2549, %v762_v7   ;;  %v617_v51 = vsub.f32 %v613_v47, %v615_v48  ;;  %v618_v52 = vsub.f32 %v614_v49, %v616_v50  ;;  %v523_v47 = vlaneseq }
  0x3e   : > { %785 = vperm.xlu0 %2551, %v2871_v3   ;;  %v621_v53 = vadd.f32 1e-05, %v617_v51  ;;  %v622_v54 = vadd.f32 1e-05, %v618_v52  ;;  %v3044_v50 = vand.u32 127, %v523_v47 }
  0x40   : > { %2552 = vset.pattern.permute.xlu1 %v4482_v9  ;;  %2609 = vrsqrt.f32 %v621_v53  ;;  %v525_v53 = vadd.s32 128, %v3044_v50  ;;  %vm776_vm7 = vcmp.lt.s32.totalorder %v3044_v50, 17  ;;  %vm828_vm14 = vcmp.lt.s32.totalorder %v3044_v50, 16 }
  0x41   : > { %885 = vperm.xlu1 %2552, %v2871_v3   ;;  %2611 = vrsqrt.f32 %v622_v54  ;;  %vm877_vm15 = vcmp.lt.s32.totalorder %v3044_v50, 15 }
  0x42   : > { %745 = vperm.xlu0 %2551, %v740_v10   ;;  %v2605_v10 = vld [vmem:[%s4553_s2] sm:$0xff]   ;;  %s4573_s2 = smov 17  }
  0x45   : > { %2553 = vset.pattern.permute.xlu1 %v4480_v13 }
  0x46   : > { %2554 = vset.pattern.permute.xlu0 %v4478_v12  ;;  %968 = vperm.xlu1 %2553, %v762_v7  }
  0x47   : > { %1011 = vperm.xlu0 %2554, %v762_v7  }
  0x4a   : > { %2558 = vset.pattern.permute.xlu1 %v4478_v12  ;;  %v2610_v55 = vpop.eup %2609 }
  0x4b   : > { %2555 = vset.pattern.permute.xlu0 %v4488_v11  ;;  %1007 = vperm.xlu1 %2558, %v2871_v3   ;;  %v2612_v58 = vpop.eup %2611  ;;  %v625_v59 = vmul.f32 %v2610_v55, %v619_v56  ;;  %v526_v55 = vcvt.s32.f32 %v3044_v50  ;;  %v527_v56 = vcvt.s32.f32 %v525_v53  ;;  %v4490_v53 = vmov 0.0  }
  0x4c   : > { %934 = vperm.xlu0 %2555, %v2871_v3   ;;  %v626_v60 = vmul.f32 %v2612_v58, %v620_v57 }
  0x4f   : > { %2559 = vset.pattern.permute.xlu1 %v4472_v15 }
  0x50   : > { %2556 = vset.pattern.permute.xlu0 %v4480_v13  ;;  %1158 = vperm.xlu1 %2559, %v762_v7  }
  0x51   : > { %964 = vperm.xlu0 %2556, %v2871_v3  }
  0x54   : > { %2563 = vset.pattern.permute.xlu1 %v4484_v1 }
  0x55   : > { %2557 = vset.pattern.permute.xlu0 %v4476_v14 }
  0x56   : > { %1060 = vperm.xlu0 %2557, %v762_v7  }
  0x5a   : > { %1056 = vperm.xlu0 %2557, %v2871_v3  }
  0x5e   : > { %2560 = vset.pattern.permute.xlu0 %v4474_v16 }
  0x5f   : > { %1109 = vperm.xlu0 %2560, %v762_v7  }
  0x63   : > { %1105 = vperm.xlu0 %2560, %v2871_v3  }
  0x67   : > { %2561 = vset.pattern.permute.xlu0 %v4472_v15 }
  0xa7   : > { %v631_v61 = vpop.permute.xlu0 %630 }
  0xa8   : > { %v633_v62 = vmul.f32 %v631_v61, %v625_v59  ;;  %v634_v63 = vmul.f32 %v631_v61, %v626_v60  ;;  %v660_v17 = vpop.permute.xlu1 %659  ;;  %v528_v59 = vmul.f32 0.0625, %v526_v55  ;;  %v529_v60 = vmul.f32 0.0625, %v527_v56 }
  0xab   : > { %v640_v0 = vpop.permute.xlu0 %639 }
  0xac   : > { %v643_v2 = vadd.f32 %v640_v0, %v634_v63  ;;  %v642_v4 = vadd.f32 %v640_v0, %v633_v62  ;;  %v655_v18 = vpop.permute.xlu1 %654  ;;  %v3058_v63 = vfloor.f32 %v528_v59  ;;  %v3060_v0 = vfloor.f32 %v529_v60 }
  0xae   : > { %v648_v6 = vpack.c.bf16 %v643_v2, %v643_v2  ;;  %v647_v7 = vpack.c.bf16 %v642_v4, %v642_v4  ;;  %v532_v4 = vmul.f32 16.0, %v3058_v63  ;;  %vm536_vm2 = vcmp.ge.f32.partialorder %v3058_v63, 1.0 }
  0xaf   : > { %vm537_vm4 = vcmp.ge.f32.partialorder %v3060_v0, 1.0  ;;  %vm566_vm13 = vcmp.lt.f32.partialorder %v3058_v63, 15.0 }
  0xb0   : > { %2465 = vmatprep.subr.msk.bf16.mxu0 %vm682_vm0, %v648_v6  ;;  %v684_v8 = vsel %vm682_vm0, %v647_v7, 0  ;;  %v3004_v29 = vpop.permute.xlu0 %836  ;;  %v533_v6 = vmul.f32 16.0, %v3060_v0  ;;  %v3142_v60 = vsel %vm537_vm4, 1.0, %v4490_v53 }
  0xb1   : > { %690 = vmatpush1.bf16.msra.mxu0 %v684_v8  ;;  %v2992_v26 = vpop.permute.xlu1 %840 }
  0xb4   : > { %2466 = vmatmul.mubr.msk.bf16.vlgmr.msra.gmra.mrb[0].mxu0 %vm675_vm1, %v2605_v10  ;;  %v3070_v10 = vsub.f32 %v526_v55, %v532_v4 }
  0xb5   : > { %731 = vmatprep.mubr.bf16.mxu0 %v4484_v1  ;;  %v3012_v31 = vpop.permute.xlu0 %790 }
  0xb6   : > { %v2996_v27 = vpop.permute.xlu1 %889  ;;  %vm538_vm3 = vcmp.ge.f32.partialorder %v3070_v10, 1.0  ;;  %vm550_vm8 = vcmp.lt.f32.partialorder %v3070_v10, 15.0  ;;  %v4564_v10 = vmov 0.0  }
  0xb7   : > { %vm540_vm6 = vmand %vm536_vm2, %vm538_vm3 }
  0xb8   : > { %v3106_v55 = vsel %vm540_vm6, 1.0, %v4490_v53  ;;  %vm552_vm11 = vmand %vm536_vm2, %vm550_vm8  ;;  %vm567_vm6 = vcmp.lt.f32.partialorder %v3060_v0, 15.0 }
  0xb9   : > { %v3016_v33 = vpop.permute.xlu0 %750  ;;  %4559 = vst [vmem:[#allocation10_spill] sm:$0xff] %v3106_v55  ;;  %v3295_v63 = vsel %vm567_vm6, 1.0, %v4564_v10 }
  0xbb   : > { %v3002_v28 = vpop.permute.xlu1 %938 }
  0xbc   : > { %2467 = vmatmul.mubr.msk.bf16.gmra.mrb[4].mxu0 %vm675_vm1, %v2606_v35 }
  0xbd   : > { %v3023_v36 = vpop.permute.xlu0 %785 }
  0xc0   : > { %v3008_v30 = vpop.permute.xlu1 %885 }
  0xc1   : > { %v3028_v38 = vpop.permute.xlu0 %745 }
  0xc5   : > { %v3014_v32 = vpop.permute.xlu1 %968 }
  0xc6   : > { %v3030_v40 = vpop.permute.xlu0 %1011 }
  0xca   : > { %v3018_v34 = vpop.permute.xlu1 %1007 }
  0xcb   : > { %v3036_v43 = vpop.permute.xlu0 %934 }
  0xcf   : > { %v3026_v37 = vpop.permute.xlu1 %1158 }
  0xd0   : > { %v965_v45 = vpop.permute.xlu0 %964 }
  0xd5   : > { %v3040_v48 = vpop.permute.xlu0 %1060 }
  0xd9   : > { %v3048_v52 = vpop.permute.xlu0 %1056 }
  0xde   : > { %v3054_v57 = vpop.permute.xlu0 %1109 }
  0xe2   : > { %v3056_v62 = vpop.permute.xlu0 %1105 }
  0xe3   : > { %4557 = vst [vmem:[#allocation8_spill] sm:$0xff] %v3056_v62 }
 0x187   : > { %v723_v19 = vpop.f32.mrb[0].mxu0 }
 0x188   : > { %v2928_v20 = vadd.f32 %v723_v19, %v655_v18  ;;  %v725_v21 = vpop.f32.mrb[1].mxu0 }
 0x189   : > { %v727_v22 = vpop.f32.mrb[2].mxu0  ;;  %v2944_v25 = vadd.f32 %v725_v21, %v655_v18 }
 0x18a   : > { %v729_v23 = vpop.f32.mrb[3].mxu0  ;;  %914 = vrot.lane.b32.xlu0 %v2928_v20, %s4470_s18  ;;  %764 = vrot.lane.b32.xlu1 %v2928_v20, %s4502_s19 }
 0x18b   : > { %v2938_v24 = vadd.f32 %v729_v23, %v660_v17  ;;  %v3099_v23 = vmul.f32 %v965_v45, %v2944_v25 }
 0x18e   : > { %987 = vrot.lane.b32.xlu0 %v2928_v20, %s4468_s20  ;;  %816 = vrot.lane.b32.xlu1 %v2928_v20, %s4462_s26 }
 0x192   : > { %772 = vrot.lane.b32.xlu0 %v2938_v24, %s4502_s19  ;;  %865 = vrot.lane.b32.xlu1 %v2928_v20, %s4500_s28 }
 0x196   : > { %873 = vrot.lane.b32.xlu0 %v2938_v24, %s4500_s28  ;;  %770 = vrot.lane.b32.xlu1 %v2944_v25, %s4502_s19 }
 0x19a   : > { %1154 = vperm.xlu0 %2561, %v2871_v3   ;;  %822 = vrot.lane.b32.xlu1 %v2944_v25, %s4462_s26  ;;  %v2966_v3 = vadd.f32 %v727_v22, %v660_v17  ;;  %s4498_s26 = smov 111   ;;  %v3072_v17 = vsub.f32 %v527_v56, %v533_v6  ;;  %v3096_v22 = vmul.f32 %v965_v45, %v2928_v20  ;;  %v3137_v45 = vsel %vm536_vm2, 1.0, %v4490_v53  ;;  %vm568_vm2 = vmand %vm566_vm13, %vm538_vm3 }
 0x19b   : > { %v3195_v13 = vsel %vm568_vm2, 1.0, %v4490_v53 }
 0x19c   : > { %vm539_vm5 = vcmp.ge.f32.partialorder %v3072_v17, 1.0  ;;  %vm551_vm10 = vcmp.lt.f32.partialorder %v3072_v17, 15.0  ;;  %4558 = vst [vmem:[#allocation9_spill] sm:$0xff] %v3096_v22  ;;  %v3103_v35 = vmul.f32 %v3014_v32, %v2966_v3 }
 0x19d   : > { %vm541_vm9 = vmand %vm537_vm4, %vm539_vm5  ;;  %v3192_v12 = vsel %vm551_vm10, 1.0, %v4490_v53 }
 0x19e   : > { %995 = vrot.lane.b32.xlu0 %v2938_v24, %s4468_s20  ;;  %871 = vrot.lane.b32.xlu1 %v2944_v25, %s4500_s28  ;;  %vm553_vm12 = vmand %vm537_vm4, %vm551_vm10  ;;  %vm926_vm4 = vcmp.lt.s32.totalorder %v3044_v50, 1 }
 0x19f   : > { %2562 = vset.pattern.permute.xlu0 %v4484_v1  ;;  %vm579_vm2 = vmand %vm567_vm6, %vm551_vm10 }
 0x1a2   : > { %1036 = vrot.lane.b32.xlu0 %v2928_v20, %s4464_s23  ;;  %920 = vrot.lane.b32.xlu1 %v2944_v25, %s4470_s18  ;;  %s4554_s23 = smov 16  }
 0x1a6   : > { %1085 = vrot.lane.b32.xlu0 %v2928_v20, %s4466_s30  ;;  %993 = vrot.lane.b32.xlu1 %v2944_v25, %s4468_s20  ;;  %s4555_s30 = smov 113  }
 0x1aa   : > { %1134 = vrot.lane.b32.xlu0 %v2928_v20, %s4498_s26  ;;  %766 = vrot.lane.b32.xlu1 %v2966_v3, %s4502_s19  ;;  %s4575_s19 = smov 15  }
 0x1ae   : > { %818 = vrot.lane.b32.xlu1 %v2966_v3, %s4554_s23 }
 0x1b2   : > { %867 = vrot.lane.b32.xlu1 %v2966_v3, %s4500_s28  ;;  %s4580_s28 = smov 127  }
 0x1b6   : > { %916 = vrot.lane.b32.xlu1 %v2966_v3, %s4470_s18 }
 0x1ba   : > { %989 = vrot.lane.b32.xlu1 %v2966_v3, %s4468_s20 }
 0x1be   : > { %1038 = vrot.lane.b32.xlu1 %v2966_v3, %s4555_s30 }
 0x1c2   : > { %1087 = vrot.lane.b32.xlu1 %v2966_v3, %s4556_s1 }
 0x1c6   : > { %824 = vrot.lane.b32.xlu1 %v2938_v24, %s4554_s23 }
 0x1ca   : > { %1136 = vrot.lane.b32.xlu1 %v2966_v3, %s4498_s26 }
 0x1ce   : > { %922 = vrot.lane.b32.xlu1 %v2938_v24, %s4470_s18  ;;  %s4582_s18 = smov 111  }
 0x1d2   : > { %1042 = vrot.lane.b32.xlu1 %v2944_v25, %s4555_s30 }
 0x1d6   : > { %1044 = vrot.lane.b32.xlu1 %v2938_v24, %s4555_s30 }
 0x1da   : > { %1093 = vrot.lane.b32.xlu1 %v2938_v24, %s4556_s1 }
 0x1de   : > { %1142 = vrot.lane.b32.xlu1 %v2938_v24, %s4498_s26 }
 0x1e2   : > { %1091 = vrot.lane.b32.xlu1 %v2944_v25, %s4556_s1 }
 0x1e6   : > { %1140 = vrot.lane.b32.xlu1 %v2944_v25, %s4498_s26  ;;  %v3119_v25 = vsel %vm541_vm9, 1.0, %v4490_v53  ;;  %vm1048_vm9 = vcmp.lt.s32.totalorder %v3044_v50, 113  ;;  %s4577_s26 = smov 1  }
 0x1e7   : > { %4560 = vst [vmem:[#allocation11_spill] sm:$0xff] %v3119_v25 }
 0x1fc   : > { %v765_v39 = vpop.permute.xlu1 %764  ;;  %v3066_v7 = vpop.permute.xlu0 %914 }
 0x200   : > { %v3032_v41 = vpop.permute.xlu1 %816  ;;  %v3076_v19 = vpop.permute.xlu0 %987 }
 0x204   : > { %v3034_v42 = vpop.permute.xlu1 %865  ;;  %v773_v47 = vpop.permute.xlu0 %772 }
 0x208   : > { %v771_v44 = vpop.permute.xlu1 %770 }
 0x209   : > { %v777_v56 = vsel %vm776_vm7, %v765_v39, %v771_v44  ;;  %v780_v59 = vsel %vm776_vm7, %v771_v44, %v765_v39  ;;  %v3132_v44 = vmul.f32 %v3014_v32, %v2938_v24  ;;  %v3150_v24 = vsel %vm552_vm11, 1.0, %v4490_v53 }
 0x20a   : > { %v799_v4 = vmul.f32 %v3023_v36, %v777_v56  ;;  %v3153_v32 = vsel %vm553_vm12, 1.0, %v4490_v53  ;;  %vm1097_vm11 = vcmp.lt.s32.totalorder %v3044_v50, 112  ;;  %vm3282_vm12 = vmand %vm566_vm13, %vm550_vm8 }
 0x20b   : > { %v3309_v0 = vsel %vm3282_vm12, 1.0, %v4564_v10  ;;  %vm1269_vm12 = vcmask 27648  }
 0x20c   : > { %v3038_v46 = vpop.permute.xlu1 %822 }
 0x210   : > { %v3042_v49 = vpop.permute.xlu1 %871 }
 0x214   : > { %v3046_v51 = vpop.permute.xlu1 %920 }
 0x218   : > { %v3051_v54 = vpop.permute.xlu1 %993 }
 0x21c   : > { %v767_v58 = vpop.permute.xlu1 %766 }
 0x21d   : > { %v778_v3 = vsel %vm776_vm7, %v767_v58, %v773_v47  ;;  %v781_v39 = vsel %vm776_vm7, %v773_v47, %v767_v58  ;;  %v798_v58 = vmul.f32 %v3023_v36, %v780_v59  ;;  %v3164_v36 = vsel %vm538_vm3, 1.0, %v4490_v53  ;;  %vm569_vm3 = vmand %vm567_vm6, %vm539_vm5 }
 0x21e   : > { %v800_v6 = vmul.f32 %v3012_v31, %v781_v39  ;;  %v801_v47 = vmul.f32 %v3012_v31, %v778_v3  ;;  %v874_v31 = vpop.permute.xlu0 %873  ;;  %v3174_v3 = vsel %vm539_vm5, 1.0, %v4490_v53  ;;  %v3179_v39 = vsel %vm550_vm8, 1.0, %v4490_v53 }
 0x21f   : > { %vm999_vm5 = vcmp.lt.s32.totalorder %v3044_v50, 127  ;;  %v3217_v5 = vsel %vm569_vm3, 1.0, %v4490_v53  ;;  %vm1146_vm8 = vcmp.lt.s32.totalorder %v3044_v50, 111 }
 0x220   : > { %v819_v61 = vpop.permute.xlu1 %818 }
 0x224   : > { %v3062_v2 = vpop.permute.xlu1 %867 }
 0x225   : > { %v879_v9 = vsel %vm877_vm15, %v3062_v2, %v874_v31  ;;  %v882_v1 = vsel %vm877_vm15, %v874_v31, %v3062_v2 }
 0x228   : > { %v3068_v8 = vpop.permute.xlu1 %916 }
 0x22c   : > { %v3074_v18 = vpop.permute.xlu1 %989 }
 0x230   : > { %v3082_v21 = vpop.permute.xlu1 %1038 }
 0x234   : > { %v3116_v20 = vpop.permute.xlu1 %1087 }
 0x238   : > { %v825_v15 = vpop.permute.xlu1 %824 }
 0x239   : > { %v830_v56 = vsel %vm828_vm14, %v819_v61, %v825_v15  ;;  %v833_v59 = vsel %vm828_vm14, %v825_v15, %v819_v61  ;;  %v804_v15 = vmul.f32 %v3106_v55, %v798_v58  ;;  %v805_v61 = vmul.f32 %v3119_v25, %v799_v4 }
 0x23a   : > { %v849_v16 = vmul.f32 %v2992_v26, %v833_v59  ;;  %v850_v14 = vmul.f32 %v2992_v26, %v830_v56  ;;  %v829_v26 = vsel %vm828_vm14, %v3032_v41, %v3038_v46  ;;  %v832_v58 = vsel %vm828_vm14, %v3038_v46, %v3032_v41 }
 0x23b   : > { %v806_v4 = vmul.f32 %v3106_v55, %v800_v6  ;;  %v807_v56 = vmul.f32 %v3119_v25, %v801_v47  ;;  %v3222_v41 = vsel %vm566_vm13, 1.0, %v4490_v53  ;;  %v878_v46 = vsel %vm877_vm15, %v3034_v42, %v3042_v49  ;;  %v3232_v47 = vpop.permute.xlu0 %1154 }
 0x23c   : > { %v3208_v59 = vpop.permute.xlu1 %1136  ;;  %v881_v6 = vsel %vm877_vm15, %v3042_v49, %v3034_v42  ;;  %4561 = vst [vmem:[#allocation12_spill] sm:$0xff] %v3232_v47  ;;  %v855_v2 = vmul.f32 %v3137_v45, %v849_v16  ;;  %v856_v31 = vmul.f32 %v3142_v60, %v850_v14  ;;  %v810_v11 = vadd.f32 %v804_v15, %v3028_v38 }
 0x23d   : > { %v811_v53 = vadd.f32 %v805_v61, %v3028_v38  ;;  %v847_v25 = vmul.f32 %v3004_v29, %v832_v58  ;;  %v848_v55 = vmul.f32 %v3004_v29, %v829_v26  ;;  %v812_v62 = vadd.f32 %v806_v4, %v3016_v33 }
 0x23e   : > { %v813_v22 = vadd.f32 %v807_v56, %v3016_v33  ;;  %v898_v42 = vmul.f32 %v2996_v27, %v882_v1  ;;  %v899_v49 = vmul.f32 %v2996_v27, %v879_v9  ;;  %v896_v14 = vmul.f32 %v3008_v30, %v881_v6 }
 0x23f   : > { %v897_v16 = vmul.f32 %v3008_v30, %v878_v46  ;;  %v861_v33 = vadd.f32 %v855_v2, %v812_v62  ;;  %v853_v27 = vmul.f32 %v3137_v45, %v847_v25  ;;  %v854_v30 = vmul.f32 %v3142_v60, %v848_v55 }
 0x240   : > { %v923_v47 = vpop.permute.xlu1 %922  ;;  %v862_v15 = vadd.f32 %v856_v31, %v813_v22  ;;  %v927_v61 = vsel %vm926_vm4, %v3066_v7, %v3046_v51  ;;  %v930_v62 = vsel %vm926_vm4, %v3046_v51, %v3066_v7  ;;  %v904_v22 = vmul.f32 %v3150_v24, %v898_v42 }
 0x241   : > { %v928_v38 = vsel %vm926_vm4, %v3068_v8, %v923_v47  ;;  %v931_v29 = vsel %vm926_vm4, %v923_v47, %v3068_v8  ;;  %v996_v8 = vpop.permute.xlu0 %995  ;;  %v902_v58 = vmul.f32 %v3150_v24, %v896_v14  ;;  %v903_v4 = vmul.f32 %v3153_v32, %v897_v16 }
 0x242   : > { %v947_v1 = vmul.f32 %v3002_v28, %v931_v29  ;;  %v948_v9 = vmul.f32 %v3002_v28, %v928_v38  ;;  %v905_v28 = vmul.f32 %v3153_v32, %v899_v49  ;;  %v1001_v56 = vsel %vm999_vm5, %v3074_v18, %v996_v8 }
 0x243   : > { %v1004_v51 = vsel %vm999_vm5, %v996_v8, %v3074_v18  ;;  %v945_v46 = vmul.f32 %v3036_v43, %v930_v62  ;;  %v946_v6 = vmul.f32 %v3036_v43, %v927_v61  ;;  %v910_v47 = vadd.f32 %v904_v22, %v861_v33 }
 0x244   : > { %v953_v26 = vmul.f32 %v3164_v36, %v947_v1  ;;  %v954_v25 = vmul.f32 %v3174_v3, %v948_v9  ;;  %v1043_v55 = vpop.permute.xlu1 %1042  ;;  %v911_v2 = vadd.f32 %v905_v28, %v862_v15  ;;  %v859_v18 = vadd.f32 %v853_v27, %v810_v11 }
 0x245   : > { %v860_v31 = vadd.f32 %v854_v30, %v811_v53  ;;  %v1020_v42 = vmul.f32 %v3030_v40, %v1001_v56  ;;  %v1021_v43 = vmul.f32 %v3030_v40, %v1004_v51  ;;  %v3312_v53 = vsel %vm579_vm2, 1.0, %v4564_v10  ;;  %v1037_v27 = vpop.permute.xlu0 %1036 }
 0x246   : > { %v959_v49 = vadd.f32 %v953_v26, %v910_v47  ;;  %v960_v14 = vadd.f32 %v954_v25, %v911_v2  ;;  %v908_v40 = vadd.f32 %v902_v58, %v859_v18  ;;  %v951_v29 = vmul.f32 %v3164_v36, %v945_v46 }
 0x247   : > { %v909_v38 = vadd.f32 %v903_v4, %v860_v31  ;;  %v952_v33 = vmul.f32 %v3174_v3, %v946_v6  ;;  %v1000_v15 = vsel %vm999_vm5, %v3076_v19, %v3051_v54  ;;  %v1026_v30 = vmul.f32 %v3179_v39, %v1020_v42 }
 0x248   : > { %v1045_v16 = vpop.permute.xlu1 %1044  ;;  %v1027_v61 = vmul.f32 %v3192_v12, %v1021_v43  ;;  %v983_v62 = vadd.f32 %v3103_v35, %v959_v49  ;;  %v984_v8 = vadd.f32 %v3132_v44, %v960_v14  ;;  %v1049_v28 = vsel %vm1048_vm9, %v1037_v27, %v1043_v55  ;;  %v4565_v14 = vld [vmem:[#allocation9_spill] sm:$0xff] }
 0x249   : > { %v1050_v17 = vsel %vm1048_vm9, %v3082_v21, %v1045_v16  ;;  %v1053_v11 = vsel %vm1048_vm9, %v1045_v16, %v3082_v21  ;;  %v1003_v21 = vsel %vm999_vm5, %v3051_v54, %v3076_v19  ;;  %v1052_v54 = vsel %vm1048_vm9, %v1043_v55, %v1037_v27 }
 0x24a   : > { %v1069_v1 = vmul.f32 %v3040_v48, %v1050_v17  ;;  %v1070_v9 = vmul.f32 %v3040_v48, %v1053_v11  ;;  %v957_v58 = vadd.f32 %v951_v29, %v908_v40  ;;  %v958_v4 = vadd.f32 %v952_v33, %v909_v38 }
 0x24b   : > { %v1018_v55 = vmul.f32 %v3018_v34, %v1000_v15  ;;  %v1019_v56 = vmul.f32 %v3018_v34, %v1003_v21  ;;  %v1032_v51 = vadd.f32 %v1026_v30, %v983_v62  ;;  %v1033_v7 = vadd.f32 %v1027_v61, %v984_v8  ;;  %v1086_v34 = vpop.permute.xlu0 %1085  ;;  %v4566_v21 = vld [vmem:[#allocation8_spill] sm:$0xff] }
 0x24c   : > { %v1094_v22 = vpop.permute.xlu1 %1093  ;;  %v1075_v26 = vmul.f32 %v3195_v13, %v1069_v1  ;;  %v1076_v35 = vmul.f32 %v3217_v5, %v1070_v9  ;;  %v1067_v47 = vmul.f32 %v3048_v52, %v1049_v28  ;;  %v1068_v2 = vmul.f32 %v3048_v52, %v1052_v54 }
 0x24d   : > { %v1099_v48 = vsel %vm1097_vm11, %v3116_v20, %v1094_v22  ;;  %v1102_v19 = vsel %vm1097_vm11, %v1094_v22, %v3116_v20  ;;  %v982_v49 = vadd.f32 %v3099_v23, %v958_v4  ;;  %v981_v16 = vadd.f32 %v4565_v14, %v957_v58  ;;  %v4567_v58 = vld [vmem:[#allocation12_spill] sm:$0xff] }
 0x24e   : > { %v1118_v44 = vmul.f32 %v3054_v57, %v1099_v48  ;;  %v1119_v25 = vmul.f32 %v3054_v57, %v1102_v19  ;;  %v1081_v31 = vadd.f32 %v1075_v26, %v1032_v51  ;;  %v1082_v10 = vadd.f32 %v1076_v35, %v1033_v7 }
 0x24f   : > { %v1024_v52 = vmul.f32 %v3179_v39, %v1018_v55  ;;  %v1025_v17 = vmul.f32 %v3192_v12, %v1019_v56  ;;  %v1073_v33 = vmul.f32 %v3195_v13, %v1067_v47  ;;  %v1074_v15 = vmul.f32 %v3217_v5, %v1068_v2  ;;  %v1135_v8 = vpop.permute.xlu0 %1134 }
 0x250   : > { %v1124_v46 = vmul.f32 %v3222_v41, %v1118_v44  ;;  %v1125_v20 = vmul.f32 %v3295_v63, %v1119_v25  ;;  %v1143_v6 = vpop.permute.xlu1 %1142  ;;  %v4571_v14 = vmov 0   ;;  %vm1286_vm2 = vcmask 1041408  }
 0x251   : > { %v1148_v57 = vsel %vm1146_vm8, %v3208_v59, %v1143_v6  ;;  %v1151_v18 = vsel %vm1146_vm8, %v1143_v6, %v3208_v59  ;;  %v1030_v61 = vadd.f32 %v1024_v52, %v981_v16  ;;  %v1031_v62 = vadd.f32 %v1025_v17, %v982_v49  ;;  %v742_v49 = vld [vmem:[%s4551_s5 + $0x10] sm:$0xff]  ;;  %v733_v52 = vpop.f32.mrb[4].mxu0 }
 0x252   : > { %v1167_v42 = vmul.f32 %v3026_v37, %v1148_v57  ;;  %v1168_v43 = vmul.f32 %v3026_v37, %v1151_v18  ;;  %v1130_v38 = vadd.f32 %v1124_v46, %v1081_v31  ;;  %v1131_v29 = vadd.f32 %v1125_v20, %v1082_v10  ;;  %v651_v10 = vld [vmem:[%s4550_s3 + $0x10] sm:$0xff]  ;;  %v735_v17 = vpop.f32.mrb[5].mxu0 }
 0x253   : > { %v1079_v26 = vadd.f32 %v1073_v33, %v1030_v61  ;;  %v1080_v25 = vadd.f32 %v1074_v15, %v1031_v62  ;;  %v4569_v31 = vmov 3   ;;  %v4572_v16 = vmov 2  }
 0x254   : > { %v1173_v11 = vmul.f32 %v3309_v0, %v1167_v42  ;;  %v1174_v40 = vmul.f32 %v3312_v53, %v1168_v43  ;;  %v1092_v59 = vpop.permute.xlu1 %1091  ;;  %v3408_v42 = vld [vmem:[%s4549_s4 + $0x10] sm:$0xff]  ;;  %v4570_v43 = vmov 1  }
 0x255   : > { %v1098_v37 = vsel %vm1097_vm11, %v1086_v34, %v1092_v59  ;;  %v1101_v23 = vsel %vm1097_vm11, %v1092_v59, %v1086_v34  ;;  %v1215_v34 = vld [vmem:[%s4568_s6] sm:$0xff] }
 0x256   : > { %v1116_v1 = vmul.f32 %v4566_v21, %v1098_v37  ;;  %v1117_v9 = vmul.f32 %v4566_v21, %v1101_v23  ;;  %v3372_v27 = vadd.f32 %v1173_v11, %v1130_v38  ;;  %v3374_v30 = vadd.f32 %v1174_v40, %v1131_v29  ;;  %v737_v11 = vpop.f32.mrb[6].mxu0 }
 0x257   : > { %v738_v40 = vpop.f32.mrb[7].mxu0 }
 0x258   : > { %v1122_v22 = vmul.f32 %v3222_v41, %v1116_v1  ;;  %v1123_v28 = vmul.f32 %v3295_v63, %v1117_v9  ;;  %v1141_v54 = vpop.permute.xlu1 %1140  ;;  %v1199_v48 = vmul.f32 %v3372_v27, %v3372_v27  ;;  %v1200_v19 = vmul.f32 %v3374_v30, %v3374_v30 }
 0x259   : > { %v1147_v35 = vsel %vm1146_vm8, %v1135_v8, %v1141_v54  ;;  %v1150_v44 = vsel %vm1146_vm8, %v1141_v54, %v1135_v8 }
 0x25a   : > { %v1165_v4 = vmul.f32 %v4567_v58, %v1147_v35  ;;  %v1166_v55 = vmul.f32 %v4567_v58, %v1150_v44  ;;  %v1201_v56 = vadd.f32 %v1200_v19, %v1199_v48  ;;  %v1128_v46 = vadd.f32 %v1122_v22, %v1079_v26 }
 0x25b   : > { %v1129_v20 = vadd.f32 %v1123_v28, %v1080_v25 }
 0x25c   : > { %v1171_v51 = vmul.f32 %v3309_v0, %v1165_v4  ;;  %v1172_v7 = vmul.f32 %v3312_v53, %v1166_v55  ;;  %1202 = vadd.xlane.f32.xlu0 %v1201_v56  ;;  %v4574_v55 = vmov 4  }
 0x25e   : > { %v3390_v6 = vadd.f32 %v1171_v51, %v1128_v46  ;;  %v3392_v47 = vadd.f32 %v1172_v7, %v1129_v20 }
 0x260   : > { %v1183_v2 = vmul.f32 %v3390_v6, %v3390_v6  ;;  %v1184_v57 = vmul.f32 %v3392_v47, %v3392_v47 }
 0x262   : > { %v1185_v18 = vadd.f32 %v1184_v57, %v1183_v2 }
 0x264   : > { %1186 = vadd.xlane.f32.xlu1 %v1185_v18 }
 0x272   : > { %1218 = vperm.xlu0 %2562, %v1215_v34   ;;  %v4579_v34 = vmov 7  }
 0x275   : > { %664 = vperm.xlu1 %2563, %v651_v10   ;;  %v4581_v10 = vmov 8  }
 0x276   : > { %2567 = vset.pattern.permute.xlu0 %v4569_v31 }
 0x279   : > { %795 = vperm.xlu1 %2563, %v3408_v42  }
 0x27d   : > { %2564 = vset.pattern.permute.xlu1 %v4570_v43 }
 0x27e   : > { %844 = vperm.xlu1 %2564, %v3408_v42  }
 0x282   : > { %2565 = vset.pattern.permute.xlu1 %v4571_v14 }
 0x283   : > { %755 = vperm.xlu1 %2565, %v742_v49  }
 0x287   : > { %2566 = vset.pattern.permute.xlu1 %v4572_v16 }
 0x2e9   : > { %v1203_v59 = vpop.xlane.xlu0 %1202 }
 0x2ea   : > { %2613 = vrsqrt.f32 %v1203_v59  ;;  %vm1206_vm10 = vcmp.eq.f32.partialorder %v1203_v59, inf  ;;  %v1209_v15 = vand.u32 2147483648, %v1203_v59  ;;  %vm1208_vm13 = vcmp.eq.f32.partialorder %v1203_v59, 0.0 }
 0x2f1   : > { %v1187_v38 = vpop.xlane.xlu1 %1186  ;;  %v1219_v51 = vpop.permute.xlu0 %1218 }
 0x2f2   : > { %2615 = vrsqrt.f32 %v1187_v38  ;;  %vm1190_vm6 = vcmp.eq.f32.partialorder %v1187_v38, inf  ;;  %v1193_v61 = vand.u32 2147483648, %v1187_v38  ;;  %vm1192_vm3 = vcmp.eq.f32.partialorder %v1187_v38, 0.0 }
 0x2f4   : > { %v2614_v29 = vpop.eup %2613 }
 0x2f5   : > { %v1205_v33 = vmul.f32 %v2614_v29, %v1203_v59  ;;  %v665_v62 = vpop.permute.xlu1 %664 }
 0x2f6   : > { %v3418_v22 = vadd.f32 %v733_v52, %v665_v62  ;;  %v3427_v25 = vadd.f32 %v735_v17, %v665_v62 }
 0x2f7   : > { %v1207_v37 = vsel %vm1206_vm10, %v1203_v59, %v1205_v33  ;;  %vm1282_vm10 = vcmask 31744  }
 0x2f8   : > { %v1210_v23 = vsel %vm1208_vm13, %v1209_v15, %v1207_v37  ;;  %768 = vrot.lane.b32.xlu0 %v3418_v22, %s4573_s2 }
 0x2f9   : > { %v1211_v21 = vmax.f32 %v1210_v23, 1e-12  ;;  %v796_v37 = vpop.permute.xlu1 %795 }
 0x2fb   : > { %2617 = vrcp.f32 %v1211_v21 }
 0x2fc   : > { %v2616_v1 = vpop.eup %2615  ;;  %942 = vperm.xlu0 %2567, %v3408_v42  }
 0x2fd   : > { %v1189_v9 = vmul.f32 %v2616_v1, %v1187_v38  ;;  %v845_v23 = vpop.permute.xlu1 %844 }
 0x2ff   : > { %v1191_v8 = vsel %vm1190_vm6, %v1187_v38, %v1189_v9 }
 0x300   : > { %v1194_v28 = vsel %vm1192_vm3, %v1193_v61, %v1191_v8  ;;  %820 = vrot.lane.b32.xlu0 %v3418_v22, %s4554_s23 }
 0x301   : > { %v1195_v54 = vmax.f32 %v1194_v28, 1e-12  ;;  %2568 = vset.pattern.permute.xlu0 %v4574_v55 }
 0x302   : > { %v756_v21 = vpop.permute.xlu1 %755 }
 0x303   : > { %2619 = vrcp.f32 %v1195_v54 }
 0x304   : > { %826 = vrot.lane.b32.xlu0 %v3427_v25, %s4554_s23 }
 0x305   : > { %v2618_v48 = vpop.eup %2617 }
 0x306   : > { %v1214_v19 = vmul.f32 %v2618_v48, %v3374_v30  ;;  %v1213_v26 = vmul.f32 %v2618_v48, %v3372_v27 }
 0x308   : > { %v1226_v35 = vpack.c.bf16 %v1214_v19, %v1214_v19  ;;  %v1225_v44 = vpack.c.bf16 %v1213_v26, %v1213_v26  ;;  %869 = vrot.lane.b32.xlu0 %v3418_v22, %s4575_s19 }
 0x30a   : > { %1229 = vmatprep.subr.bf16.mxu1 %v1226_v35  ;;  %v1343_v58 = vrot.slane %v1226_v35, 2  ;;  %v1342_v4 = vrot.slane %v1225_v44, 2 }
 0x30b   : > { %1230 = vmatpush1.bf16.xpose.msra.mxu1 %v1225_v44 }
 0x30c   : > { %1346 = vmatprep.subr.bf16.mxu0 %v1343_v58  ;;  %875 = vrot.lane.b32.xlu0 %v3427_v25, %s4575_s19 }
 0x30d   : > { %v2620_v56 = vpop.eup %2619  ;;  %1347 = vmatpush1.bf16.xpose.msra.mxu0 %v1342_v4 }
 0x30e   : > { %v1197_v27 = vmul.f32 %v2620_v56, %v3390_v6  ;;  %v1198_v30 = vmul.f32 %v2620_v56, %v3392_v47  ;;  %v4576_v6 = vmov 5   ;;  %v4578_v47 = vmov 6  }
 0x310   : > { %v1221_v7 = vmul.f32 %v1219_v51, %v1197_v27  ;;  %v1222_v46 = vmul.f32 %v1219_v51, %v1198_v30  ;;  %972 = vperm.xlu0 %2568, %v3408_v42  }
 0x312   : > { %v1224_v20 = vpack.c.bf16 %v1222_v46, %v1222_v46  ;;  %v1223_v2 = vpack.c.bf16 %v1221_v7, %v1221_v7 }
 0x314   : > { %1261 = vmatprep.mubr.bf16.mxu1 %v1224_v20  ;;  %v1337_v57 = vrot.slane %v1224_v20, 2  ;;  %v1336_v18 = vrot.slane %v1223_v2, 2  ;;  %2569 = vset.pattern.permute.xlu0 %v4576_v6 }
 0x315   : > { %1262 = vmatmul.mubr.bf16.vlgmr.msra.gmra.mrb[0].mxu1 %v1223_v2  ;;  %1015 = vperm.xlu0 %2569, %v3408_v42  }
 0x316   : > { %1378 = vmatprep.mubr.bf16.mxu0 %v1337_v57  ;;  %1325 = vmatprep.mubr.bf16.mxu1 %v4571_v14 }
 0x317   : > { %1379 = vmatmul.mubr.bf16.vlgmr.msra.gmra.mrb[8].mxu0 %v1336_v18 }
 0x318   : > { %1504 = vmatprep.mubr.bf16.mxu0 %v4571_v14 }
 0x319   : > { %924 = vrot.lane.b32.xlu0 %v3427_v25, %s4577_s26 }
 0x31a   : > { %2570 = vset.pattern.permute.xlu0 %v4578_v47 }
 0x31d   : > { %1064 = vperm.xlu0 %2570, %v3408_v42  }
 0x321   : > { %2571 = vset.pattern.permute.xlu0 %v4579_v34 }
 0x322   : > { %1113 = vperm.xlu0 %2571, %v3408_v42  }
 0x326   : > { %991 = vrot.lane.b32.xlu0 %v3418_v22, %s4580_s28 }
 0x327   : > { %2572 = vset.pattern.permute.xlu0 %v4581_v10 }
 0x32a   : > { %997 = vrot.lane.b32.xlu0 %v3427_v25, %s4580_s28 }
 0x32e   : > { %1162 = vperm.xlu0 %2572, %v3408_v42  }
 0x332   : > { %1040 = vrot.lane.b32.xlu0 %v3418_v22, %s4555_s30 }
 0x333   : > { %2573 = vset.pattern.permute.xlu0 %v4571_v14 }
 0x336   : > { %1046 = vrot.lane.b32.xlu0 %v3427_v25, %s4555_s30 }
 0x33a   : > { %1089 = vrot.lane.b32.xlu0 %v3418_v22, %s4556_s1 }
 0x33e   : > { %1095 = vrot.lane.b32.xlu0 %v3427_v25, %s4556_s1 }
 0x342   : > { %1144 = vrot.lane.b32.xlu0 %v3427_v25, %s4582_s18 }
 0x36a   : > { %v769_v35 = vpop.permute.xlu0 %768 }
 0x37b   : > { %v943_v44 = vpop.permute.xlu0 %942 }
 0x37f   : > { %v821_v58 = vpop.permute.xlu0 %820 }
 0x383   : > { %v827_v4 = vpop.permute.xlu0 %826 }
 0x387   : > { %v870_v56 = vpop.permute.xlu0 %869 }
 0x38b   : > { %v876_v51 = vpop.permute.xlu0 %875 }
 0x38f   : > { %v973_v27 = vpop.permute.xlu0 %972 }
 0x394   : > { %v1016_v30 = vpop.permute.xlu0 %1015 }
 0x398   : > { %v925_v7 = vpop.permute.xlu0 %924 }
 0x39c   : > { %v1065_v46 = vpop.permute.xlu0 %1064 }
 0x3a1   : > { %v3484_v20 = vpop.permute.xlu0 %1113 }
 0x3a5   : > { %v992_v2 = vpop.permute.xlu0 %991 }
 0x3a9   : > { %v998_v18 = vpop.permute.xlu0 %997 }
 0x3e8   : > { %v1263_v49 = vpop.f32.mrb[0].mxu1 }
 0x3e9   : > { %v1265_v52 = vpop.f32.mrb[1].mxu1  ;;  %v1270_v17 = vsel %vm1269_vm12, %v1263_v49, -inf }
 0x3ea   : > { %v1380_v11 = vpop.f32.mrb[8].mxu0  ;;  %1271 = vmax.xlane.f32.xlu1 %v1270_v17  ;;  %v1266_v40 = vpop.f32.mrb[2].mxu1 }
 0x3eb   : > { %v1267_v59 = vpop.f32.mrb[3].mxu1  ;;  %v1382_v38 = vpop.f32.mrb[9].mxu0  ;;  %v1386_v15 = vsel %vm1269_vm12, %v1380_v11, -inf }
 0x3ec   : > { %v1383_v29 = vpop.f32.mrb[10].mxu0  ;;  %v3490_v40 = vpop.permute.xlu0 %1162  ;;  %v831_v59 = vsel %vm828_vm14, %v821_v58, %v827_v4  ;;  %v834_v38 = vsel %vm828_vm14, %v827_v4, %v821_v58 }
 0x3ed   : > { %v1384_v33 = vpop.f32.mrb[11].mxu0  ;;  %v4583_v29 = vld [vmem:[#allocation10_spill] sm:$0xff] }
 0x3fb   : > { %893 = vperm.xlu1 %2566, %v3408_v42  }
 0x3ff   : > { %2574 = vset.pattern.permute.xlu1 %v4571_v14 }
 0x41f   : > { %1387 = vmax.xlane.f32.xlu1 %v1386_v15  ;;  %v4584_v15 = vld [vmem:[#allocation11_spill] sm:$0xff] }
 0x430   : > { %774 = vrot.lane.b32.xlu1 %v3427_v25, %s4573_s2 }
 0x434   : > { %918 = vrot.lane.b32.xlu1 %v3418_v22, %s4577_s26 }
 0x477   : > { %v1272_v1 = vpop.xlane.xlu1 %1271 }
 0x478   : > { %v1273_v9 = vsub.f32 %v1263_v49, %v1272_v1 }
 0x47a   : > { %v1274_v61 = vmul.f32 1.442695, %v1273_v9  ;;  %v851_v9 = vmul.f32 %v845_v23, %v834_v38 }
 0x47b   : > { %v894_v8 = vpop.permute.xlu1 %893 }
 0x47c   : > { %2621 = vpow2.f32 %v1274_v61  ;;  %v852_v61 = vmul.f32 %v845_v23, %v831_v59 }
 0x47e   : > { %v858_v58 = vmul.f32 %v3142_v60, %v852_v61 }
 0x486   : > { %v3474_v62 = vpop.eup %2621 }
 0x487   : > { %v1276_v42 = vsel %vm1269_vm12, %v3474_v62, 0.0 }
 0x488   : > { %1277 = vadd.xlane.f32.xlu1 %v1276_v42  ;;  %v880_v42 = vsel %vm877_vm15, %v870_v56, %v876_v51 }
 0x4ac   : > { %v1388_v28 = vpop.xlane.xlu1 %1387 }
 0x4ad   : > { %v1389_v54 = vsub.f32 %v1380_v11, %v1388_v28  ;;  %v1041_v28 = vpop.permute.xlu0 %1040 }
 0x4af   : > { %v1390_v48 = vmul.f32 1.442695, %v1389_v54 }
 0x4b0   : > { %v775_v57 = vpop.permute.xlu1 %774 }
 0x4b1   : > { %2623 = vpow2.f32 %v1390_v48  ;;  %v779_v49 = vsel %vm776_vm7, %v769_v35, %v775_v57  ;;  %v782_v52 = vsel %vm776_vm7, %v775_v57, %v769_v35  ;;  %v857_v35 = vmul.f32 %v3137_v45, %v851_v9 }
 0x4b2   : > { %v802_v17 = vmul.f32 %v796_v37, %v782_v52  ;;  %v803_v11 = vmul.f32 %v796_v37, %v779_v49  ;;  %v883_v37 = vsel %vm877_vm15, %v876_v51, %v870_v56  ;;  %v901_v57 = vmul.f32 %v894_v8, %v880_v42 }
 0x4b3   : > { %v900_v4 = vmul.f32 %v894_v8, %v883_v37  ;;  %v1002_v9 = vsel %vm999_vm5, %v992_v2, %v998_v18 }
 0x4b4   : > { %v808_v33 = vmul.f32 %v4583_v29, %v802_v17  ;;  %v809_v1 = vmul.f32 %v4584_v15, %v803_v11  ;;  %v907_v51 = vmul.f32 %v3153_v32, %v901_v57 }
 0x4b5   : > { %v906_v56 = vmul.f32 %v3150_v24, %v900_v4 }
 0x4b6   : > { %v814_v54 = vadd.f32 %v808_v33, %v756_v21  ;;  %v815_v48 = vadd.f32 %v809_v1, %v756_v21  ;;  %v1047_v21 = vpop.permute.xlu0 %1046 }
 0x4b8   : > { %v863_v52 = vadd.f32 %v857_v35, %v814_v54  ;;  %v864_v17 = vadd.f32 %v858_v58, %v815_v48  ;;  %v979_v54 = vmul.f32 %v973_v27, %v3418_v22  ;;  %v980_v48 = vmul.f32 %v973_v27, %v3427_v25 }
 0x4b9   : > { %v1051_v35 = vsel %vm1048_vm9, %v1041_v28, %v1047_v21  ;;  %v1054_v58 = vsel %vm1048_vm9, %v1047_v21, %v1041_v28 }
 0x4ba   : > { %v912_v38 = vadd.f32 %v906_v56, %v863_v52  ;;  %v913_v33 = vadd.f32 %v907_v51, %v864_v17  ;;  %v1090_v61 = vpop.permute.xlu0 %1089  ;;  %v1072_v52 = vmul.f32 %v1065_v46, %v1054_v58 }
 0x4bb   : > { %v3478_v19 = vpop.eup %2623 }
 0x4bc   : > { %v1392_v26 = vsel %vm1269_vm12, %v3478_v19, 0.0  ;;  %v1078_v51 = vmul.f32 %v3217_v5, %v1072_v52 }
 0x4bd   : > { %1393 = vadd.xlane.f32.xlu1 %v1392_v26  ;;  %v919_v26 = vpop.permute.xlu1 %918 }
 0x4be   : > { %v929_v49 = vsel %vm926_vm4, %v919_v26, %v925_v7  ;;  %v932_v23 = vsel %vm926_vm4, %v925_v7, %v919_v26  ;;  %v1005_v7 = vsel %vm999_vm5, %v998_v18, %v992_v2 }
 0x4bf   : > { %v949_v11 = vmul.f32 %v943_v44, %v932_v23  ;;  %v950_v59 = vmul.f32 %v943_v44, %v929_v49  ;;  %v1022_v44 = vmul.f32 %v1016_v30, %v1002_v9  ;;  %v1023_v26 = vmul.f32 %v1016_v30, %v1005_v7 }
 0x4c0   : > { %v1071_v23 = vmul.f32 %v1065_v46, %v1051_v35 }
 0x4c1   : > { %v955_v1 = vmul.f32 %v3164_v36, %v949_v11  ;;  %v956_v8 = vmul.f32 %v3174_v3, %v950_v59  ;;  %v1028_v2 = vmul.f32 %v3179_v39, %v1022_v44  ;;  %v1029_v18 = vmul.f32 %v3192_v12, %v1023_v26 }
 0x4c2   : > { %v1077_v56 = vmul.f32 %v3195_v13, %v1071_v23 }
 0x4c3   : > { %v961_v42 = vadd.f32 %v955_v1, %v912_v38  ;;  %v962_v37 = vadd.f32 %v956_v8, %v913_v33 }
 0x4c5   : > { %v985_v4 = vadd.f32 %v979_v54, %v961_v42  ;;  %v986_v57 = vadd.f32 %v980_v48, %v962_v37 }
 0x4c7   : > { %v1035_v30 = vadd.f32 %v1029_v18, %v986_v57  ;;  %v1034_v28 = vadd.f32 %v1028_v2, %v985_v4 }
 0x4c9   : > { %v1084_v38 = vadd.f32 %v1078_v51, %v1035_v30  ;;  %v1083_v33 = vadd.f32 %v1077_v56, %v1034_v28  ;;  %v2474_v30 = vld [vmem:[%s4586_s9 + $0x8] sm:$0xff] }
 0x4ce   : > { %1138 = vrot.lane.b32.xlu1 %v3418_v22, %s4582_s18  ;;  %v1096_v22 = vpop.permute.xlu0 %1095 }
 0x4cf   : > { %v1100_v25 = vsel %vm1097_vm11, %v1090_v61, %v1096_v22  ;;  %v1103_v27 = vsel %vm1097_vm11, %v1096_v22, %v1090_v61 }
 0x4d0   : > { %v1120_v21 = vmul.f32 %v3484_v20, %v1100_v25  ;;  %v1121_v11 = vmul.f32 %v3484_v20, %v1103_v27  ;;  %v1565_v27 = vld [vmem:[%s4586_s9] sm:$0xff] }
 0x4d2   : > { %v1145_v46 = vpop.permute.xlu0 %1144  ;;  %v1126_v9 = vmul.f32 %v3222_v41, %v1120_v21  ;;  %v1127_v7 = vmul.f32 %v3295_v63, %v1121_v11 }
 0x4d4   : > { %v1133_v54 = vadd.f32 %v1127_v7, %v1084_v38  ;;  %v1132_v48 = vadd.f32 %v1126_v9, %v1083_v33 }
 0x515   : > { %v1278_v49 = vpop.xlane.xlu1 %1277 }
 0x516   : > { %2625 = vrcp.f32 %v1278_v49 }
 0x520   : > { %v2626_v44 = vpop.eup %2625 }
 0x521   : > { %v1280_v57 = vmul.f32 %v2626_v44, %v3474_v62  ;;  %v1515_v62 = vld [vmem:[%s4585_s8] sm:$0xff]  ;;  %v1591_v44 = vld [vmem:[%s4455_s11 + $0x18] sm:$0xff] }
 0x522   : > { %1518 = vperm.xlu0 %2573, %v1515_v62  }
 0x526   : > { %1568 = vperm.xlu0 %2573, %v1565_v27   ;;  %v1690_v27 = vld [vmem:[%s4457_s13 + $0x18] sm:$0xff] }
 0x52a   : > { %1577 = vperm.xlu0 %2573, %v2474_v30  }
 0x52e   : > { %2576 = vset.pattern.permute.xlu0 %v4570_v43 }
 0x54a   : > { %v1394_v17 = vpop.xlane.xlu1 %1393 }
 0x54b   : > { %2627 = vrcp.f32 %v1394_v17 }
 0x54e   : > { %v1139_v59 = vpop.permute.xlu1 %1138 }
 0x54f   : > { %v1149_v1 = vsel %vm1146_vm8, %v1139_v59, %v1145_v46  ;;  %v1152_v8 = vsel %vm1146_vm8, %v1145_v46, %v1139_v59 }
 0x550   : > { %v1169_v61 = vmul.f32 %v3490_v40, %v1149_v1  ;;  %v1170_v42 = vmul.f32 %v3490_v40, %v1152_v8  ;;  %v1281_v40 = vpack.c.bf16 %v1280_v57, %v1280_v57  ;;  %v3616_v57 = vld [vmem:[%s4456_s12 + $0x10] sm:$0xff] }
 0x552   : > { %v1175_v20 = vmul.f32 %v3309_v0, %v1169_v61  ;;  %v1176_v37 = vmul.f32 %v3312_v53, %v1170_v42  ;;  %v1460_v61 = vld [vmem:[%s4451_s7] sm:$0xf] }
 0x553   : > { %v1588_v42 = vld [vmem:[%s4455_s11] sm:$0xff] }
 0x554   : > { %v1182_v26 = vadd.f32 %v1176_v37, %v1133_v54  ;;  %v1181_v35 = vadd.f32 %v1175_v20, %v1132_v48  ;;  %v3571_v20 = vld [vmem:[%s4456_s12 + $0x8] sm:$0xff]  ;;  %1594 = vperm.xlu1 %2574, %v1588_v42   ;;  %v1590_v37 = vld [vmem:[%s4455_s11 + $0x10] sm:$0xff]  ;;  %v3584_v48 = vld [vmem:[%s4456_s12] sm:$0xff] }
 0x555   : > { %v2628_v23 = vpop.eup %2627  ;;  %1816 = vperm.xlu0 %2576, %v3571_v20   ;;  %v1589_v54 = vld [vmem:[%s4455_s11 + $0x8] sm:$0xff] }
 0x556   : > { %v1228_v58 = vpack.c.bf16 %v1182_v26, %v1182_v26  ;;  %v1227_v4 = vpack.c.bf16 %v1181_v35, %v1181_v35  ;;  %v1396_v22 = vmul.f32 %v2628_v23, %v3478_v19  ;;  %v3596_v26 = vld [vmem:[%s4456_s12 + $0x18] sm:$0xff]  ;;  %v1687_v35 = vld [vmem:[%s4457_s13] sm:$0xff] }
 0x558   : > { %2468 = vmatprep.subr.msk.bf16.mxu1 %vm1286_vm2, %v1228_v58  ;;  %v1288_v49 = vsel %vm1286_vm2, %v1227_v4, 0  ;;  %v1401_v2 = vrot.slane %v1228_v58, 2  ;;  %v1400_v18 = vrot.slane %v1227_v4, 2  ;;  %v1397_v25 = vpack.c.bf16 %v1396_v22, %v1396_v22  ;;  %1604 = vperm.xlu1 %2574, %v1590_v37   ;;  %v1689_v58 = vld [vmem:[%s4457_s13 + $0x10] sm:$0xff]  ;;  %v1688_v4 = vld [vmem:[%s4457_s13 + $0x8] sm:$0xff] }
 0x559   : > { %1294 = vmatpush1.bf16.msra.mxu1 %v1288_v49  ;;  %2577 = vset.pattern.permute.xlu0 %v4571_v14 }
 0x55a   : > { %2470 = vmatprep.subr.msk.bf16.mxu1 %vm1286_vm2, %v1401_v2  ;;  %v1406_v52 = vsel %vm1286_vm2, %v1400_v18, 0  ;;  %1599 = vperm.xlu0 %2577, %v1589_v54   ;;  %v2641_v2 = vld [vmem:[%s2916_s29] sm:$0xff] }
 0x55c   : > { %2469 = vmatmul.mubr.msk.bf16.vlgmr.msra.gmra.mrb[4].mxu1 %vm1282_vm10, %v1281_v40  ;;  %1745 = vperm.xlu1 %2574, %v3584_v48  }
 0x55d   : > { %1412 = vmatpush1.bf16.msra.mxu1 %v1406_v52  ;;  %1443 = vmatprep.mubr.bf16.mxu1 %v4571_v14  ;;  %v2642_v52 = vld [vmem:[%s2916_s29 + $0x8] sm:$0xff]  ;;  %s2725_s29 = smov [#allocation2]  }
 0x55e   : > { %1609 = vperm.xlu0 %2577, %v1591_v44   ;;  %s2647_s5 = sshll.u32 %s2725_s29, 4  ;;  %s2648_s5 = int_to_ptr.vmem [resolvable:$false] %s2647_s5 }
 0x55f   : > { %s2649_s6 = scalar_lea.vmem %s2648_s5, 512 }
 0x560   : > { %2575 = vset.pattern.permute.xlu1 %v4570_v43 }
 0x561   : > { %1812 = vperm.xlu1 %2575, %v3584_v48  }
 0x562   : > { %1750 = vperm.xlu0 %2577, %v3571_v20  }
 0x564   : > { %2471 = vmatmul.mubr.msk.bf16.vlgmr.msra.gmra.mrb[8].mxu1 %vm1282_vm10, %v1397_v25 }
 0x565   : > { %1666 = vmatprep.mubr.bf16.mxu1 %v4571_v14  ;;  %2578 = vset.pattern.permute.xlu1 %v4571_v14 }
 0x566   : > { %1760 = vperm.xlu0 %2577, %v3596_v26   ;;  %1693 = vperm.xlu1 %2578, %v1687_v35  }
 0x56a   : > { %1703 = vperm.xlu0 %2577, %v1689_v58   ;;  %1698 = vperm.xlu1 %2578, %v1688_v4  }
 0x56e   : > { %2588 = vset.pattern.permute.xlu0 %v4572_v16  ;;  %2579 = vset.pattern.permute.xlu1 %v4572_v16 }
 0x56f   : > { %1876 = vperm.xlu0 %2588, %v3584_v48   ;;  %1880 = vperm.xlu1 %2579, %v3571_v20  }
 0x573   : > { %1884 = vperm.xlu0 %2588, %v3616_v57   ;;  %2580 = vset.pattern.permute.xlu1 %v4569_v31 }
 0x574   : > { %1940 = vperm.xlu1 %2580, %v3584_v48  }
 0x577   : > { %2590 = vset.pattern.permute.xlu0 %v4569_v31 }
 0x578   : > { %1944 = vperm.xlu0 %2590, %v3571_v20   ;;  %2581 = vset.pattern.permute.xlu1 %v4574_v55 }
 0x579   : > { %1984 = vperm.xlu1 %2581, %v3571_v20  }
 0x57c   : > { %1952 = vperm.xlu0 %2590, %v3596_v26  }
 0x57d   : > { %2582 = vset.pattern.permute.xlu1 %v4576_v6 }
 0x57e   : > { %2036 = vperm.xlu1 %2582, %v3584_v48  }
 0x580   : > { %2593 = vset.pattern.permute.xlu0 %v4574_v55 }
 0x581   : > { %1980 = vperm.xlu0 %2593, %v3584_v48  }
 0x582   : > { %2583 = vset.pattern.permute.xlu1 %v4578_v47 }
 0x583   : > { %2104 = vperm.xlu1 %2583, %v3571_v20  }
 0x585   : > { %1988 = vperm.xlu0 %2593, %v3616_v57  }
 0x587   : > { %2584 = vset.pattern.permute.xlu1 %v4579_v34 }
 0x588   : > { %2164 = vperm.xlu1 %2584, %v3584_v48  }
 0x589   : > { %2594 = vset.pattern.permute.xlu0 %v4576_v6 }
 0x58a   : > { %2040 = vperm.xlu0 %2594, %v3571_v20  }
 0x58c   : > { %2585 = vset.pattern.permute.xlu1 %v4581_v10 }
 0x58d   : > { %2232 = vperm.xlu1 %2585, %v3571_v20  }
 0x58e   : > { %2048 = vperm.xlu0 %2594, %v3596_v26  }
 0x591   : > { %2586 = vset.pattern.permute.xlu1 %v4571_v14 }
 0x592   : > { %2597 = vset.pattern.permute.xlu0 %v4578_v47  ;;  %1755 = vperm.xlu1 %2586, %v3616_v57  }
 0x593   : > { %2100 = vperm.xlu0 %2597, %v3584_v48  }
 0x596   : > { %2587 = vset.pattern.permute.xlu1 %v4570_v43 }
 0x597   : > { %2108 = vperm.xlu0 %2597, %v3616_v57   ;;  %1820 = vperm.xlu1 %2587, %v3616_v57  }
 0x59b   : > { %2598 = vset.pattern.permute.xlu0 %v4579_v34  ;;  %1824 = vperm.xlu1 %2587, %v3596_v26  }
 0x59c   : > { %2168 = vperm.xlu0 %2598, %v3571_v20  }
 0x59f   : > { %2589 = vset.pattern.permute.xlu1 %v4571_v14 }
 0x5a0   : > { %2176 = vperm.xlu0 %2598, %v3596_v26   ;;  %1708 = vperm.xlu1 %2589, %v1690_v27  }
 0x5a1   : > { %v1519_v23 = vpop.permute.xlu0 %1518 }
 0x5a4   : > { %2601 = vset.pattern.permute.xlu0 %v4581_v10  ;;  %2591 = vset.pattern.permute.xlu1 %v4572_v16 }
 0x5a5   : > { %2228 = vperm.xlu0 %2601, %v3584_v48   ;;  %1888 = vperm.xlu1 %2591, %v3596_v26   ;;  %v1569_v27 = vpop.permute.xlu0 %1568 }
 0x5a9   : > { %2236 = vperm.xlu0 %2601, %v3616_v57   ;;  %2592 = vset.pattern.permute.xlu1 %v4569_v31 }
 0x5aa   : > { %1948 = vperm.xlu1 %2592, %v3616_v57  }
 0x5ad   : > { %2604 = vset.pattern.permute.xlu0 %v4571_v14 }
 0x5ae   : > { %2595 = vset.pattern.permute.xlu1 %v4574_v55 }
 0x5af   : > { %1992 = vperm.xlu1 %2595, %v3596_v26  }
 0x5b3   : > { %2596 = vset.pattern.permute.xlu1 %v4576_v6 }
 0x5b4   : > { %2044 = vperm.xlu1 %2596, %v3616_v57  }
 0x5b8   : > { %2599 = vset.pattern.permute.xlu1 %v4578_v47 }
 0x5b9   : > { %2112 = vperm.xlu1 %2599, %v3596_v26  }
 0x5bd   : > { %2600 = vset.pattern.permute.xlu1 %v4579_v34  ;;  %v2607_v34 = vld [vmem:[%s4454_s10] sm:$0xff]  }
 0x5be   : > { %2172 = vperm.xlu1 %2600, %v3616_v57  }
 0x5c2   : > { %2602 = vset.pattern.permute.xlu1 %v4581_v10  ;;  %v2608_v10 = vld [vmem:[%s4454_s10 + $0x8] sm:$0xff]  }
 0x5c3   : > { %2240 = vperm.xlu1 %2602, %v3596_v26  }
 0x5c7   : > { %2603 = vset.pattern.permute.xlu1 %v4571_v14 }
 0x5d3   : > { %v1595_v26 = vpop.permute.xlu1 %1594 }
 0x5d7   : > { %v3701_v57 = vpop.permute.xlu1 %1604 }
 0x62f   : > { %v1327_v19 = vpop.f32.mrb[4].mxu1 }
 0x630   : > { %v1329_v17 = vpop.f32.mrb[5].mxu1 }
 0x631   : > { %v1331_v28 = vpop.f32.mrb[6].mxu1 }
 0x632   : > { %v1332_v56 = vpop.f32.mrb[7].mxu1 }
 0x637   : > { %v1445_v51 = vpop.f32.mrb[8].mxu1 }
 0x638   : > { %v1454_v21 = vrot.slane %v1445_v51, 4  ;;  %v1447_v11 = vpop.f32.mrb[9].mxu1 }
 0x639   : > { %v1455_v46 = vrot.slane %v1447_v11, 4  ;;  %v1449_v59 = vpop.f32.mrb[10].mxu1 }
 0x63a   : > { %v1458_v38 = vsel %vm682_vm0, %v1327_v19, %v1454_v21  ;;  %v1450_v33 = vpop.f32.mrb[11].mxu1 }
 0x63b   : > { %v1461_v1 = vpack.c.bf16 %v1458_v38, %v1458_v38  ;;  %v1459_v8 = vsel %vm682_vm0, %v1329_v17, %v1455_v46 }
 0x63c   : > { %v1462_v9 = vpack.c.bf16 %v1459_v8, %v1459_v8 }
 0x63d   : > { %v1467_v7 = vsel %vm682_vm0, %v1461_v1, 0 }
 0x63e   : > { %2472 = vmatprep.subr.msk.bf16.mxu0 %vm682_vm0, %v1462_v9 }
 0x63f   : > { %1473 = vmatpush1.bf16.msra.mxu0 %v1467_v7 }
 0x642   : > { %2473 = vmatmul.mubr.msk.bf16.vlgmr.msra.gmra.mrb[12].mxu0 %vm675_vm1, %v1460_v61 }
 0x643   : > { %2352 = vmatprep.mubr.bf16.mxu0 %v4571_v14 }
 0x715   : > { %v1506_v49 = vpop.f32.mrb[12].mxu0 }
 0x716   : > { %v1513_v18 = vadd.f32 %v2641_v2, %v1506_v49  ;;  %v1508_v40 = vpop.f32.mrb[13].mxu0 }
 0x717   : > { %v1514_v22 = vadd.f32 %v2642_v52, %v1508_v40  ;;  %v1510_v25 = vpop.f32.mrb[14].mxu0 }
 0x718   : > { %v3652_v62 = vadd.f32 %v1519_v23, %v1513_v18  ;;  %v1511_v43 = vpop.f32.mrb[15].mxu0 }
 0x719   : > { %v3657_v30 = vadd.f32 %v1519_v23, %v1514_v22 }
 0x71a   : > { %4587 = vst [vmem:[#allocation9_spill] sm:$0xff] %v3652_v62  ;;  %v1523_v19 = vrot.slane %v3652_v62, 4  ;;  %v1537_v17 = vmul.f32 %v3652_v62, %v3652_v62 }
 0x71b   : > { %4588 = vst [vmem:[#allocation8_spill] sm:$0xff] %v3657_v30  ;;  %v1529_v28 = vrot.slane %v3657_v30, 4  ;;  %v1538_v56 = vmul.f32 %v3657_v30, %v3657_v30 }
 0x71c   : > { %v1539_v51 = vrot.slane %v1537_v17, 4  ;;  %v1524_v21 = vadd.f32 %v1523_v19, %v3652_v62 }
 0x71d   : > { %v1545_v11 = vrot.slane %v1538_v56, 4  ;;  %v1530_v46 = vadd.f32 %v1529_v28, %v3657_v30 }
 0x71e   : > { %v1540_v59 = vadd.f32 %v1539_v51, %v1537_v17  ;;  %v1525_v38 = vrot.slane %v1524_v21, 2 }
 0x71f   : > { %v1546_v33 = vadd.f32 %v1545_v11, %v1538_v56  ;;  %v1531_v1 = vrot.slane %v1530_v46, 2 }
 0x720   : > { %v1541_v8 = vrot.slane %v1540_v59, 2  ;;  %v1526_v9 = vadd.f32 %v1525_v38, %v1524_v21  ;;  %v1578_v21 = vpop.permute.xlu0 %1577 }
 0x721   : > { %v1547_v7 = vrot.slane %v1546_v33, 2  ;;  %v1532_v61 = vadd.f32 %v1531_v1, %v1530_v46  ;;  %v3703_v1 = vpop.permute.xlu1 %1745 }
 0x722   : > { %v1527_v42 = vrot.slane %v1526_v9, 1  ;;  %v1542_v20 = vadd.f32 %v1541_v8, %v1540_v59 }
 0x723   : > { %v1533_v37 = vrot.slane %v1532_v61, 1  ;;  %v1548_v54 = vadd.f32 %v1547_v7, %v1546_v33 }
 0x724   : > { %v1528_v44 = vadd.f32 %v1527_v42, %v1526_v9  ;;  %v1543_v35 = vrot.slane %v1542_v20, 1 }
 0x725   : > { %v1534_v58 = vadd.f32 %v1533_v37, %v1532_v61  ;;  %v1549_v16 = vrot.slane %v1548_v54, 1  ;;  %v3705_v8 = vpop.permute.xlu1 %1812  ;;  %v3709_v61 = vpop.permute.xlu0 %1816 }
 0x726   : > { %v1535_v48 = vmul.f32 0.125, %v1528_v44  ;;  %v1544_v4 = vadd.f32 %v1543_v35, %v1542_v20 }
 0x727   : > { %v1536_v49 = vmul.f32 0.125, %v1534_v58  ;;  %v1550_v2 = vadd.f32 %v1549_v16, %v1548_v54 }
 0x728   : > { %v1551_v18 = vmul.f32 0.125, %v1544_v4  ;;  %v1553_v40 = vmul.f32 %v1535_v48, %v1535_v48  ;;  %v1557_v19 = vsub.f32 %v3652_v62, %v1535_v48 }
 0x729   : > { %v1552_v23 = vmul.f32 0.125, %v1550_v2  ;;  %v1554_v52 = vmul.f32 %v1536_v49, %v1536_v49  ;;  %v1558_v17 = vsub.f32 %v3657_v30, %v1536_v49  ;;  %v3707_v9 = vpop.permute.xlu1 %1693  ;;  %v1600_v35 = vpop.permute.xlu0 %1599 }
 0x72a   : > { %v1555_v22 = vsub.f32 %v1551_v18, %v1553_v40 }
 0x72b   : > { %v1556_v31 = vsub.f32 %v1552_v23, %v1554_v52 }
 0x72c   : > { %v1559_v25 = vadd.f32 1e-05, %v1555_v22 }
 0x72d   : > { %v1560_v43 = vadd.f32 1e-05, %v1556_v31  ;;  %v3717_v54 = vpop.permute.xlu1 %1698  ;;  %v3733_v2 = vpop.permute.xlu0 %1609 }
 0x72e   : > { %2629 = vrsqrt.f32 %v1559_v25 }
 0x72f   : > { %2631 = vrsqrt.f32 %v1560_v43 }
 0x731   : > { %v3725_v4 = vpop.permute.xlu1 %1880  ;;  %v3741_v40 = vpop.permute.xlu0 %1750 }
 0x735   : > { %v3739_v18 = vpop.permute.xlu1 %1940  ;;  %v3755_v22 = vpop.permute.xlu0 %1760 }
 0x736   : > { %4589 = vst [vmem:[#allocation12_spill] sm:$0xff] %v3755_v22 }
 0x738   : > { %v2630_v55 = vpop.eup %2629 }
 0x739   : > { %v2632_v28 = vpop.eup %2631  ;;  %v1563_v56 = vmul.f32 %v2630_v55, %v1557_v19  ;;  %v3749_v52 = vpop.permute.xlu1 %1984 }
 0x73a   : > { %v1564_v6 = vmul.f32 %v2632_v28, %v1558_v17  ;;  %v3763_v25 = vpop.permute.xlu0 %1703 }
 0x73b   : > { %v1571_v51 = vmul.f32 %v1569_v27, %v1563_v56  ;;  %4590 = vst [vmem:[#allocation10_spill] sm:$0xff] %v3763_v25 }
 0x73c   : > { %v1572_v11 = vmul.f32 %v1569_v27, %v1564_v6 }
 0x73d   : > { %v1580_v46 = vadd.f32 %v1578_v21, %v1571_v51  ;;  %v3761_v31 = vpop.permute.xlu1 %2036 }
 0x73e   : > { %v1581_v47 = vadd.f32 %v1578_v21, %v1572_v11  ;;  %v3775_v27 = vpop.permute.xlu0 %1876 }
 0x73f   : > { %v1586_v59 = vpack.c.bf16 %v1580_v46, %v1580_v46 }
 0x740   : > { %v1587_v38 = vpack.c.bf16 %v1581_v47, %v1581_v47 }
 0x741   : > { %v1629_v33 = vsel %vm682_vm0, %v1586_v59, 0  ;;  %v3769_v43 = vpop.permute.xlu1 %2104 }
 0x742   : > { %2477 = vmatprep.subr.msk.bf16.mxu1 %vm682_vm0, %v1587_v38  ;;  %4591 = vst [vmem:[#allocation11_spill] sm:$0xff] %v3769_v43  ;;  %v3785_v17 = vpop.permute.xlu0 %1884  ;;  %vm2316_vm0 = vcmask 130048  }
 0x743   : > { %1635 = vmatpush1.bf16.msra.mxu1 %v1629_v33  ;;  %4592 = vst [vmem:[#allocation13_spill] sm:$0xff] %v3785_v17 }
 0x745   : > { %v3783_v55 = vpop.permute.xlu1 %2164 }
 0x746   : > { %2478 = vmatmul.mubr.msk.bf16.vlgmr.msra.gmra.mrb[12].mxu1 %vm675_vm1, %v2607_v34  ;;  %v3797_v56 = vpop.permute.xlu0 %1944 }
 0x747   : > { %1676 = vmatprep.mubr.bf16.mxu1 %v4571_v14 }
 0x749   : > { %v3791_v28 = vpop.permute.xlu1 %2232 }
 0x74a   : > { %4593 = vst [vmem:[#allocation14_spill] sm:$0xff] %v3791_v28  ;;  %v3808_v21 = vpop.permute.xlu0 %1952 }
 0x74b   : > { %4595 = vst [vmem:[#allocation16_spill] sm:$0xff] %v3808_v21 }
 0x74d   : > { %v3806_v51 = vpop.permute.xlu1 %1755 }
 0x74e   : > { %2479 = vmatmul.mubr.msk.bf16.gmra.mrb[16].mxu1 %vm675_vm1, %v2608_v10  ;;  %4594 = vst [vmem:[#allocation15_spill] sm:$0xff] %v3806_v51  ;;  %v3823_v47 = vpop.permute.xlu0 %1980 }
 0x751   : > { %v3817_v46 = vpop.permute.xlu1 %1820 }
 0x752   : > { %4596 = vst [vmem:[#allocation17_spill] sm:$0xff] %v3817_v46  ;;  %v3829_v59 = vpop.permute.xlu0 %1988 }
 0x753   : > { %4597 = vst [vmem:[#allocation18_spill] sm:$0xff] %v3829_v59 }
 0x755   : > { %v3831_v38 = vpop.permute.xlu1 %1824 }
 0x756   : > { %4598 = vst [vmem:[#allocation19_spill] sm:$0xff] %v3831_v38  ;;  %v3837_v33 = vpop.permute.xlu0 %2040 }
 0x759   : > { %v3839_v34 = vpop.permute.xlu1 %1708 }
 0x75a   : > { %4599 = vst [vmem:[#allocation20_spill] sm:$0xff] %v3839_v34 }
 0x819   : > { %v1668_v7 = vpop.f32.mrb[12].mxu1 }
 0x81a   : > { %v3711_v42 = vadd.f32 %v1668_v7, %v1595_v26  ;;  %v1670_v14 = vpop.f32.mrb[13].mxu1 }
 0x81b   : > { %v1672_v20 = vpop.f32.mrb[14].mxu1  ;;  %v3719_v44 = vadd.f32 %v1670_v14, %v1595_v26  ;;  %v3852_v26 = vpop.permute.xlu0 %2048 }
 0x81c   : > { %v1674_v37 = vpop.f32.mrb[15].mxu1  ;;  %1851 = vrot.lane.b32.xlu0 %v3711_v42, %s4575_s19  ;;  %1719 = vrot.lane.b32.xlu1 %v3711_v42, %s4573_s2  ;;  %v3747_v23 = vadd.f32 %v1672_v20, %v1600_v35  ;;  %4601 = vst [vmem:[#allocation22_spill] sm:$0xff] %v3852_v26 }
 0x81d   : > { %v3777_v19 = vadd.f32 %v1674_v37, %v1600_v35 }
 0x81f   : > { %v3860_v7 = vpop.permute.xlu0 %2100 }
 0x820   : > { %1795 = vrot.lane.b32.xlu0 %v3719_v44, %s4554_s23  ;;  %1787 = vrot.lane.b32.xlu1 %v3711_v42, %s4554_s23 }
 0x821   : > { %v1678_v58 = vpop.f32.mrb[16].mxu1 }
 0x822   : > { %v1680_v16 = vpop.f32.mrb[17].mxu1  ;;  %v3804_v6 = vadd.f32 %v1678_v58, %v3701_v57 }
 0x823   : > { %v1682_v48 = vpop.f32.mrb[18].mxu1  ;;  %v3815_v11 = vadd.f32 %v1680_v16, %v3701_v57  ;;  %v3854_v57 = vpop.permute.xlu1 %1888 }
 0x824   : > { %1859 = vrot.lane.b32.xlu0 %v3719_v44, %s4575_s19  ;;  %1915 = vrot.lane.b32.xlu1 %v3711_v42, %s4577_s26  ;;  %v3731_v49 = vpop.f32.mrb[19].mxu1  ;;  %v3846_v10 = vadd.f32 %v1682_v48, %v3733_v2  ;;  %4602 = vst [vmem:[#allocation23_spill] sm:$0xff] %v3854_v57  ;;  %v3876_v37 = vpop.permute.xlu0 %2108 }
 0x825   : > { %v3870_v20 = vadd.f32 %v3731_v49, %v3733_v2  ;;  %4605 = vst [vmem:[#allocation26_spill] sm:$0xff] %v3876_v37 }
 0x826   : > { %4600 = vst [vmem:[#allocation21_spill] sm:$0xff] %v3846_v10 }
 0x827   : > { %v3862_v14 = vpop.permute.xlu1 %1948  ;;  %4604 = vst [vmem:[#allocation25_spill] sm:$0xff] %v3870_v20 }
 0x828   : > { %1923 = vrot.lane.b32.xlu0 %v3719_v44, %s4577_s26  ;;  %2011 = vrot.lane.b32.xlu1 %v3711_v42, %s4580_s28  ;;  %4603 = vst [vmem:[#allocation24_spill] sm:$0xff] %v3862_v14  ;;  %v3886_v16 = vpop.permute.xlu0 %2168 }
 0x829   : > { %4608 = vst [vmem:[#allocation29_spill] sm:$0xff] %v3886_v16 }
 0x82b   : > { %v3878_v35 = vpop.permute.xlu1 %1992 }
 0x82c   : > { %2019 = vrot.lane.b32.xlu0 %v3719_v44, %s4580_s28  ;;  %2075 = vrot.lane.b32.xlu1 %v3711_v42, %s4555_s30  ;;  %4606 = vst [vmem:[#allocation27_spill] sm:$0xff] %v3878_v35  ;;  %v3898_v49 = vpop.permute.xlu0 %2176 }
 0x82d   : > { %4610 = vst [vmem:[#allocation31_spill] sm:$0xff] %v3898_v49 }
 0x82f   : > { %v3884_v58 = vpop.permute.xlu1 %2044 }
 0x830   : > { %1721 = vrot.lane.b32.xlu0 %v3747_v23, %s4573_s2  ;;  %2139 = vrot.lane.b32.xlu1 %v3711_v42, %s4556_s1  ;;  %4607 = vst [vmem:[#allocation28_spill] sm:$0xff] %v3884_v58  ;;  %v3906_v30 = vpop.permute.xlu0 %2228 }
 0x833   : > { %v3896_v48 = vpop.permute.xlu1 %2112 }
 0x834   : > { %2077 = vrot.lane.b32.xlu0 %v3747_v23, %s4555_s30  ;;  %2203 = vrot.lane.b32.xlu1 %v3711_v42, %s4582_s18  ;;  %4609 = vst [vmem:[#allocation30_spill] sm:$0xff] %v3896_v48  ;;  %v3912_v62 = vpop.permute.xlu0 %2236 }
 0x835   : > { %4612 = vst [vmem:[#allocation33_spill] sm:$0xff] %v3912_v62 }
 0x837   : > { %v3904_v2 = vpop.permute.xlu1 %2172 }
 0x838   : > { %2141 = vrot.lane.b32.xlu0 %v3747_v23, %s4556_s1  ;;  %1727 = vrot.lane.b32.xlu1 %v3719_v44, %s4573_s2  ;;  %4611 = vst [vmem:[#allocation32_spill] sm:$0xff] %v3904_v2 }
 0x83b   : > { %v3914_v26 = vpop.permute.xlu1 %2240 }
 0x83c   : > { %2205 = vrot.lane.b32.xlu0 %v3747_v23, %s4582_s18  ;;  %2083 = vrot.lane.b32.xlu1 %v3719_v44, %s4555_s30  ;;  %4613 = vst [vmem:[#allocation34_spill] sm:$0xff] %v3914_v26 }
 0x840   : > { %1729 = vrot.lane.b32.xlu0 %v3777_v19, %s4573_s2  ;;  %2147 = vrot.lane.b32.xlu1 %v3719_v44, %s4556_s1 }
 0x844   : > { %2085 = vrot.lane.b32.xlu0 %v3777_v19, %s4555_s30  ;;  %2211 = vrot.lane.b32.xlu1 %v3719_v44, %s4582_s18 }
 0x848   : > { %2149 = vrot.lane.b32.xlu0 %v3777_v19, %s4556_s1  ;;  %1789 = vrot.lane.b32.xlu1 %v3747_v23, %s4554_s23 }
 0x84c   : > { %2213 = vrot.lane.b32.xlu0 %v3777_v19, %s4582_s18  ;;  %1853 = vrot.lane.b32.xlu1 %v3747_v23, %s4575_s19 }
 0x850   : > { %1917 = vrot.lane.b32.xlu1 %v3747_v23, %s4577_s26  ;;  %1855 = vrot.lane.b32.xlu0 %v3804_v6, %s4575_s19 }
 0x854   : > { %2013 = vrot.lane.b32.xlu1 %v3747_v23, %s4580_s28  ;;  %1799 = vrot.lane.b32.xlu0 %v3815_v11, %s4554_s23 }
 0x858   : > { %1797 = vrot.lane.b32.xlu1 %v3777_v19, %s4554_s23  ;;  %1863 = vrot.lane.b32.xlu0 %v3815_v11, %s4575_s19 }
 0x85c   : > { %1861 = vrot.lane.b32.xlu1 %v3777_v19, %s4575_s19  ;;  %1927 = vrot.lane.b32.xlu0 %v3815_v11, %s4577_s26 }
 0x860   : > { %1925 = vrot.lane.b32.xlu1 %v3777_v19, %s4577_s26  ;;  %2023 = vrot.lane.b32.xlu0 %v3815_v11, %s4580_s28 }
 0x864   : > { %2021 = vrot.lane.b32.xlu1 %v3777_v19, %s4580_s28  ;;  %1725 = vrot.lane.b32.xlu0 %v3846_v10, %s4573_s2 }
 0x868   : > { %2081 = vrot.lane.b32.xlu0 %v3846_v10, %s4555_s30  ;;  %1723 = vrot.lane.b32.xlu1 %v3804_v6, %s4573_s2 }
 0x86c   : > { %2145 = vrot.lane.b32.xlu0 %v3846_v10, %s4556_s1  ;;  %1791 = vrot.lane.b32.xlu1 %v3804_v6, %s4554_s23 }
 0x870   : > { %1733 = vrot.lane.b32.xlu0 %v3870_v20, %s4573_s2  ;;  %1919 = vrot.lane.b32.xlu1 %v3804_v6, %s4577_s26 }
 0x874   : > { %2209 = vrot.lane.b32.xlu0 %v3846_v10, %s4582_s18  ;;  %2015 = vrot.lane.b32.xlu1 %v3804_v6, %s4580_s28 }
 0x878   : > { %2089 = vrot.lane.b32.xlu0 %v3870_v20, %s4555_s30  ;;  %2079 = vrot.lane.b32.xlu1 %v3804_v6, %s4555_s30 }
 0x87c   : > { %2153 = vrot.lane.b32.xlu0 %v3870_v20, %s4556_s1  ;;  %2143 = vrot.lane.b32.xlu1 %v3804_v6, %s4556_s1 }
 0x880   : > { %2217 = vrot.lane.b32.xlu0 %v3870_v20, %s4582_s18  ;;  %1731 = vrot.lane.b32.xlu1 %v3815_v11, %s4573_s2 }
 0x884   : > { %2087 = vrot.lane.b32.xlu1 %v3815_v11, %s4555_s30 }
 0x888   : > { %2151 = vrot.lane.b32.xlu1 %v3815_v11, %s4556_s1 }
 0x88c   : > { %1793 = vrot.lane.b32.xlu1 %v3846_v10, %s4554_s23 }
 0x88e   : > { %v1852_v37 = vpop.permute.xlu0 %1851  ;;  %v1720_v21 = vpop.permute.xlu1 %1719 }
 0x890   : > { %1857 = vrot.lane.b32.xlu1 %v3846_v10, %s4575_s19 }
 0x892   : > { %v1796_v2 = vpop.permute.xlu0 %1795  ;;  %v1788_v49 = vpop.permute.xlu1 %1787 }
 0x893   : > { %v1803_v14 = vsel %vm828_vm14, %v1788_v49, %v1796_v2  ;;  %v1807_v22 = vsel %vm828_vm14, %v1796_v2, %v1788_v49 }
 0x894   : > { %1921 = vrot.lane.b32.xlu1 %v3846_v10, %s4577_s26  ;;  %v1828_v17 = vmul.f32 %v3705_v8, %v1803_v14 }
 0x896   : > { %v1860_v57 = vpop.permute.xlu0 %1859  ;;  %v1916_v38 = vpop.permute.xlu1 %1915 }
 0x897   : > { %v1867_v28 = vsel %vm877_vm15, %v1852_v37, %v1860_v57  ;;  %v1871_v49 = vsel %vm877_vm15, %v1860_v57, %v1852_v37  ;;  %v1836_v37 = vmul.f32 %v3142_v60, %v1828_v17 }
 0x898   : > { %2017 = vrot.lane.b32.xlu1 %v3846_v10, %s4580_s28  ;;  %v1827_v10 = vmul.f32 %v3705_v8, %v1807_v22 }
 0x89a   : > { %v1924_v62 = vpop.permute.xlu0 %1923  ;;  %v2012_v26 = vpop.permute.xlu1 %2011  ;;  %v1835_v57 = vmul.f32 %v3137_v45, %v1827_v10 }
 0x89b   : > { %v1931_v22 = vsel %vm926_vm4, %v1916_v38, %v1924_v62  ;;  %v1935_v8 = vsel %vm926_vm4, %v1924_v62, %v1916_v38 }
 0x89c   : > { %1801 = vrot.lane.b32.xlu1 %v3870_v20, %s4554_s23 }
 0x89e   : > { %v2020_v34 = vpop.permute.xlu0 %2019  ;;  %v2076_v48 = vpop.permute.xlu1 %2075 }
 0x8a0   : > { %1865 = vrot.lane.b32.xlu1 %v3870_v20, %s4575_s19  ;;  %s512_s19 = sand.u32 1, %s2697_s22  }
 0x8a2   : > { %v3928_v58 = vpop.permute.xlu0 %1721  ;;  %v2140_v25 = vpop.permute.xlu1 %2139 }
 0x8a4   : > { %1929 = vrot.lane.b32.xlu1 %v3870_v20, %s4577_s26  ;;  %s2443_s26 = sshll.u32 %s512_s19, 4 }
 0x8a6   : > { %v3936_v46 = vpop.permute.xlu0 %2077  ;;  %v3938_v35 = vpop.permute.xlu1 %2203 }
 0x8a8   : > { %2025 = vrot.lane.b32.xlu1 %v3870_v20, %s4580_s28  ;;  %s2487_s28 = sshll.u32 %s2832_s25, 8  ;;  %s2366_s25 = scalar_lea.sflag [#allocation3], %s512_s19 }
 0x8a9   : > { %s4402_s3 = scalar_lea.hbm %s4460_s16, %s2487_s28 }
 0x8aa   : > { %v3944_v59 = vpop.permute.xlu0 %2141  ;;  %v1728_v51 = vpop.permute.xlu1 %1727 }
 0x8ab   : > { %4614 = vst [vmem:[#allocation35_spill] sm:$0xff] %v3944_v59  ;;  %v1735_v2 = vsel %vm776_vm7, %v1720_v21, %v1728_v51  ;;  %v1739_v16 = vsel %vm776_vm7, %v1728_v51, %v1720_v21  ;;  %v1891_v59 = vmul.f32 %v3775_v27, %v1871_v49  ;;  %v1892_v51 = vmul.f32 %v3775_v27, %v1867_v28 }
 0x8ac   : > { %v1763_v14 = vmul.f32 %v3703_v1, %v1739_v16  ;;  %v1764_v20 = vmul.f32 %v3703_v1, %v1735_v2  ;;  %2207 = vrot.lane.b32.xlu1 %v3804_v6, %s4582_s18  ;;  %v1955_v1 = vmul.f32 %v3739_v18, %v1935_v8  ;;  %v1956_v16 = vmul.f32 %v3739_v18, %v1931_v22 }
 0x8ad   : > { %v2027_v27 = vsel %vm999_vm5, %v2012_v26, %v2020_v34  ;;  %v2031_v28 = vsel %vm999_vm5, %v2020_v34, %v2012_v26  ;;  %v1899_v18 = vmul.f32 %v3150_v24, %v1891_v59  ;;  %v1900_v2 = vmul.f32 %v3153_v32, %v1892_v51 }
 0x8ae   : > { %v1771_v21 = vmul.f32 %v4583_v29, %v1763_v14  ;;  %v1772_v43 = vmul.f32 %v4584_v15, %v1764_v20  ;;  %v3968_v62 = vpop.permute.xlu0 %2205  ;;  %v2084_v38 = vpop.permute.xlu1 %2083  ;;  %v2310_v14 = vld [vmem:[%s4459_s15] sm:$0xff]  ;;  %v2051_v34 = vmul.f32 %v3761_v31, %v2027_v27  ;;  %v2052_v26 = vmul.f32 %v3761_v31, %v2031_v28 }
 0x8af   : > { %v2091_v10 = vsel %vm1048_vm9, %v2076_v48, %v2084_v38  ;;  %v2095_v17 = vsel %vm1048_vm9, %v2084_v38, %v2076_v48  ;;  %v1963_v59 = vmul.f32 %v3164_v36, %v1955_v1  ;;  %v1995_v31 = vmul.f32 %v3823_v47, %v3711_v42 }
 0x8b0   : > { %v1779_v20 = vadd.f32 %v1771_v21, %v3707_v9  ;;  %v1780_v49 = vadd.f32 %v1772_v43, %v3707_v9  ;;  %2215 = vrot.lane.b32.xlu1 %v3815_v11, %s4582_s18  ;;  %v2115_v38 = vmul.f32 %v3860_v7, %v2091_v10  ;;  %v2116_v27 = vmul.f32 %v3860_v7, %v2095_v17  ;;  %s514_s18 = scalar_lea.vmem [#allocation2], %s2443_s26 }
 0x8b1   : > { %v1996_v28 = vmul.f32 %v3823_v47, %v3719_v44  ;;  %v2059_v1 = vmul.f32 %v3179_v39, %v2051_v34  ;;  %s2380_s20 = sshll.u32 %s514_s18, 4  ;;  %s4404_s20 = int_to_ptr.vmem [resolvable:$true] %s2380_s20 }
 0x8b2   : > { %v1843_v22 = vadd.f32 %v1835_v57, %v1779_v20  ;;  %v1844_v8 = vadd.f32 %v1836_v37, %v1780_v49  ;;  %v2148_v48 = vpop.permute.xlu1 %2147  ;;  %v1964_v57 = vmul.f32 %v3174_v3, %v1956_v16  ;;  %v1730_v21 = vpop.permute.xlu0 %1729  ;;  %v2060_v16 = vmul.f32 %v3192_v12, %v2052_v26  ;;  %s2643_s4 = scalar_lea.vmem %s4404_s20, 256  ;;  %p2650_p0 = scmp.lt.s32.totalorder %s4404_s20, %s2648_s5 }
 0x8b3   : > { %v2155_v9 = vsel %vm1097_vm11, %v2140_v25, %v2148_v48  ;;  %v2159_v43 = vsel %vm1097_vm11, %v2148_v48, %v2140_v25  ;;  %v2123_v7 = vmul.f32 %v3195_v13, %v2115_v38  ;;  %v2124_v42 = vmul.f32 %v3217_v5, %v2116_v27  ;;  %p2644_p11 = scmp.ne.s32.totalorder %s4404_s20, %s2643_s4  ;;  %p2651_p1 = scmp.lt.s32.totalorder %s2649_s6, %s2643_s4 }
 0x8b4   : > { %v1907_v37 = vadd.f32 %v1899_v18, %v1843_v22  ;;  %v1908_v51 = vadd.f32 %v1900_v2, %v1844_v8  ;;  %2313 = vperm.xlu1 %2603, %v2310_v14   ;;  %v2179_v22 = vmul.f32 %v3783_v55, %v2155_v9  ;;  %v2180_v10 = vmul.f32 %v3783_v55, %v2159_v43 }
 0x8b5   : > { %p2645_p12 = pnand %p2644_p11, %p2849_p5  ;;  %p2652_p2 = por %p2651_p1, %p2650_p0 }
 0x8b6   : > { %v1971_v20 = vadd.f32 %v1963_v59, %v1907_v37  ;;  %v1972_v25 = vadd.f32 %v1964_v57, %v1908_v51  ;;  %v2212_v49 = vpop.permute.xlu1 %2211  ;;  %v4015_v48 = vpop.permute.xlu0 %2085  ;;  %v2187_v43 = vmul.f32 %v3222_v41, %v2179_v22  ;;  %v2188_v59 = vmul.f32 %v3295_v63, %v2180_v10 }
 0x8b7   : > { %v2219_v44 = vsel %vm1146_vm8, %v3938_v35, %v2212_v49  ;;  %v2223_v47 = vsel %vm1146_vm8, %v2212_v49, %v3938_v35  ;;  %p2646_p13 = pneg %p2645_p12 }
 0x8b8   : > { %v2003_v18 = vadd.f32 %v1995_v31, %v1971_v20  ;;  %v2004_v2 = vadd.f32 %v1996_v28, %v1972_v25  ;;  %v2243_v14 = vmul.f32 %v3906_v30, %v2219_v44  ;;  %v2244_v55 = vmul.f32 %v3906_v30, %v2223_v47 }
 0x8b9   : > { %v1740_v20 = vsel %vm776_vm7, %v1730_v21, %v3928_v58  ;;  %p2653_p3 = pnand %p2652_p2, %p2646_p13 }
 0x8ba   : > { %v2067_v17 = vadd.f32 %v2059_v1, %v2003_v18  ;;  %v2068_v8 = vadd.f32 %v2060_v16, %v2004_v2  ;;  %v1790_v34 = vpop.permute.xlu1 %1789  ;;  %v2251_v51 = vmul.f32 %v3309_v0, %v2243_v14  ;;  %v2252_v35 = vmul.f32 %v3312_v53, %v2244_v55  ;;  %v4027_v28 = vpop.permute.xlu0 %2149 }
 0x8bb   : > { %v1765_v1 = vmul.f32 %v3741_v40, %v1740_v20  ;;  %v1997_v20 = vmul.f32 %v3749_v52, %v3747_v23 }
 0x8bc   : > { %v2131_v26 = vadd.f32 %v2123_v7, %v2067_v17  ;;  %v2132_v9 = vadd.f32 %v2124_v42, %v2068_v8 }
 0x8bd   : > { %v1773_v2 = vmul.f32 %v4583_v29, %v1765_v1 }
 0x8be   : > { %v2195_v57 = vadd.f32 %v2187_v43, %v2131_v26  ;;  %v2196_v37 = vadd.f32 %v2188_v59, %v2132_v9  ;;  %v1854_v38 = vpop.permute.xlu1 %1853  ;;  %v4032_v25 = vpop.permute.xlu0 %2213 }
 0x8bf   : > { %v1781_v47 = vadd.f32 %v1773_v2, %v3717_v54 }
 0x8c0   : > { %v4023_v27 = vadd.f32 %v2251_v51, %v2195_v57  ;;  %v4025_v31 = vadd.f32 %v2252_v35, %v2196_v37  ;;  %v1736_v57 = vsel %vm776_vm7, %v3928_v58, %v1730_v21 }
 0x8c1   : > { %v1766_v1 = vmul.f32 %v3741_v40, %v1736_v57 }
 0x8c2   : > { %v1918_v30 = vpop.permute.xlu1 %1917  ;;  %v4038_v22 = vpop.permute.xlu0 %1855  ;;  %v2272_v57 = vmul.f32 0.044715, %v4025_v31 }
 0x8c6   : > { %v2014_v49 = vpop.permute.xlu1 %2013  ;;  %v4046_v8 = vpop.permute.xlu0 %1799 }
 0x8ca   : > { %v1798_v16 = vpop.permute.xlu1 %1797 }
 0x8cb   : > { %v1808_v18 = vsel %vm828_vm14, %v1798_v16, %v1790_v34  ;;  %v1804_v35 = vsel %vm828_vm14, %v1790_v34, %v1798_v16  ;;  %v1774_v34 = vmul.f32 %v4584_v15, %v1766_v1 }
 0x8cc   : > { %v1829_v10 = vmul.f32 %v3709_v61, %v1808_v18  ;;  %v4061_v18 = vpop.permute.xlu0 %1863 }
 0x8ce   : > { %v1837_v7 = vmul.f32 %v3137_v45, %v1829_v10  ;;  %v1862_v42 = vpop.permute.xlu1 %1861 }
 0x8cf   : > { %v1872_v44 = vsel %vm877_vm15, %v1862_v42, %v1854_v38  ;;  %v1868_v10 = vsel %vm877_vm15, %v1854_v38, %v1862_v42 }
 0x8d0   : > { %v1893_v17 = vmul.f32 %v3725_v4, %v1872_v44  ;;  %v1845_v14 = vadd.f32 %v1837_v7, %v1781_v47  ;;  %v1830_v7 = vmul.f32 %v3709_v61, %v1804_v35  ;;  %v1894_v23 = vmul.f32 %v3725_v4, %v1868_v10  ;;  %v4073_v16 = vpop.permute.xlu0 %1927 }
 0x8d1   : > { %v1782_v61 = vadd.f32 %v1774_v34, %v3717_v54  ;;  %v1998_v35 = vmul.f32 %v3749_v52, %v3777_v19  ;;  %v2276_v19 = vmul.f32 %v2272_v57, %v4025_v31 }
 0x8d2   : > { %v1901_v55 = vmul.f32 %v3150_v24, %v1893_v17  ;;  %v1926_v26 = vpop.permute.xlu1 %1925  ;;  %v1838_v40 = vmul.f32 %v3142_v60, %v1830_v7  ;;  %v1902_v38 = vmul.f32 %v3153_v32, %v1894_v23  ;;  %v4615_v7 = vld [vmem:[#allocation11_spill] sm:$0xff] }
 0x8d3   : > { %v1936_v9 = vsel %vm926_vm4, %v1926_v26, %v1918_v30  ;;  %v1932_v44 = vsel %vm926_vm4, %v1918_v30, %v1926_v26  ;;  %v4616_v23 = vld [vmem:[#allocation35_spill] sm:$0xff] }
 0x8d4   : > { %v1909_v43 = vadd.f32 %v1901_v55, %v1845_v14  ;;  %v1957_v59 = vmul.f32 %v3797_v56, %v1936_v9  ;;  %v1958_v47 = vmul.f32 %v3797_v56, %v1932_v44  ;;  %v1846_v42 = vadd.f32 %v1838_v40, %v1782_v61  ;;  %v4085_v26 = vpop.permute.xlu0 %2023 }
 0x8d5   : > { %v2271_v9 = vmul.f32 0.044715, %v4023_v27 }
 0x8d6   : > { %v1965_v37 = vmul.f32 %v3164_v36, %v1957_v59  ;;  %v2022_v51 = vpop.permute.xlu1 %2021  ;;  %v1966_v14 = vmul.f32 %v3174_v3, %v1958_v47  ;;  %v1910_v55 = vadd.f32 %v1902_v38, %v1846_v42  ;;  %v2280_v42 = vmul.f32 %v2276_v19, %v4025_v31 }
 0x8d7   : > { %v2032_v4 = vsel %vm999_vm5, %v2022_v51, %v2014_v49  ;;  %v2028_v56 = vsel %vm999_vm5, %v2014_v49, %v2022_v51  ;;  %v2092_v49 = vsel %vm1048_vm9, %v3936_v46, %v4015_v48  ;;  %v2275_v51 = vmul.f32 %v2271_v9, %v4023_v27 }
 0x8d8   : > { %v1973_v2 = vadd.f32 %v1965_v37, %v1909_v43  ;;  %v1974_v43 = vadd.f32 %v1966_v14, %v1910_v55  ;;  %v2054_v54 = vmul.f32 %v3837_v33, %v2032_v4  ;;  %v2053_v37 = vmul.f32 %v3837_v33, %v2028_v56  ;;  %v4106_v1 = vpop.permute.xlu0 %1725  ;;  %v4617_v4 = vld [vmem:[#allocation29_spill] sm:$0xff] }
 0x8d9   : > { %v2117_v34 = vmul.f32 %v4615_v7, %v2092_v49  ;;  %v2279_v61 = vmul.f32 %v2275_v51, %v4023_v27  ;;  %v4618_v51 = vld [vmem:[#allocation14_spill] sm:$0xff] }
 0x8da   : > { %v2005_v58 = vadd.f32 %v1997_v20, %v1973_v2  ;;  %v4066_v21 = vpop.permute.xlu1 %1723  ;;  %v2096_v20 = vsel %vm1048_vm9, %v4015_v48, %v3936_v46  ;;  %v2006_v2 = vadd.f32 %v1998_v35, %v1974_v43  ;;  %v2062_v33 = vmul.f32 %v3192_v12, %v2054_v54 }
 0x8db   : > { %v2061_v52 = vmul.f32 %v3179_v39, %v2053_v37  ;;  %v2118_v44 = vmul.f32 %v4615_v7, %v2096_v20  ;;  %v2160_v46 = vsel %vm1097_vm11, %v4027_v28, %v4616_v23  ;;  %v2156_v48 = vsel %vm1097_vm11, %v4616_v23, %v4027_v28 }
 0x8dc   : > { %v2070_v40 = vadd.f32 %v2062_v33, %v2006_v2  ;;  %v2182_v55 = vmul.f32 %v4617_v4, %v2160_v46  ;;  %v4129_v56 = vpop.permute.xlu0 %2081  ;;  %v2125_v9 = vmul.f32 %v3195_v13, %v2117_v34  ;;  %v2181_v43 = vmul.f32 %v4617_v4, %v2156_v48 }
 0x8dd   : > { %v2069_v38 = vadd.f32 %v2061_v52, %v2005_v58  ;;  %v2126_v14 = vmul.f32 %v3217_v5, %v2118_v44  ;;  %v2224_v28 = vsel %vm1146_vm8, %v4032_v25, %v3968_v62  ;;  %v2220_v58 = vsel %vm1146_vm8, %v3968_v62, %v4032_v25 }
 0x8de   : > { %v4076_v17 = vpop.permute.xlu1 %1791  ;;  %v2283_v37 = vadd.f32 %v2279_v61, %v4023_v27  ;;  %v2284_v20 = vadd.f32 %v2280_v42, %v4025_v31  ;;  %v2190_v49 = vmul.f32 %v3295_v63, %v2182_v55  ;;  %v2246_v2 = vmul.f32 %v4618_v51, %v2224_v28 }
 0x8df   : > { %v2134_v54 = vadd.f32 %v2126_v14, %v2070_v40  ;;  %v2133_v35 = vadd.f32 %v2125_v9, %v2069_v38  ;;  %v2189_v33 = vmul.f32 %v3222_v41, %v2181_v43  ;;  %v2245_v52 = vmul.f32 %v4618_v51, %v2220_v58  ;;  %v4619_v58 = vld [vmem:[#allocation15_spill] sm:$0xff] }
 0x8e0   : > { %v4147_v7 = vpop.permute.xlu0 %2145  ;;  %v2287_v62 = vmul.f32 0.7978846, %v2283_v37  ;;  %v2288_v34 = vmul.f32 0.7978846, %v2284_v20  ;;  %v2254_v23 = vmul.f32 %v3312_v53, %v2246_v2  ;;  %v1873_v9 = vsel %vm877_vm15, %v4061_v18, %v4038_v22  ;;  %v4620_v37 = vld [vmem:[#allocation18_spill] sm:$0xff]  ;;  %v4621_v20 = vld [vmem:[#allocation13_spill] sm:$0xff] }
 0x8e1   : > { %v2198_v19 = vadd.f32 %v2190_v49, %v2134_v54  ;;  %v2197_v25 = vadd.f32 %v2189_v33, %v2133_v35  ;;  %v2253_v46 = vmul.f32 %v3309_v0, %v2245_v52  ;;  %v1869_v28 = vsel %vm877_vm15, %v4038_v22, %v4061_v18  ;;  %v4622_v33 = vld [vmem:[#allocation21_spill] sm:$0xff]  ;;  %v4623_v52 = vld [vmem:[#allocation27_spill] sm:$0xff] }
 0x8e2   : > { %v4081_v30 = vpop.permute.xlu1 %1919  ;;  %2633 = vtanh.f32 %v2287_v62  ;;  %v4182_v35 = vmul.f32 %v4620_v37, %v3804_v6  ;;  %v1895_v49 = vmul.f32 %v4621_v20, %v1873_v9  ;;  %v4191_v18 = vmul.f32 %v4620_v37, %v3815_v11  ;;  %v4625_v11 = vld [vmem:[#allocation17_spill] sm:$0xff] }
 0x8e3   : > { %v2262_v48 = vadd.f32 %v2254_v23, %v2198_v19  ;;  %v4155_v61 = vadd.f32 %v2253_v46, %v2197_v25  ;;  %2635 = vtanh.f32 %v2288_v34  ;;  %v4195_v19 = vmul.f32 %v4623_v52, %v4622_v33  ;;  %v4624_v34 = vld [vmem:[#allocation25_spill] sm:$0xff] }
 0x8e4   : > { %v1734_v38 = vpop.permute.xlu0 %1733  ;;  %v1896_v62 = vmul.f32 %v4621_v20, %v1869_v28  ;;  %v4201_v23 = vmul.f32 %v4623_v52, %v4624_v34  ;;  %v1805_v46 = vsel %vm828_vm14, %v4076_v17, %v4046_v8 }
 0x8e5   : > { %v2274_v55 = vmul.f32 0.044715, %v2262_v48  ;;  %v2273_v43 = vmul.f32 0.044715, %v4155_v61  ;;  %v1738_v9 = vsel %vm776_vm7, %v4106_v1, %v1734_v38 }
 0x8e6   : > { %v4091_v59 = vpop.permute.xlu1 %2015  ;;  %v1904_v20 = vmul.f32 %v3153_v32, %v1896_v62  ;;  %v4629_v62 = vld [vmem:[#allocation24_spill] sm:$0xff] }
 0x8e7   : > { %v2278_v22 = vmul.f32 %v2274_v55, %v2262_v48  ;;  %v2277_v6 = vmul.f32 %v2273_v43, %v4155_v61  ;;  %v1742_v43 = vsel %vm776_vm7, %v1734_v38, %v4106_v1  ;;  %v1832_v1 = vmul.f32 %v4625_v11, %v1805_v46 }
 0x8e8   : > { %v4185_v51 = vpop.permute.xlu0 %2209  ;;  %v1933_v38 = vsel %vm926_vm4, %v4081_v30, %v4073_v16 }
 0x8e9   : > { %v2282_v37 = vmul.f32 %v2278_v22, %v2262_v48 }
 0x8ea   : > { %v4109_v10 = vpop.permute.xlu1 %2079 }
 0x8ec   : > { %v2634_v25 = vpop.eup %2633  ;;  %v2090_v52 = vpop.permute.xlu0 %2089 }
 0x8ed   : > { %v2636_v55 = vpop.eup %2635  ;;  %v4238_v34 = vadd.f32 1.0, %v2634_v25 }
 0x8ee   : > { %v4123_v47 = vpop.permute.xlu1 %2143 }
 0x8f2   : > { %v1732_v57 = vpop.permute.xlu1 %1731 }
 0x8f3   : > { %v1737_v42 = vsel %vm776_vm7, %v4066_v21, %v1732_v57  ;;  %v1741_v14 = vsel %vm776_vm7, %v1732_v57, %v4066_v21  ;;  %v1809_v21 = vsel %vm828_vm14, %v4046_v8, %v4076_v17  ;;  %v1903_v8 = vmul.f32 %v3150_v24, %v1895_v49 }
 0x8f4   : > { %v1767_v54 = vmul.f32 %v4619_v58, %v1741_v14  ;;  %v1768_v57 = vmul.f32 %v4619_v58, %v1737_v42  ;;  %v1831_v42 = vmul.f32 %v4625_v11, %v1809_v21  ;;  %v4209_v14 = vmul.f32 0.5, %v4023_v27  ;;  %v4630_v11 = vld [vmem:[#allocation10_spill] sm:$0xff] }
 0x8f5   : > { %v1937_v27 = vsel %vm926_vm4, %v4073_v16, %v4081_v30  ;;  %v4227_v21 = vmul.f32 0.5, %v4025_v31  ;;  %v4240_v31 = vadd.f32 1.0, %v2636_v55  ;;  %v1960_v16 = vmul.f32 %v4629_v62, %v1933_v38 }
 0x8f6   : > { %v4149_v44 = vpop.permute.xlu1 %2087  ;;  %4626 = vst [vmem:[#allocation11_spill] sm:$0xff] %v4209_v14  ;;  %v1775_v28 = vmul.f32 %v4583_v29, %v1767_v54  ;;  %v1776_v58 = vmul.f32 %v4584_v15, %v1768_v57  ;;  %v2281_v54 = vmul.f32 %v2277_v6, %v4155_v61  ;;  %v4628_v57 = vld [vmem:[#allocation12_spill] sm:$0xff]  ;;  %v1839_v22 = vmul.f32 %v3137_v45, %v1831_v42 }
 0x8f7   : > { %4627 = vst [vmem:[#allocation35_spill] sm:$0xff] %v4227_v21  ;;  %v1769_v49 = vmul.f32 %v4628_v57, %v1742_v43  ;;  %v1770_v33 = vmul.f32 %v4628_v57, %v1738_v9  ;;  %v1959_v46 = vmul.f32 %v4629_v62, %v1937_v27  ;;  %v2029_v30 = vsel %vm999_vm5, %v4091_v59, %v4085_v26 }
 0x8f8   : > { %v1783_v21 = vadd.f32 %v1775_v28, %v4630_v11  ;;  %v1784_v14 = vadd.f32 %v1776_v58, %v4630_v11  ;;  %v2033_v6 = vsel %vm999_vm5, %v4085_v26, %v4091_v59  ;;  %v2286_v42 = vadd.f32 %v2282_v37, %v2262_v48  ;;  %v4631_v37 = vld [vmem:[#allocation28_spill] sm:$0xff] }
 0x8f9   : > { %v1840_v55 = vmul.f32 %v3142_v60, %v1832_v1  ;;  %v2094_v9 = vsel %vm1048_vm9, %v4129_v56, %v2090_v52  ;;  %v4261_v43 = vmul.f32 0.5, %v2262_v48  ;;  %v2285_v28 = vadd.f32 %v2281_v54, %v4155_v61 }
 0x8fa   : > { %v4153_v40 = vpop.permute.xlu1 %2151  ;;  %v1777_v58 = vmul.f32 %v4583_v29, %v1769_v49  ;;  %v1778_v27 = vmul.f32 %v4584_v15, %v1770_v33  ;;  %v2098_v26 = vsel %vm1048_vm9, %v2090_v52, %v4129_v56  ;;  %v4270_v59 = vmul.f32 0.5, %v4155_v61  ;;  %v4632_v29 = vld [vmem:[#allocation30_spill] sm:$0xff]  ;;  %v2154_v15 = vpop.permute.xlu0 %2153  ;;  %v4633_v52 = vld [vmem:[#allocation20_spill] sm:$0xff] }
 0x8fb   : > { %v2055_v1 = vmul.f32 %v4631_v37, %v2029_v30  ;;  %v2056_v38 = vmul.f32 %v4631_v37, %v2033_v6  ;;  %v1847_v57 = vadd.f32 %v1839_v22, %v1783_v21  ;;  %v1848_v48 = vadd.f32 %v1840_v55, %v1784_v14 }
 0x8fc   : > { %v1967_v62 = vmul.f32 %v3164_v36, %v1959_v46  ;;  %v1968_v54 = vmul.f32 %v3174_v3, %v1960_v16  ;;  %v2121_v49 = vmul.f32 %v4632_v29, %v2094_v9  ;;  %v2290_v11 = vmul.f32 0.7978846, %v2286_v42  ;;  %v4634_v16 = vld [vmem:[#allocation19_spill] sm:$0xff] }
 0x8fd   : > { %v2122_v56 = vmul.f32 %v4632_v29, %v2098_v26  ;;  %v2289_v14 = vmul.f32 0.7978846, %v2285_v28  ;;  %v1785_v22 = vadd.f32 %v1777_v58, %v4633_v52  ;;  %v1786_v46 = vadd.f32 %v1778_v27, %v4633_v52  ;;  %v4643_v50 = vld [vmem:[#allocation11_spill] sm:$0xff] }
 0x8fe   : > { %v4163_v4 = vpop.permute.xlu1 %1793  ;;  %v2063_v42 = vmul.f32 %v3179_v39, %v2055_v1  ;;  %v2064_v55 = vmul.f32 %v3192_v12, %v2056_v38  ;;  %v1911_v9 = vadd.f32 %v1903_v8, %v1847_v57  ;;  %v1912_v26 = vadd.f32 %v1904_v20, %v1848_v48  ;;  %v2218_v1 = vpop.permute.xlu0 %2217 }
 0x8ff   : > { %v4291_v37 = vmul.f32 %v3195_v13, %v2121_v49  ;;  %v2162_v28 = vsel %vm1097_vm11, %v2154_v15, %v4147_v7  ;;  %2637 = vtanh.f32 %v2290_v11  ;;  %v4300_v27 = vmul.f32 %v3217_v5, %v2122_v56  ;;  %v4636_v49 = vld [vmem:[#allocation31_spill] sm:$0xff] }
 0x900   : > { %2639 = vtanh.f32 %v2289_v14  ;;  %v1975_v11 = vadd.f32 %v1967_v62, %v1911_v9  ;;  %v1976_v56 = vadd.f32 %v1968_v54, %v1912_v26  ;;  %v2222_v62 = vsel %vm1146_vm8, %v4185_v51, %v2218_v1  ;;  %v4638_v9 = vld [vmem:[#allocation26_spill] sm:$0xff] }
 0x901   : > { %v2226_v54 = vsel %vm1146_vm8, %v2218_v1, %v4185_v51  ;;  %v4639_v1 = vld [vmem:[#allocation22_spill] sm:$0xff] }
 0x902   : > { %v4187_v2 = vpop.permute.xlu1 %1857 }
 0x906   : > { %v4224_v17 = vpop.permute.xlu1 %1921 }
 0x90a   : > { %v4255_v25 = vpop.permute.xlu1 %2017 }
 0x90e   : > { %v1802_v33 = vpop.permute.xlu1 %1801 }
 0x90f   : > { %v1806_v61 = vsel %vm828_vm14, %v4163_v4, %v1802_v33  ;;  %v1810_v21 = vsel %vm828_vm14, %v1802_v33, %v4163_v4  ;;  %v2158_v4 = vsel %vm1097_vm11, %v4147_v7, %v2154_v15  ;;  %v4635_v7 = vld [vmem:[#allocation23_spill] sm:$0xff]  ;;  %v2186_v33 = vmul.f32 %v4636_v49, %v2162_v28 }
 0x910   : > { %v1833_v30 = vmul.f32 %v4634_v16, %v1810_v21  ;;  %v1834_v6 = vmul.f32 %v4634_v16, %v1806_v61  ;;  %v2185_v15 = vmul.f32 %v4636_v49, %v2158_v4 }
 0x912   : > { %v1866_v58 = vpop.permute.xlu1 %1865  ;;  %v1841_v38 = vmul.f32 %v3137_v45, %v1833_v30  ;;  %v1842_v57 = vmul.f32 %v3142_v60, %v1834_v6  ;;  %v2097_v45 = vsel %vm1048_vm9, %v4149_v44, %v4109_v10  ;;  %v2007_v30 = vadd.f32 %v4182_v35, %v1975_v11 }
 0x913   : > { %v1870_v8 = vsel %vm877_vm15, %v4187_v2, %v1866_v58  ;;  %v1874_v20 = vsel %vm877_vm15, %v1866_v58, %v4187_v2  ;;  %v2093_v2 = vsel %vm1048_vm9, %v4109_v10, %v4149_v44  ;;  %v2008_v6 = vadd.f32 %v4191_v18, %v1976_v56 }
 0x914   : > { %v1897_v48 = vmul.f32 %v4635_v7, %v1874_v20  ;;  %v1898_v29 = vmul.f32 %v4635_v7, %v1870_v8  ;;  %v1850_v44 = vadd.f32 %v1842_v57, %v1786_v46  ;;  %v2119_v51 = vmul.f32 %v4638_v9, %v2093_v2 }
 0x915   : > { %v2120_v26 = vmul.f32 %v4638_v9, %v2097_v45  ;;  %v2157_v46 = vsel %vm1097_vm11, %v4123_v47, %v4153_v40  ;;  %v2161_v35 = vsel %vm1097_vm11, %v4153_v40, %v4123_v47  ;;  %v2071_v40 = vadd.f32 %v2063_v42, %v2007_v30 }
 0x916   : > { %v1905_v60 = vmul.f32 %v3150_v24, %v1897_v48  ;;  %v1906_v61 = vmul.f32 %v3153_v32, %v1898_v29  ;;  %v1930_v21 = vpop.permute.xlu1 %1929  ;;  %v1849_v24 = vadd.f32 %v1841_v38, %v1785_v22  ;;  %v4637_v32 = vld [vmem:[#allocation16_spill] sm:$0xff]  ;;  %v4640_v48 = vld [vmem:[#allocation34_spill] sm:$0xff]  ;;  %v2072_v49 = vadd.f32 %v2064_v55, %v2008_v6  ;;  %v4642_v6 = vld [vmem:[#allocation33_spill] sm:$0xff] }
 0x917   : > { %v1934_v14 = vsel %vm926_vm4, %v4224_v17, %v1930_v21  ;;  %v1938_v10 = vsel %vm926_vm4, %v1930_v21, %v4224_v17  ;;  %v2249_v29 = vmul.f32 %v4640_v48, %v2222_v62  ;;  %v2250_v47 = vmul.f32 %v4640_v48, %v2226_v54  ;;  %v4641_v21 = vld [vmem:[#allocation32_spill] sm:$0xff]  ;;  %v4645_v48 = vld [vmem:[#allocation9_spill] sm:$0xff] }
 0x918   : > { %v1961_v52 = vmul.f32 %v4637_v32, %v1938_v10  ;;  %v1962_v16 = vmul.f32 %v4637_v32, %v1934_v14  ;;  %v1913_v4 = vadd.f32 %v1905_v60, %v1849_v24  ;;  %v1914_v28 = vadd.f32 %v1906_v61, %v1850_v44 }
 0x919   : > { %v2127_v60 = vmul.f32 %v3195_v13, %v2119_v51  ;;  %v2128_v61 = vmul.f32 %v3217_v5, %v2120_v26  ;;  %v2183_v14 = vmul.f32 %v4641_v21, %v2157_v46  ;;  %v2184_v62 = vmul.f32 %v4641_v21, %v2161_v35  ;;  %v4644_v46 = vld [vmem:[#allocation35_spill] sm:$0xff] }
 0x91a   : > { %v1969_v58 = vmul.f32 %v3164_v36, %v1961_v52  ;;  %v1970_v17 = vmul.f32 %v3174_v3, %v1962_v16  ;;  %v2026_v22 = vpop.permute.xlu1 %2025  ;;  %v2638_v3 = vpop.eup %2637  ;;  %v2193_v42 = vmul.f32 %v3222_v41, %v2185_v15  ;;  %v2194_v55 = vmul.f32 %v3295_v63, %v2186_v33 }
 0x91b   : > { %v2030_v18 = vsel %vm999_vm5, %v4255_v25, %v2026_v22  ;;  %v2034_v36 = vsel %vm999_vm5, %v2026_v22, %v4255_v25  ;;  %v2640_v7 = vpop.eup %2639  ;;  %v2136_v10 = vadd.f32 %v2128_v61, %v2072_v49  ;;  %v2258_v13 = vmul.f32 %v3312_v53, %v2250_v47 }
 0x91c   : > { %v1977_v8 = vadd.f32 %v1969_v58, %v1913_v4  ;;  %v1978_v20 = vadd.f32 %v1970_v17, %v1914_v28  ;;  %v2057_v38 = vmul.f32 %v4639_v1, %v2030_v18  ;;  %v2058_v57 = vmul.f32 %v4639_v1, %v2034_v36 }
 0x91d   : > { %v2297_v24 = vadd.f32 1.0, %v2640_v7  ;;  %v2191_v52 = vmul.f32 %v3222_v41, %v2183_v14  ;;  %v2192_v15 = vmul.f32 %v3295_v63, %v2184_v62  ;;  %v2299_v22 = vmul.f32 %v4238_v34, %v4643_v50 }
 0x91e   : > { %v2009_v11 = vadd.f32 %v4195_v19, %v1977_v8  ;;  %v2010_v56 = vadd.f32 %v4201_v23, %v1978_v20  ;;  %v2065_v25 = vmul.f32 %v3179_v39, %v2057_v38  ;;  %v2066_v2 = vmul.f32 %v3192_v12, %v2058_v57  ;;  %v2208_v45 = vpop.permute.xlu1 %2207 }
 0x91f   : > { %v2135_v23 = vadd.f32 %v2127_v60, %v2071_v40  ;;  %v2298_v39 = vadd.f32 1.0, %v2638_v3  ;;  %v2257_v12 = vmul.f32 %v3309_v0, %v2249_v29  ;;  %v2200_v4 = vadd.f32 %v2192_v15, %v2136_v10  ;;  %v4646_v40 = vld [vmem:[#allocation8_spill] sm:$0xff] }
 0x920   : > { %v2073_v19 = vadd.f32 %v2065_v25, %v2009_v11  ;;  %v2074_v54 = vadd.f32 %v2066_v2, %v2010_v56  ;;  %v2301_v41 = vmul.f32 %v2297_v24, %v4270_v59  ;;  %v2300_v35 = vmul.f32 %v4240_v31, %v4644_v46 }
 0x922   : > { %v2137_v5 = vadd.f32 %v4291_v37, %v2073_v19  ;;  %v2138_v44 = vadd.f32 %v4300_v27, %v2074_v54  ;;  %v2216_v32 = vpop.permute.xlu1 %2215  ;;  %v2199_v37 = vadd.f32 %v2191_v52, %v2135_v23  ;;  %v2302_v27 = vmul.f32 %v2298_v39, %v4261_v43 }
 0x923   : > { %v2221_v33 = vsel %vm1146_vm8, %v2208_v45, %v2216_v32  ;;  %v2225_v16 = vsel %vm1146_vm8, %v2216_v32, %v2208_v45 }
 0x924   : > { %v2201_v30 = vadd.f32 %v2193_v42, %v2137_v5  ;;  %v2247_v9 = vmul.f32 %v4642_v6, %v2221_v33  ;;  %v2248_v51 = vmul.f32 %v4642_v6, %v2225_v16  ;;  %v2202_v26 = vadd.f32 %v2194_v55, %v2138_v44 }
 0x926   : > { %v2255_v63 = vmul.f32 %v3309_v0, %v2247_v9  ;;  %v2256_v28 = vmul.f32 %v3312_v53, %v2248_v51  ;;  %v2266_v58 = vadd.f32 %v2258_v13, %v2202_v26  ;;  %v2265_v17 = vadd.f32 %v2257_v12, %v2201_v30  ;;  %v2303_v53 = vld [vmem:[%s4458_s14] sm:$0xf] }
 0x928   : > { %v2263_v18 = vadd.f32 %v2255_v63, %v2199_v37  ;;  %v2264_v36 = vadd.f32 %v2256_v28, %v2200_v4  ;;  %v2307_v3 = vmul.f32 %v2302_v27, %v2266_v58  ;;  %v2306_v8 = vmul.f32 %v2301_v41, %v2265_v17 }
 0x92a   : > { %v2304_v43 = vmul.f32 %v2299_v22, %v2263_v18  ;;  %v2305_v59 = vmul.f32 %v2300_v35, %v2264_v36 }
 0x92c   : > { %v2309_v20 = vpack.c.bf16 %v2307_v3, %v2305_v59  ;;  %v2308_v0 = vpack.c.bf16 %v2306_v8, %v2304_v43 }
 0x92e   : > { %2320 = vmatprep.subr.bf16.mxu0 %v2309_v20 }
 0x92f   : > { %2321 = vmatpush1.bf16.msra.mxu0 %v2308_v0 }
 0x932   : > { %2480 = vmatmul.mubr.msk.bf16.vlgmr.msra.gmra.mrb[16].mxu0 %vm2316_vm0, %v2303_v53 }
 0x933   : > { %v2314_v34 = vpop.permute.xlu1 %2313 }
 0xa05   : > { %v2354_v31 = vpop.f32.mrb[16].mxu0 }
 0xa06   : > { %v2355_v1 = vadd.f32 %v2354_v31, %v2314_v34  ;;  %v2356_v38 = vpop.f32.mrb[17].mxu0 }
 0xa07   : > { %v2357_v57 = vadd.f32 %v2356_v38, %v2314_v34  ;;  %v2358_v7 = vpop.f32.mrb[18].mxu0 }
 0xa08   : > { %v2361_v29 = vadd.f32 %v2355_v1, %v4645_v48  ;;  %v2359_v47 = vpop.f32.mrb[19].mxu0 }
 0xa09   : > { %v2362_v49 = vadd.f32 %v2357_v57, %v4646_v40 }
 0xa0a   : > { %2363 = vst [vmem:[%s514_s18] sm:$0xff] %v2361_v29 }
 0xa0b   : > { %2364 = vst [vmem:[%s514_s18 + $0x8] sm:$0xff] %v2362_v49 }
 0xa0c   : > { %2656 = shalt.err (!%p2653_p3)
}
 0xa0d   : > { %s2657_s27 = scalar_lea.hbm %s4402_s3, 256  ;;  %s2661_s30 = scalar_lea.hbm %s4460_s16, 512 }
 0xa0e   : > { %p2658_p4 = scmp.ne.s32.totalorder %s4402_s3, %s2657_s27  ;;  %p2662_p9 = scmp.lt.u32.totalorder %s4402_s3, %s4460_s16 }
 0xa0f   : > { %p2663_p10 = scmp.lt.u32.totalorder %s2661_s30, %s2657_s27  ;;  %p2665_p12 = scmp.lt.u32.totalorder %s2657_s27, %s4402_s3 }
 0xa10   : > { %p2659_p7 = pnand %p2658_p4, %p2849_p5 }
 0xa11   : > { %p2664_p11 = por %p2663_p10, %p2662_p9 }
 0xa12   : > { %p2660_p8 = pneg %p2659_p7 }
 0xa13   : > { %p2666_p13 = por %p2665_p12, %p2664_p11 }
 0xa15   : > { %p2667_p0 = pnand %p2666_p13, %p2660_p8 }
 0xa17   : > { %2670 = shalt.err (!%p2667_p0)
}
 0xa18   : > { %2488 = dma.vmem_to_hbm [thread:$0]  (%p2849_p5), %s4404_s20, 256, %s4402_s3, %s2366_s25  }
 0xa19 PF: > { %p2494_p1 = scmp.ge.s32.totalorder %s2705_s24, 2  ;;  %s2392_s26 = sand.u32 1, %s2693_s21  }
 0xa1a   : > { %s2393_s28 = scalar_lea.sflag [#allocation3], %s2392_s26 }
 0xa1b   : > { %p2491_p2 = pnand %p2494_p1, %p2853_p6 }
 0xa1d   : > { %2688 = dma.done.wait (!%p2491_p2), %s2393_s28, 256  }
 0xa1e   : > { %2690 = vsyncadd (!%p2491_p2), %s2393_s28, 4294967040  ;;  %s4647_s24 = sld [smem:[#allocation6_spill]]  ;;  %s4648_s18 = sld [smem:[#allocation5_spill]] }
 0xa1f   : > { %s4649_s23 = sld [smem:[#allocation7_spill]]  ;;  %s4650_s21 = smov %s2697_s22 }
 0xa24   : > { %p26_p3 = scmp.ge.s32.totalorder %s4647_s24, 4   ;;  %s4651_s22 = smov %s4648_s18 }
 0xa26   :  { %28 = sbr.rel (!%p26_p3) target bundleno = 13 (0xd), region = 121 }
 0xa2d   :  { %2398 = vsyncpa [#allocation3], 1 }
 0xa2e   :  { %2400 = vsyncpa [#allocation3 + $0x1], 1 }

</bundles_post_ra>
